<compile_context>
chip_gen: v5e
topology: v5e:2x2
jax: 0.10.0
libtpu: 0.0.40
codegen_flags: <defaults>
</compile_context>

<pallas_src>
import functools

import jax
import jax.numpy as jnp
from jax.experimental import pallas as pl
from jax.experimental.pallas import tpu as pltpu


# ----------------------------------------------------------------------------
# Fused kernel: conv1 + LeakyReLU + conv2 + LeakyReLU + Flatten + Linear
# ----------------------------------------------------------------------------
def _discriminator_kernel(x1_ref, w1_ref, b1_ref, w2_ref, b2_ref, w3_ref,
                          b3_ref, o_ref, phase_ref, *, tb, chunk_ow):
    # x1_ref   : (14, 7, tb, 64)  bf16  conv1 im2col, K=64 = [even|odd] column
    #            pair of 25-tap patches (each zero-padded to 32), batch next
    #            to the K/lane dim.
    # w1_ref   : (64, 128) bf16   block-diag conv1 weight.   b1_ref: (1,128) f32
    # w2_ref   : (5, 3, 128, 128) bf16 combined conv2 taps.  b2_ref: (1,128) f32
    # w3_ref   : (8, 8, 128) f32  Linear weight in HWC order, zero-padded 7->8.
    # b3_ref   : (1, 1) f32
    # o_ref    : (tb, 1) f32 logits
    # phase_ref: (10, 2, 10, tb, 128) bf16 scratch: padded conv1 output,
    #            [r, row-parity, col-pair, batch, (even|odd)*64ch].
    f32 = jnp.float32

    # Padding regions of the phase scratch must read as zeros every step
    # (scratch persists across grid steps / cores).  Data region is fully
    # overwritten by conv1 below.
    phase_ref[...] = jnp.zeros_like(phase_ref)

    # ---------------- conv1: 14 rows, each one (7*tb,64)@(64,128) matmul ----
    for oh1 in range(14):
        lhs1 = x1_ref[oh1].reshape(7 * tb, 64)                     # (7tb, 64)
        h = jnp.dot(lhs1, w1_ref[...], preferred_element_type=f32)
        h = h + b1_ref[...]
        h = jnp.maximum(h, 0.3 * h)                                # LeakyReLU(0.3)
        # TODO(synk): nn.Dropout(0.3) is identity here (eval semantics).
        phase_ref[oh1 // 2 + 1, oh1 % 2, 1:8, :, :] = (
            h.astype(jnp.bfloat16).reshape(7, tb, 128))

    # ---------------- conv2 + LeakyReLU + fused Linear ----------------------
    # 15 combined taps (di, rj): row-parity pr = di % 2, row shift ri = di//2,
    # column-pair shift rj; both column parities folded into the K=128 dim.
    taps = [(di % 2, di // 2, rj) for di in range(5) for rj in range(3)]
    n_sub = 8 // chunk_ow

    o_ref[...] = jnp.broadcast_to(b3_ref[...], (tb, 1))            # Linear bias

    @pl.loop(0, 7)                       # output rows 0..6 (row 7 would be x0)
    def _conv2_row(oh):
        for sub in range(n_sub):         # M-chunks keep the f32 acc ~16 vregs
            c0 = sub * chunk_ow
            acc = jnp.zeros((chunk_ow * tb, 128), f32)
            for pr, ri, rj in taps:
                lhs = phase_ref[oh + ri, pr, rj + c0:rj + c0 + chunk_ow, :, :]
                lhs = lhs.reshape(chunk_ow * tb, 128)              # free reshape
                acc = acc + jnp.dot(lhs, w2_ref[2 * ri + pr, rj],
                                    preferred_element_type=f32)
            acc = acc + b2_ref[...]
            acc = jnp.maximum(acc, 0.3 * acc)                      # LeakyReLU(0.3)
            # TODO(synk): second nn.Dropout(0.3) is identity (eval semantics).
            # Fused Flatten + Linear: multiply by matching w3 rows and reduce.
            # (w3 is zero at the padded 8th output column, masking garbage.)
            w3c = w3_ref[oh, pl.ds(c0, chunk_ow), :]               # (chunk_ow,128)
            prod = acc.reshape(chunk_ow, tb, 128) * w3c[:, None, :]
            part = jnp.sum(jnp.sum(prod, axis=2, keepdims=True), axis=0)
            o_ref[...] += part                                     # (tb, 1)


def _pick_tb(batch):
    # >=2 grid steps for realistic batches (v7x megacore), tb multiple of 16.
    if batch >= 256:
        return 64
    if batch >= 64:
        return 32
    return 16


def discriminator_forward(kparams, x_nchw):
    """x_nchw: (B, 1, 28, 28) f32 -> (B, 1) f32 logits (Dropout = identity)."""
    B = x_nchw.shape[0]
    assert x_nchw.shape[1:] == (1, 28, 28), x_nchw.shape
    tb = _pick_tb(B)
    chunk_ow = max(1, min(8, 128 // tb))
    assert 8 % chunk_ow == 0
    Bp = pl.cdiv(B, tb) * tb
    grid_b = Bp // tb

    # ---- cheap JAX-side im2col for conv1 (Cin=1, K=25 -> pair-packed 64) ----
    x = jnp.transpose(x_nchw, (0, 2, 3, 1)).astype(jnp.bfloat16)   # (B,28,28,1)
    xp = jnp.pad(x, ((0, 0), (2, 2), (2, 2), (0, 0)))              # (B,32,32,1)
    cols = [xp[:, di:di + 28:2, dj:dj + 28:2, 0]
            for di in range(5) for dj in range(5)]
    patches = jnp.stack(cols, axis=-1)                             # (B,14,14,25)
    patches = jnp.pad(patches, ((0, 0), (0, 0), (0, 0), (0, 7)))   # K 25 -> 32
    patches = patches.reshape(B, 14, 7, 64)                        # pair-pack cols
    x1 = jnp.transpose(patches, (1, 2, 0, 3))                      # (14,7,B,64)
    if Bp != B:
        x1 = jnp.pad(x1, ((0, 0), (0, 0), (0, Bp - B), (0, 0)))

    kernel = functools.partial(_discriminator_kernel, tb=tb, chunk_ow=chunk_ow)
    cost = pl.CostEstimate(
        flops=Bp * (2 * 98 * 64 * 128 + 7 * 8 * 15 * 2 * 128 * 128),
        transcendentals=0,
        bytes_accessed=(x1.size * 2 + 64 * 128 * 2 + 5 * 3 * 128 * 128 * 2
                        + 8 * 8 * 128 * 4 + 2 * 128 * 4 + 4 + Bp * 4))
    out = pl.pallas_call(
        kernel,
        out_shape=jax.ShapeDtypeStruct((Bp, 1), jnp.float32),
        grid=(grid_b,),
        in_specs=[
            pl.BlockSpec((14, 7, tb, 64), lambda i: (0, 0, i, 0)),   # streamed
            pl.BlockSpec((64, 128), lambda i: (0, 0)),               # resident
            pl.BlockSpec((1, 128), lambda i: (0, 0)),
            pl.BlockSpec((5, 3, 128, 128), lambda i: (0, 0, 0, 0)),
            pl.BlockSpec((1, 128), lambda i: (0, 0)),
            pl.BlockSpec((8, 8, 128), lambda i: (0, 0, 0)),
            pl.BlockSpec((1, 1), lambda i: (0, 0)),
        ],
        out_specs=pl.BlockSpec((tb, 1), lambda i: (i, 0)),
        scratch_shapes=[pltpu.VMEM((10, 2, 10, tb, 128), jnp.bfloat16)],
        compiler_params=pltpu.CompilerParams(
            dimension_semantics=("parallel",)),
        cost_estimate=cost,
    )(x1, kparams["w1bd"], kparams["b1"], kparams["w2c"], kparams["b2"],
      kparams["w3"], kparams["b3"])
    return out[:B] if Bp != B else out


# ----------------------------------------------------------------------------
# Parameters (synthetic init in PyTorch layouts) + one-time kernel repack
# ----------------------------------------------------------------------------
def init_params(key):
    k1, k2, k3, k4, k5, k6 = jax.random.split(key, 6)
    return {
        "w1": jax.random.normal(k1, (5, 5, 1, 64), jnp.float32) * 0.1,   # HWIO
        "b1": jax.random.normal(k2, (64,), jnp.float32) * 0.01,
        "w2": jax.random.normal(k3, (5, 5, 64, 128), jnp.float32) * 0.02,
        "b2": jax.random.normal(k4, (128,), jnp.float32) * 0.01,
        # Linear weight rows in PyTorch NCHW-flatten order: idx = c*49 + h*7 + w
        "w3": jax.random.normal(k5, (128 * 7 * 7, 1), jnp.float32) * 0.01,
        "b3": jax.random.normal(k6, (1,), jnp.float32) * 0.01,
    }


def prepare_params(params):
    """One-time repack of PyTorch-layout params into kernel-ready layouts."""
    # conv1: block-diagonal weight so one matmul emits a lane-dense packed
    # pair of output columns ([even 64ch | odd 64ch]).
    w1 = jnp.pad(params["w1"].reshape(25, 64), ((0, 7), (0, 0)))     # (32, 64)
    w1bd = jnp.zeros((64, 128), jnp.float32)
    w1bd = w1bd.at[0:32, 0:64].set(w1).at[32:64, 64:128].set(w1)
    w1bd = w1bd.astype(jnp.bfloat16)
    b1 = jnp.concatenate([params["b1"], params["b1"]]).reshape(1, 128)
    b1 = b1.astype(jnp.float32)

    # conv2: combined tap (di, rj) stacks [W2[di,2rj]; W2[di,2rj+1]] along the
    # 128-wide contraction dim (dj=5 slot is zero).  bf16 for the MXU.
    w2p = jnp.pad(params["w2"], ((0, 0), (0, 1), (0, 0), (0, 0)))    # (5,6,64,128)
    w2c = w2p.reshape(5, 3, 128, 128).astype(jnp.bfloat16)
    b2 = params["b2"].reshape(1, 128).astype(jnp.float32)

    # Linear weight permuted from PyTorch (C,H,W)-flatten to (H,W,C) order and
    # zero-padded 7x7 -> 8x8: the kernel's extra 8th output column (computed
    # from the zero-padded region) is masked by these zero rows/cols.
    w3_hwc = jnp.transpose(params["w3"].reshape(128, 7, 7), (1, 2, 0))
    w3 = jnp.pad(w3_hwc, ((0, 1), (0, 1), (0, 0))).astype(jnp.float32)
    assert w3.shape == (8, 8, 128)
    assert float(jnp.max(jnp.abs(w3[7]))) == 0.0
    assert float(jnp.max(jnp.abs(w3[:, 7]))) == 0.0
    b3 = params["b3"].reshape(1, 1).astype(jnp.float32)
    return {"w1bd": w1bd, "b1": b1, "w2c": w2c, "b2": b2, "w3": w3, "b3": b3}


# ----------------------------------------------------------------------------
# Pure-JAX f32 reference (PyTorch semantics) for a correctness sanity check
# ----------------------------------------------------------------------------
def _reference_forward(params, x_nchw):
    def conv(x, w, b):
        y = jax.lax.conv_general_dilated(
            x, w, window_strides=(2, 2), padding=((2, 2), (2, 2)),
            dimension_numbers=("NHWC", "HWIO", "NHWC"))
        y = y + b
        return jnp.where(y >= 0, y, 0.3 * y)

    x = jnp.transpose(x_nchw, (0, 2, 3, 1))
    h = conv(x, params["w1"], params["b1"])
    h = conv(h, params["w2"], params["b2"])
    B = h.shape[0]
    h_flat = jnp.transpose(h, (0, 3, 1, 2)).reshape(B, -1)   # NCHW flatten
    return h_flat @ params["w3"] + params["b3"]


if __name__ == "__main__":
    key = jax.random.PRNGKey(0)
    pkey, xkey = jax.random.split(key)
    params = init_params(pkey)
    kparams = prepare_params(params)
    x = jax.random.normal(xkey, (2, 1, 28, 28), jnp.float32)   # batch = 2

    fwd = jax.jit(discriminator_forward)
    out = fwd(kparams, x)
    jax.block_until_ready(out)

    assert out.shape == (2, 1), out.shape
    ref = _reference_forward(params, x)
    assert jnp.allclose(out, ref, atol=5e-2, rtol=5e-2), (out, ref)

    print("KERNEL_OK")
</pallas_src>

<mosaic_0001>
module attributes {stable_mosaic.version = 11 : i64} {
  func.func @_discriminator_kernel(%arg0: i32, %arg1: memref<14x7x16x64xbf16, #tpu.memory_space<vmem>>, %arg2: memref<64x128xbf16, #tpu.memory_space<vmem>>, %arg3: memref<1x128xf32, #tpu.memory_space<vmem>>, %arg4: memref<5x3x128x128xbf16, #tpu.memory_space<vmem>>, %arg5: memref<1x128xf32, #tpu.memory_space<vmem>>, %arg6: memref<8x8x128xf32, #tpu.memory_space<vmem>>, %arg7: memref<1x1xf32, #tpu.memory_space<vmem>>, %arg8: memref<16x1xf32, #tpu.memory_space<vmem>>, %arg9: memref<10x2x10x16x128xbf16, #tpu.memory_space<vmem>>) attributes {dimension_semantics = [#tpu.dimension_semantics<parallel>], iteration_bounds = array<i64: 1>, scalar_prefetch = 0 : i64, scratch_operands = 1 : i64, tpu.core_type = #tpu.core_type<tc>, window_params = [{transform_indices = @transform_0, window_bounds = array<i64: 14, 7, 16, 64>}, {pipeline_mode = #tpu.pipeline_mode<synchronous>, transform_indices = @transform_1, window_bounds = array<i64: 64, 128>}, {pipeline_mode = #tpu.pipeline_mode<synchronous>, transform_indices = @transform_2, window_bounds = array<i64: 1, 128>}, {pipeline_mode = #tpu.pipeline_mode<synchronous>, transform_indices = @transform_3, window_bounds = array<i64: 5, 3, 128, 128>}, {pipeline_mode = #tpu.pipeline_mode<synchronous>, transform_indices = @transform_4, window_bounds = array<i64: 1, 128>}, {pipeline_mode = #tpu.pipeline_mode<synchronous>, transform_indices = @transform_5, window_bounds = array<i64: 8, 8, 128>}, {pipeline_mode = #tpu.pipeline_mode<synchronous>, transform_indices = @transform_6, window_bounds = array<i64: 1, 1>}, {transform_indices = @transform_7, window_bounds = array<i64: 16, 1>}]} {
    %cst = arith.constant 0.000000e+00 : bf16
    %0 = vector.broadcast %cst : bf16 to vector<10x2x10x16x128xbf16>
    %c0 = arith.constant 0 : index
    %c0_0 = arith.constant 0 : index
    %c0_1 = arith.constant 0 : index
    %c0_2 = arith.constant 0 : index
    %c0_3 = arith.constant 0 : index
    %1 = vector.load %arg9[%c0, %c0_0, %c0_1, %c0_2, %c0_3] : memref<10x2x10x16x128xbf16, #tpu.memory_space<vmem>>, vector<10x2x10x16x128xbf16>
    tpu.vector_store %arg9[%c0, %c0_0, %c0_1, %c0_2, %c0_3], %0 {strides = array<i32>} : memref<10x2x10x16x128xbf16, #tpu.memory_space<vmem>>, vector<10x2x10x16x128xbf16>,
    %c0_4 = arith.constant 0 : index
    %c0_5 = arith.constant 0 : index
    %c0_6 = arith.constant 0 : index
    %c0_7 = arith.constant 0 : index
    %2 = vector.load %arg1[%c0_4, %c0_5, %c0_6, %c0_7] : memref<14x7x16x64xbf16, #tpu.memory_space<vmem>>, vector<1x7x16x64xbf16>
    %3 = vector.shape_cast %2 : vector<1x7x16x64xbf16> to vector<7x16x64xbf16>
    %4 = vector.shape_cast %3 : vector<7x16x64xbf16> to vector<112x64xbf16>
    %c0_8 = arith.constant 0 : index
    %c0_9 = arith.constant 0 : index
    %5 = vector.load %arg2[%c0_8, %c0_9] : memref<64x128xbf16, #tpu.memory_space<vmem>>, vector<64x128xbf16>
    %cst_10 = arith.constant dense<0.000000e+00> : vector<112x128xf32>
    %6 = tpu.matmul %4, %5, %cst_10 {dimension_numbers = #tpu.dot_dimension_numbers<[1], [0], [0], [1], [0, 0, 1, 1], [], []>} : vector<112x64xbf16>, vector<64x128xbf16>, vector<112x128xf32> -> vector<112x128xf32>
    %c0_11 = arith.constant 0 : index
    %c0_12 = arith.constant 0 : index
    %7 = vector.load %arg3[%c0_11, %c0_12] : memref<1x128xf32, #tpu.memory_space<vmem>>, vector<1x128xf32>
    %8 = vector.broadcast %7 : vector<1x128xf32> to vector<112x128xf32>
    %9 = arith.addf %6, %8 : vector<112x128xf32>
    %cst_13 = arith.constant 3.000000e-01 : f32
    %10 = vector.broadcast %cst_13 : f32 to vector<112x128xf32>
    %11 = arith.mulf %10, %9 : vector<112x128xf32>
    %12 = arith.maximumf %9, %11 : vector<112x128xf32>
    %13 = arith.truncf %12 : vector<112x128xf32> to vector<112x128xbf16>
    %14 = vector.shape_cast %13 : vector<112x128xbf16> to vector<7x16x128xbf16>
    %c1 = arith.constant 1 : index
    %c0_14 = arith.constant 0 : index
    %c1_15 = arith.constant 1 : index
    %c0_16 = arith.constant 0 : index
    %c0_17 = arith.constant 0 : index
    %15 = vector.load %arg9[%c1, %c0_14, %c1_15, %c0_16, %c0_17] : memref<10x2x10x16x128xbf16, #tpu.memory_space<vmem>>, vector<1x1x7x16x128xbf16>
    %16 = vector.shape_cast %15 : vector<1x1x7x16x128xbf16> to vector<7x16x128xbf16>
    %17 = vector.shape_cast %14 : vector<7x16x128xbf16> to vector<1x1x7x16x128xbf16>
    tpu.vector_store %arg9[%c1, %c0_14, %c1_15, %c0_16, %c0_17], %17 {strides = array<i32>} : memref<10x2x10x16x128xbf16, #tpu.memory_space<vmem>>, vector<1x1x7x16x128xbf16>,
    %c1_18 = arith.constant 1 : index
    %c0_19 = arith.constant 0 : index
    %c0_20 = arith.constant 0 : index
    %c0_21 = arith.constant 0 : index
    %18 = vector.load %arg1[%c1_18, %c0_19, %c0_20, %c0_21] : memref<14x7x16x64xbf16, #tpu.memory_space<vmem>>, vector<1x7x16x64xbf16>
    %19 = vector.shape_cast %18 : vector<1x7x16x64xbf16> to vector<7x16x64xbf16>
    %20 = vector.shape_cast %19 : vector<7x16x64xbf16> to vector<112x64xbf16>
    %c0_22 = arith.constant 0 : index
    %c0_23 = arith.constant 0 : index
    %21 = vector.load %arg2[%c0_22, %c0_23] : memref<64x128xbf16, #tpu.memory_space<vmem>>, vector<64x128xbf16>
    %cst_24 = arith.constant dense<0.000000e+00> : vector<112x128xf32>
    %22 = tpu.matmul %20, %21, %cst_24 {dimension_numbers = #tpu.dot_dimension_numbers<[1], [0], [0], [1], [0, 0, 1, 1], [], []>} : vector<112x64xbf16>, vector<64x128xbf16>, vector<112x128xf32> -> vector<112x128xf32>
    %c0_25 = arith.constant 0 : index
    %c0_26 = arith.constant 0 : index
    %23 = vector.load %arg3[%c0_25, %c0_26] : memref<1x128xf32, #tpu.memory_space<vmem>>, vector<1x128xf32>
    %24 = vector.broadcast %23 : vector<1x128xf32> to vector<112x128xf32>
    %25 = arith.addf %22, %24 : vector<112x128xf32>
    %cst_27 = arith.constant 3.000000e-01 : f32
    %26 = vector.broadcast %cst_27 : f32 to vector<112x128xf32>
    %27 = arith.mulf %26, %25 : vector<112x128xf32>
    %28 = arith.maximumf %25, %27 : vector<112x128xf32>
    %29 = arith.truncf %28 : vector<112x128xf32> to vector<112x128xbf16>
    %30 = vector.shape_cast %29 : vector<112x128xbf16> to vector<7x16x128xbf16>
    %c1_28 = arith.constant 1 : index
    %c1_29 = arith.constant 1 : index
    %c1_30 = arith.constant 1 : index
    %c0_31 = arith.constant 0 : index
    %c0_32 = arith.constant 0 : index
    %31 = vector.load %arg9[%c1_28, %c1_29, %c1_30, %c0_31, %c0_32] : memref<10x2x10x16x128xbf16, #tpu.memory_space<vmem>>, vector<1x1x7x16x128xbf16>
    %32 = vector.shape_cast %31 : vector<1x1x7x16x128xbf16> to vector<7x16x128xbf16>
    %33 = vector.shape_cast %30 : vector<7x16x128xbf16> to vector<1x1x7x16x128xbf16>
    tpu.vector_store %arg9[%c1_28, %c1_29, %c1_30, %c0_31, %c0_32], %33 {strides = array<i32>} : memref<10x2x10x16x128xbf16, #tpu.memory_space<vmem>>, vector<1x1x7x16x128xbf16>,
    %c2 = arith.constant 2 : index
    %c0_33 = arith.constant 0 : index
    %c0_34 = arith.constant 0 : index
    %c0_35 = arith.constant 0 : index
    %34 = vector.load %arg1[%c2, %c0_33, %c0_34, %c0_35] : memref<14x7x16x64xbf16, #tpu.memory_space<vmem>>, vector<1x7x16x64xbf16>
    %35 = vector.shape_cast %34 : vector<1x7x16x64xbf16> to vector<7x16x64xbf16>
    %36 = vector.shape_cast %35 : vector<7x16x64xbf16> to vector<112x64xbf16>
    %c0_36 = arith.constant 0 : index
    %c0_37 = arith.constant 0 : index
    %37 = vector.load %arg2[%c0_36, %c0_37] : memref<64x128xbf16, #tpu.memory_space<vmem>>, vector<64x128xbf16>
    %cst_38 = arith.constant dense<0.000000e+00> : vector<112x128xf32>
    %38 = tpu.matmul %36, %37, %cst_38 {dimension_numbers = #tpu.dot_dimension_numbers<[1], [0], [0], [1], [0, 0, 1, 1], [], []>} : vector<112x64xbf16>, vector<64x128xbf16>, vector<112x128xf32> -> vector<112x128xf32>
    %c0_39 = arith.constant 0 : index
    %c0_40 = arith.constant 0 : index
    %39 = vector.load %arg3[%c0_39, %c0_40] : memref<1x128xf32, #tpu.memory_space<vmem>>, vector<1x128xf32>
    %40 = vector.broadcast %39 : vector<1x128xf32> to vector<112x128xf32>
    %41 = arith.addf %38, %40 : vector<112x128xf32>
    %cst_41 = arith.constant 3.000000e-01 : f32
    %42 = vector.broadcast %cst_41 : f32 to vector<112x128xf32>
    %43 = arith.mulf %42, %41 : vector<112x128xf32>
    %44 = arith.maximumf %41, %43 : vector<112x128xf32>
    %45 = arith.truncf %44 : vector<112x128xf32> to vector<112x128xbf16>
    %46 = vector.shape_cast %45 : vector<112x128xbf16> to vector<7x16x128xbf16>
    %c2_42 = arith.constant 2 : index
    %c0_43 = arith.constant 0 : index
    %c1_44 = arith.constant 1 : index
    %c0_45 = arith.constant 0 : index
    %c0_46 = arith.constant 0 : index
    %47 = vector.load %arg9[%c2_42, %c0_43, %c1_44, %c0_45, %c0_46] : memref<10x2x10x16x128xbf16, #tpu.memory_space<vmem>>, vector<1x1x7x16x128xbf16>
    %48 = vector.shape_cast %47 : vector<1x1x7x16x128xbf16> to vector<7x16x128xbf16>
    %49 = vector.shape_cast %46 : vector<7x16x128xbf16> to vector<1x1x7x16x128xbf16>
    tpu.vector_store %arg9[%c2_42, %c0_43, %c1_44, %c0_45, %c0_46], %49 {strides = array<i32>} : memref<10x2x10x16x128xbf16, #tpu.memory_space<vmem>>, vector<1x1x7x16x128xbf16>,
    %c3 = arith.constant 3 : index
    %c0_47 = arith.constant 0 : index
    %c0_48 = arith.constant 0 : index
    %c0_49 = arith.constant 0 : index
    %50 = vector.load %arg1[%c3, %c0_47, %c0_48, %c0_49] : memref<14x7x16x64xbf16, #tpu.memory_space<vmem>>, vector<1x7x16x64xbf16>
    %51 = vector.shape_cast %50 : vector<1x7x16x64xbf16> to vector<7x16x64xbf16>
    %52 = vector.shape_cast %51 : vector<7x16x64xbf16> to vector<112x64xbf16>
    %c0_50 = arith.constant 0 : index
    %c0_51 = arith.constant 0 : index
    %53 = vector.load %arg2[%c0_50, %c0_51] : memref<64x128xbf16, #tpu.memory_space<vmem>>, vector<64x128xbf16>
    %cst_52 = arith.constant dense<0.000000e+00> : vector<112x128xf32>
    %54 = tpu.matmul %52, %53, %cst_52 {dimension_numbers = #tpu.dot_dimension_numbers<[1], [0], [0], [1], [0, 0, 1, 1], [], []>} : vector<112x64xbf16>, vector<64x128xbf16>, vector<112x128xf32> -> vector<112x128xf32>
    %c0_53 = arith.constant 0 : index
    %c0_54 = arith.constant 0 : index
    %55 = vector.load %arg3[%c0_53, %c0_54] : memref<1x128xf32, #tpu.memory_space<vmem>>, vector<1x128xf32>
    %56 = vector.broadcast %55 : vector<1x128xf32> to vector<112x128xf32>
    %57 = arith.addf %54, %56 : vector<112x128xf32>
    %cst_55 = arith.constant 3.000000e-01 : f32
    %58 = vector.broadcast %cst_55 : f32 to vector<112x128xf32>
    %59 = arith.mulf %58, %57 : vector<112x128xf32>
    %60 = arith.maximumf %57, %59 : vector<112x128xf32>
    %61 = arith.truncf %60 : vector<112x128xf32> to vector<112x128xbf16>
    %62 = vector.shape_cast %61 : vector<112x128xbf16> to vector<7x16x128xbf16>
    %c2_56 = arith.constant 2 : index
    %c1_57 = arith.constant 1 : index
    %c1_58 = arith.constant 1 : index
    %c0_59 = arith.constant 0 : index
    %c0_60 = arith.constant 0 : index
    %63 = vector.load %arg9[%c2_56, %c1_57, %c1_58, %c0_59, %c0_60] : memref<10x2x10x16x128xbf16, #tpu.memory_space<vmem>>, vector<1x1x7x16x128xbf16>
    %64 = vector.shape_cast %63 : vector<1x1x7x16x128xbf16> to vector<7x16x128xbf16>
    %65 = vector.shape_cast %62 : vector<7x16x128xbf16> to vector<1x1x7x16x128xbf16>
    tpu.vector_store %arg9[%c2_56, %c1_57, %c1_58, %c0_59, %c0_60], %65 {strides = array<i32>} : memref<10x2x10x16x128xbf16, #tpu.memory_space<vmem>>, vector<1x1x7x16x128xbf16>,
    %c4 = arith.constant 4 : index
    %c0_61 = arith.constant 0 : index
    %c0_62 = arith.constant 0 : index
    %c0_63 = arith.constant 0 : index
    %66 = vector.load %arg1[%c4, %c0_61, %c0_62, %c0_63] : memref<14x7x16x64xbf16, #tpu.memory_space<vmem>>, vector<1x7x16x64xbf16>
    %67 = vector.shape_cast %66 : vector<1x7x16x64xbf16> to vector<7x16x64xbf16>
    %68 = vector.shape_cast %67 : vector<7x16x64xbf16> to vector<112x64xbf16>
    %c0_64 = arith.constant 0 : index
    %c0_65 = arith.constant 0 : index
    %69 = vector.load %arg2[%c0_64, %c0_65] : memref<64x128xbf16, #tpu.memory_space<vmem>>, vector<64x128xbf16>
    %cst_66 = arith.constant dense<0.000000e+00> : vector<112x128xf32>
    %70 = tpu.matmul %68, %69, %cst_66 {dimension_numbers = #tpu.dot_dimension_numbers<[1], [0], [0], [1], [0, 0, 1, 1], [], []>} : vector<112x64xbf16>, vector<64x128xbf16>, vector<112x128xf32> -> vector<112x128xf32>
    %c0_67 = arith.constant 0 : index
    %c0_68 = arith.constant 0 : index
    %71 = vector.load %arg3[%c0_67, %c0_68] : memref<1x128xf32, #tpu.memory_space<vmem>>, vector<1x128xf32>
    %72 = vector.broadcast %71 : vector<1x128xf32> to vector<112x128xf32>
    %73 = arith.addf %70, %72 : vector<112x128xf32>
    %cst_69 = arith.constant 3.000000e-01 : f32
    %74 = vector.broadcast %cst_69 : f32 to vector<112x128xf32>
    %75 = arith.mulf %74, %73 : vector<112x128xf32>
    %76 = arith.maximumf %73, %75 : vector<112x128xf32>
    %77 = arith.truncf %76 : vector<112x128xf32> to vector<112x128xbf16>
    %78 = vector.shape_cast %77 : vector<112x128xbf16> to vector<7x16x128xbf16>
    %c3_70 = arith.constant 3 : index
    %c0_71 = arith.constant 0 : index
    %c1_72 = arith.constant 1 : index
    %c0_73 = arith.constant 0 : index
    %c0_74 = arith.constant 0 : index
    %79 = vector.load %arg9[%c3_70, %c0_71, %c1_72, %c0_73, %c0_74] : memref<10x2x10x16x128xbf16, #tpu.memory_space<vmem>>, vector<1x1x7x16x128xbf16>
    %80 = vector.shape_cast %79 : vector<1x1x7x16x128xbf16> to vector<7x16x128xbf16>
    %81 = vector.shape_cast %78 : vector<7x16x128xbf16> to vector<1x1x7x16x128xbf16>
    tpu.vector_store %arg9[%c3_70, %c0_71, %c1_72, %c0_73, %c0_74], %81 {strides = array<i32>} : memref<10x2x10x16x128xbf16, #tpu.memory_space<vmem>>, vector<1x1x7x16x128xbf16>,
    %c5 = arith.constant 5 : index
    %c0_75 = arith.constant 0 : index
    %c0_76 = arith.constant 0 : index
    %c0_77 = arith.constant 0 : index
    %82 = vector.load %arg1[%c5, %c0_75, %c0_76, %c0_77] : memref<14x7x16x64xbf16, #tpu.memory_space<vmem>>, vector<1x7x16x64xbf16>
    %83 = vector.shape_cast %82 : vector<1x7x16x64xbf16> to vector<7x16x64xbf16>
    %84 = vector.shape_cast %83 : vector<7x16x64xbf16> to vector<112x64xbf16>
    %c0_78 = arith.constant 0 : index
    %c0_79 = arith.constant 0 : index
    %85 = vector.load %arg2[%c0_78, %c0_79] : memref<64x128xbf16, #tpu.memory_space<vmem>>, vector<64x128xbf16>
    %cst_80 = arith.constant dense<0.000000e+00> : vector<112x128xf32>
    %86 = tpu.matmul %84, %85, %cst_80 {dimension_numbers = #tpu.dot_dimension_numbers<[1], [0], [0], [1], [0, 0, 1, 1], [], []>} : vector<112x64xbf16>, vector<64x128xbf16>, vector<112x128xf32> -> vector<112x128xf32>
    %c0_81 = arith.constant 0 : index
    %c0_82 = arith.constant 0 : index
    %87 = vector.load %arg3[%c0_81, %c0_82] : memref<1x128xf32, #tpu.memory_space<vmem>>, vector<1x128xf32>
    %88 = vector.broadcast %87 : vector<1x128xf32> to vector<112x128xf32>
    %89 = arith.addf %86, %88 : vector<112x128xf32>
    %cst_83 = arith.constant 3.000000e-01 : f32
    %90 = vector.broadcast %cst_83 : f32 to vector<112x128xf32>
    %91 = arith.mulf %90, %89 : vector<112x128xf32>
    %92 = arith.maximumf %89, %91 : vector<112x128xf32>
    %93 = arith.truncf %92 : vector<112x128xf32> to vector<112x128xbf16>
    %94 = vector.shape_cast %93 : vector<112x128xbf16> to vector<7x16x128xbf16>
    %c3_84 = arith.constant 3 : index
    %c1_85 = arith.constant 1 : index
    %c1_86 = arith.constant 1 : index
    %c0_87 = arith.constant 0 : index
    %c0_88 = arith.constant 0 : index
    %95 = vector.load %arg9[%c3_84, %c1_85, %c1_86, %c0_87, %c0_88] : memref<10x2x10x16x128xbf16, #tpu.memory_space<vmem>>, vector<1x1x7x16x128xbf16>
    %96 = vector.shape_cast %95 : vector<1x1x7x16x128xbf16> to vector<7x16x128xbf16>
    %97 = vector.shape_cast %94 : vector<7x16x128xbf16> to vector<1x1x7x16x128xbf16>
    tpu.vector_store %arg9[%c3_84, %c1_85, %c1_86, %c0_87, %c0_88], %97 {strides = array<i32>} : memref<10x2x10x16x128xbf16, #tpu.memory_space<vmem>>, vector<1x1x7x16x128xbf16>,
    %c6 = arith.constant 6 : index
    %c0_89 = arith.constant 0 : index
    %c0_90 = arith.constant 0 : index
    %c0_91 = arith.constant 0 : index
    %98 = vector.load %arg1[%c6, %c0_89, %c0_90, %c0_91] : memref<14x7x16x64xbf16, #tpu.memory_space<vmem>>, vector<1x7x16x64xbf16>
    %99 = vector.shape_cast %98 : vector<1x7x16x64xbf16> to vector<7x16x64xbf16>
    %100 = vector.shape_cast %99 : vector<7x16x64xbf16> to vector<112x64xbf16>
    %c0_92 = arith.constant 0 : index
    %c0_93 = arith.constant 0 : index
    %101 = vector.load %arg2[%c0_92, %c0_93] : memref<64x128xbf16, #tpu.memory_space<vmem>>, vector<64x128xbf16>
    %cst_94 = arith.constant dense<0.000000e+00> : vector<112x128xf32>
    %102 = tpu.matmul %100, %101, %cst_94 {dimension_numbers = #tpu.dot_dimension_numbers<[1], [0], [0], [1], [0, 0, 1, 1], [], []>} : vector<112x64xbf16>, vector<64x128xbf16>, vector<112x128xf32> -> vector<112x128xf32>
    %c0_95 = arith.constant 0 : index
    %c0_96 = arith.constant 0 : index
    %103 = vector.load %arg3[%c0_95, %c0_96] : memref<1x128xf32, #tpu.memory_space<vmem>>, vector<1x128xf32>
    %104 = vector.broadcast %103 : vector<1x128xf32> to vector<112x128xf32>
    %105 = arith.addf %102, %104 : vector<112x128xf32>
    %cst_97 = arith.constant 3.000000e-01 : f32
    %106 = vector.broadcast %cst_97 : f32 to vector<112x128xf32>
    %107 = arith.mulf %106, %105 : vector<112x128xf32>
    %108 = arith.maximumf %105, %107 : vector<112x128xf32>
    %109 = arith.truncf %108 : vector<112x128xf32> to vector<112x128xbf16>
    %110 = vector.shape_cast %109 : vector<112x128xbf16> to vector<7x16x128xbf16>
    %c4_98 = arith.constant 4 : index
    %c0_99 = arith.constant 0 : index
    %c1_100 = arith.constant 1 : index
    %c0_101 = arith.constant 0 : index
    %c0_102 = arith.constant 0 : index
    %111 = vector.load %arg9[%c4_98, %c0_99, %c1_100, %c0_101, %c0_102] : memref<10x2x10x16x128xbf16, #tpu.memory_space<vmem>>, vector<1x1x7x16x128xbf16>
    %112 = vector.shape_cast %111 : vector<1x1x7x16x128xbf16> to vector<7x16x128xbf16>
    %113 = vector.shape_cast %110 : vector<7x16x128xbf16> to vector<1x1x7x16x128xbf16>
    tpu.vector_store %arg9[%c4_98, %c0_99, %c1_100, %c0_101, %c0_102], %113 {strides = array<i32>} : memref<10x2x10x16x128xbf16, #tpu.memory_space<vmem>>, vector<1x1x7x16x128xbf16>,
    %c7 = arith.constant 7 : index
    %c0_103 = arith.constant 0 : index
    %c0_104 = arith.constant 0 : index
    %c0_105 = arith.constant 0 : index
    %114 = vector.load %arg1[%c7, %c0_103, %c0_104, %c0_105] : memref<14x7x16x64xbf16, #tpu.memory_space<vmem>>, vector<1x7x16x64xbf16>
    %115 = vector.shape_cast %114 : vector<1x7x16x64xbf16> to vector<7x16x64xbf16>
    %116 = vector.shape_cast %115 : vector<7x16x64xbf16> to vector<112x64xbf16>
    %c0_106 = arith.constant 0 : index
    %c0_107 = arith.constant 0 : index
    %117 = vector.load %arg2[%c0_106, %c0_107] : memref<64x128xbf16, #tpu.memory_space<vmem>>, vector<64x128xbf16>
    %cst_108 = arith.constant dense<0.000000e+00> : vector<112x128xf32>
    %118 = tpu.matmul %116, %117, %cst_108 {dimension_numbers = #tpu.dot_dimension_numbers<[1], [0], [0], [1], [0, 0, 1, 1], [], []>} : vector<112x64xbf16>, vector<64x128xbf16>, vector<112x128xf32> -> vector<112x128xf32>
    %c0_109 = arith.constant 0 : index
    %c0_110 = arith.constant 0 : index
    %119 = vector.load %arg3[%c0_109, %c0_110] : memref<1x128xf32, #tpu.memory_space<vmem>>, vector<1x128xf32>
    %120 = vector.broadcast %119 : vector<1x128xf32> to vector<112x128xf32>
    %121 = arith.addf %118, %120 : vector<112x128xf32>
    %cst_111 = arith.constant 3.000000e-01 : f32
    %122 = vector.broadcast %cst_111 : f32 to vector<112x128xf32>
    %123 = arith.mulf %122, %121 : vector<112x128xf32>
    %124 = arith.maximumf %121, %123 : vector<112x128xf32>
    %125 = arith.truncf %124 : vector<112x128xf32> to vector<112x128xbf16>
    %126 = vector.shape_cast %125 : vector<112x128xbf16> to vector<7x16x128xbf16>
    %c4_112 = arith.constant 4 : index
    %c1_113 = arith.constant 1 : index
    %c1_114 = arith.constant 1 : index
    %c0_115 = arith.constant 0 : index
    %c0_116 = arith.constant 0 : index
    %127 = vector.load %arg9[%c4_112, %c1_113, %c1_114, %c0_115, %c0_116] : memref<10x2x10x16x128xbf16, #tpu.memory_space<vmem>>, vector<1x1x7x16x128xbf16>
    %128 = vector.shape_cast %127 : vector<1x1x7x16x128xbf16> to vector<7x16x128xbf16>
    %129 = vector.shape_cast %126 : vector<7x16x128xbf16> to vector<1x1x7x16x128xbf16>
    tpu.vector_store %arg9[%c4_112, %c1_113, %c1_114, %c0_115, %c0_116], %129 {strides = array<i32>} : memref<10x2x10x16x128xbf16, #tpu.memory_space<vmem>>, vector<1x1x7x16x128xbf16>,
    %c8 = arith.constant 8 : index
    %c0_117 = arith.constant 0 : index
    %c0_118 = arith.constant 0 : index
    %c0_119 = arith.constant 0 : index
    %130 = vector.load %arg1[%c8, %c0_117, %c0_118, %c0_119] : memref<14x7x16x64xbf16, #tpu.memory_space<vmem>>, vector<1x7x16x64xbf16>
    %131 = vector.shape_cast %130 : vector<1x7x16x64xbf16> to vector<7x16x64xbf16>
    %132 = vector.shape_cast %131 : vector<7x16x64xbf16> to vector<112x64xbf16>
    %c0_120 = arith.constant 0 : index
    %c0_121 = arith.constant 0 : index
    %133 = vector.load %arg2[%c0_120, %c0_121] : memref<64x128xbf16, #tpu.memory_space<vmem>>, vector<64x128xbf16>
    %cst_122 = arith.constant dense<0.000000e+00> : vector<112x128xf32>
    %134 = tpu.matmul %132, %133, %cst_122 {dimension_numbers = #tpu.dot_dimension_numbers<[1], [0], [0], [1], [0, 0, 1, 1], [], []>} : vector<112x64xbf16>, vector<64x128xbf16>, vector<112x128xf32> -> vector<112x128xf32>
    %c0_123 = arith.constant 0 : index
    %c0_124 = arith.constant 0 : index
    %135 = vector.load %arg3[%c0_123, %c0_124] : memref<1x128xf32, #tpu.memory_space<vmem>>, vector<1x128xf32>
    %136 = vector.broadcast %135 : vector<1x128xf32> to vector<112x128xf32>
    %137 = arith.addf %134, %136 : vector<112x128xf32>
    %cst_125 = arith.constant 3.000000e-01 : f32
    %138 = vector.broadcast %cst_125 : f32 to vector<112x128xf32>
    %139 = arith.mulf %138, %137 : vector<112x128xf32>
    %140 = arith.maximumf %137, %139 : vector<112x128xf32>
    %141 = arith.truncf %140 : vector<112x128xf32> to vector<112x128xbf16>
    %142 = vector.shape_cast %141 : vector<112x128xbf16> to vector<7x16x128xbf16>
    %c5_126 = arith.constant 5 : index
    %c0_127 = arith.constant 0 : index
    %c1_128 = arith.constant 1 : index
    %c0_129 = arith.constant 0 : index
    %c0_130 = arith.constant 0 : index
    %143 = vector.load %arg9[%c5_126, %c0_127, %c1_128, %c0_129, %c0_130] : memref<10x2x10x16x128xbf16, #tpu.memory_space<vmem>>, vector<1x1x7x16x128xbf16>
    %144 = vector.shape_cast %143 : vector<1x1x7x16x128xbf16> to vector<7x16x128xbf16>
    %145 = vector.shape_cast %142 : vector<7x16x128xbf16> to vector<1x1x7x16x128xbf16>
    tpu.vector_store %arg9[%c5_126, %c0_127, %c1_128, %c0_129, %c0_130], %145 {strides = array<i32>} : memref<10x2x10x16x128xbf16, #tpu.memory_space<vmem>>, vector<1x1x7x16x128xbf16>,
    %c9 = arith.constant 9 : index
    %c0_131 = arith.constant 0 : index
    %c0_132 = arith.constant 0 : index
    %c0_133 = arith.constant 0 : index
    %146 = vector.load %arg1[%c9, %c0_131, %c0_132, %c0_133] : memref<14x7x16x64xbf16, #tpu.memory_space<vmem>>, vector<1x7x16x64xbf16>
    %147 = vector.shape_cast %146 : vector<1x7x16x64xbf16> to vector<7x16x64xbf16>
    %148 = vector.shape_cast %147 : vector<7x16x64xbf16> to vector<112x64xbf16>
    %c0_134 = arith.constant 0 : index
    %c0_135 = arith.constant 0 : index
    %149 = vector.load %arg2[%c0_134, %c0_135] : memref<64x128xbf16, #tpu.memory_space<vmem>>, vector<64x128xbf16>
    %cst_136 = arith.constant dense<0.000000e+00> : vector<112x128xf32>
    %150 = tpu.matmul %148, %149, %cst_136 {dimension_numbers = #tpu.dot_dimension_numbers<[1], [0], [0], [1], [0, 0, 1, 1], [], []>} : vector<112x64xbf16>, vector<64x128xbf16>, vector<112x128xf32> -> vector<112x128xf32>
    %c0_137 = arith.constant 0 : index
    %c0_138 = arith.constant 0 : index
    %151 = vector.load %arg3[%c0_137, %c0_138] : memref<1x128xf32, #tpu.memory_space<vmem>>, vector<1x128xf32>
    %152 = vector.broadcast %151 : vector<1x128xf32> to vector<112x128xf32>
    %153 = arith.addf %150, %152 : vector<112x128xf32>
    %cst_139 = arith.constant 3.000000e-01 : f32
    %154 = vector.broadcast %cst_139 : f32 to vector<112x128xf32>
    %155 = arith.mulf %154, %153 : vector<112x128xf32>
    %156 = arith.maximumf %153, %155 : vector<112x128xf32>
    %157 = arith.truncf %156 : vector<112x128xf32> to vector<112x128xbf16>
    %158 = vector.shape_cast %157 : vector<112x128xbf16> to vector<7x16x128xbf16>
    %c5_140 = arith.constant 5 : index
    %c1_141 = arith.constant 1 : index
    %c1_142 = arith.constant 1 : index
    %c0_143 = arith.constant 0 : index
    %c0_144 = arith.constant 0 : index
    %159 = vector.load %arg9[%c5_140, %c1_141, %c1_142, %c0_143, %c0_144] : memref<10x2x10x16x128xbf16, #tpu.memory_space<vmem>>, vector<1x1x7x16x128xbf16>
    %160 = vector.shape_cast %159 : vector<1x1x7x16x128xbf16> to vector<7x16x128xbf16>
    %161 = vector.shape_cast %158 : vector<7x16x128xbf16> to vector<1x1x7x16x128xbf16>
    tpu.vector_store %arg9[%c5_140, %c1_141, %c1_142, %c0_143, %c0_144], %161 {strides = array<i32>} : memref<10x2x10x16x128xbf16, #tpu.memory_space<vmem>>, vector<1x1x7x16x128xbf16>,
    %c10 = arith.constant 10 : index
    %c0_145 = arith.constant 0 : index
    %c0_146 = arith.constant 0 : index
    %c0_147 = arith.constant 0 : index
    %162 = vector.load %arg1[%c10, %c0_145, %c0_146, %c0_147] : memref<14x7x16x64xbf16, #tpu.memory_space<vmem>>, vector<1x7x16x64xbf16>
    %163 = vector.shape_cast %162 : vector<1x7x16x64xbf16> to vector<7x16x64xbf16>
    %164 = vector.shape_cast %163 : vector<7x16x64xbf16> to vector<112x64xbf16>
    %c0_148 = arith.constant 0 : index
    %c0_149 = arith.constant 0 : index
    %165 = vector.load %arg2[%c0_148, %c0_149] : memref<64x128xbf16, #tpu.memory_space<vmem>>, vector<64x128xbf16>
    %cst_150 = arith.constant dense<0.000000e+00> : vector<112x128xf32>
    %166 = tpu.matmul %164, %165, %cst_150 {dimension_numbers = #tpu.dot_dimension_numbers<[1], [0], [0], [1], [0, 0, 1, 1], [], []>} : vector<112x64xbf16>, vector<64x128xbf16>, vector<112x128xf32> -> vector<112x128xf32>
    %c0_151 = arith.constant 0 : index
    %c0_152 = arith.constant 0 : index
    %167 = vector.load %arg3[%c0_151, %c0_152] : memref<1x128xf32, #tpu.memory_space<vmem>>, vector<1x128xf32>
    %168 = vector.broadcast %167 : vector<1x128xf32> to vector<112x128xf32>
    %169 = arith.addf %166, %168 : vector<112x128xf32>
    %cst_153 = arith.constant 3.000000e-01 : f32
    %170 = vector.broadcast %cst_153 : f32 to vector<112x128xf32>
    %171 = arith.mulf %170, %169 : vector<112x128xf32>
    %172 = arith.maximumf %169, %171 : vector<112x128xf32>
    %173 = arith.truncf %172 : vector<112x128xf32> to vector<112x128xbf16>
    %174 = vector.shape_cast %173 : vector<112x128xbf16> to vector<7x16x128xbf16>
    %c6_154 = arith.constant 6 : index
    %c0_155 = arith.constant 0 : index
    %c1_156 = arith.constant 1 : index
    %c0_157 = arith.constant 0 : index
    %c0_158 = arith.constant 0 : index
    %175 = vector.load %arg9[%c6_154, %c0_155, %c1_156, %c0_157, %c0_158] : memref<10x2x10x16x128xbf16, #tpu.memory_space<vmem>>, vector<1x1x7x16x128xbf16>
    %176 = vector.shape_cast %175 : vector<1x1x7x16x128xbf16> to vector<7x16x128xbf16>
    %177 = vector.shape_cast %174 : vector<7x16x128xbf16> to vector<1x1x7x16x128xbf16>
    tpu.vector_store %arg9[%c6_154, %c0_155, %c1_156, %c0_157, %c0_158], %177 {strides = array<i32>} : memref<10x2x10x16x128xbf16, #tpu.memory_space<vmem>>, vector<1x1x7x16x128xbf16>,
    %c11 = arith.constant 11 : index
    %c0_159 = arith.constant 0 : index
    %c0_160 = arith.constant 0 : index
    %c0_161 = arith.constant 0 : index
    %178 = vector.load %arg1[%c11, %c0_159, %c0_160, %c0_161] : memref<14x7x16x64xbf16, #tpu.memory_space<vmem>>, vector<1x7x16x64xbf16>
    %179 = vector.shape_cast %178 : vector<1x7x16x64xbf16> to vector<7x16x64xbf16>
    %180 = vector.shape_cast %179 : vector<7x16x64xbf16> to vector<112x64xbf16>
    %c0_162 = arith.constant 0 : index
    %c0_163 = arith.constant 0 : index
    %181 = vector.load %arg2[%c0_162, %c0_163] : memref<64x128xbf16, #tpu.memory_space<vmem>>, vector<64x128xbf16>
    %cst_164 = arith.constant dense<0.000000e+00> : vector<112x128xf32>
    %182 = tpu.matmul %180, %181, %cst_164 {dimension_numbers = #tpu.dot_dimension_numbers<[1], [0], [0], [1], [0, 0, 1, 1], [], []>} : vector<112x64xbf16>, vector<64x128xbf16>, vector<112x128xf32> -> vector<112x128xf32>
    %c0_165 = arith.constant 0 : index
    %c0_166 = arith.constant 0 : index
    %183 = vector.load %arg3[%c0_165, %c0_166] : memref<1x128xf32, #tpu.memory_space<vmem>>, vector<1x128xf32>
    %184 = vector.broadcast %183 : vector<1x128xf32> to vector<112x128xf32>
    %185 = arith.addf %182, %184 : vector<112x128xf32>
    %cst_167 = arith.constant 3.000000e-01 : f32
    %186 = vector.broadcast %cst_167 : f32 to vector<112x128xf32>
    %187 = arith.mulf %186, %185 : vector<112x128xf32>
    %188 = arith.maximumf %185, %187 : vector<112x128xf32>
    %189 = arith.truncf %188 : vector<112x128xf32> to vector<112x128xbf16>
    %190 = vector.shape_cast %189 : vector<112x128xbf16> to vector<7x16x128xbf16>
    %c6_168 = arith.constant 6 : index
    %c1_169 = arith.constant 1 : index
    %c1_170 = arith.constant 1 : index
    %c0_171 = arith.constant 0 : index
    %c0_172 = arith.constant 0 : index
    %191 = vector.load %arg9[%c6_168, %c1_169, %c1_170, %c0_171, %c0_172] : memref<10x2x10x16x128xbf16, #tpu.memory_space<vmem>>, vector<1x1x7x16x128xbf16>
    %192 = vector.shape_cast %191 : vector<1x1x7x16x128xbf16> to vector<7x16x128xbf16>
    %193 = vector.shape_cast %190 : vector<7x16x128xbf16> to vector<1x1x7x16x128xbf16>
    tpu.vector_store %arg9[%c6_168, %c1_169, %c1_170, %c0_171, %c0_172], %193 {strides = array<i32>} : memref<10x2x10x16x128xbf16, #tpu.memory_space<vmem>>, vector<1x1x7x16x128xbf16>,
    %c12 = arith.constant 12 : index
    %c0_173 = arith.constant 0 : index
    %c0_174 = arith.constant 0 : index
    %c0_175 = arith.constant 0 : index
    %194 = vector.load %arg1[%c12, %c0_173, %c0_174, %c0_175] : memref<14x7x16x64xbf16, #tpu.memory_space<vmem>>, vector<1x7x16x64xbf16>
    %195 = vector.shape_cast %194 : vector<1x7x16x64xbf16> to vector<7x16x64xbf16>
    %196 = vector.shape_cast %195 : vector<7x16x64xbf16> to vector<112x64xbf16>
    %c0_176 = arith.constant 0 : index
    %c0_177 = arith.constant 0 : index
    %197 = vector.load %arg2[%c0_176, %c0_177] : memref<64x128xbf16, #tpu.memory_space<vmem>>, vector<64x128xbf16>
    %cst_178 = arith.constant dense<0.000000e+00> : vector<112x128xf32>
    %198 = tpu.matmul %196, %197, %cst_178 {dimension_numbers = #tpu.dot_dimension_numbers<[1], [0], [0], [1], [0, 0, 1, 1], [], []>} : vector<112x64xbf16>, vector<64x128xbf16>, vector<112x128xf32> -> vector<112x128xf32>
    %c0_179 = arith.constant 0 : index
    %c0_180 = arith.constant 0 : index
    %199 = vector.load %arg3[%c0_179, %c0_180] : memref<1x128xf32, #tpu.memory_space<vmem>>, vector<1x128xf32>
    %200 = vector.broadcast %199 : vector<1x128xf32> to vector<112x128xf32>
    %201 = arith.addf %198, %200 : vector<112x128xf32>
    %cst_181 = arith.constant 3.000000e-01 : f32
    %202 = vector.broadcast %cst_181 : f32 to vector<112x128xf32>
    %203 = arith.mulf %202, %201 : vector<112x128xf32>
    %204 = arith.maximumf %201, %203 : vector<112x128xf32>
    %205 = arith.truncf %204 : vector<112x128xf32> to vector<112x128xbf16>
    %206 = vector.shape_cast %205 : vector<112x128xbf16> to vector<7x16x128xbf16>
    %c7_182 = arith.constant 7 : index
    %c0_183 = arith.constant 0 : index
    %c1_184 = arith.constant 1 : index
    %c0_185 = arith.constant 0 : index
    %c0_186 = arith.constant 0 : index
    %207 = vector.load %arg9[%c7_182, %c0_183, %c1_184, %c0_185, %c0_186] : memref<10x2x10x16x128xbf16, #tpu.memory_space<vmem>>, vector<1x1x7x16x128xbf16>
    %208 = vector.shape_cast %207 : vector<1x1x7x16x128xbf16> to vector<7x16x128xbf16>
    %209 = vector.shape_cast %206 : vector<7x16x128xbf16> to vector<1x1x7x16x128xbf16>
    tpu.vector_store %arg9[%c7_182, %c0_183, %c1_184, %c0_185, %c0_186], %209 {strides = array<i32>} : memref<10x2x10x16x128xbf16, #tpu.memory_space<vmem>>, vector<1x1x7x16x128xbf16>,
    %c13 = arith.constant 13 : index
    %c0_187 = arith.constant 0 : index
    %c0_188 = arith.constant 0 : index
    %c0_189 = arith.constant 0 : index
    %210 = vector.load %arg1[%c13, %c0_187, %c0_188, %c0_189] : memref<14x7x16x64xbf16, #tpu.memory_space<vmem>>, vector<1x7x16x64xbf16>
    %211 = vector.shape_cast %210 : vector<1x7x16x64xbf16> to vector<7x16x64xbf16>
    %212 = vector.shape_cast %211 : vector<7x16x64xbf16> to vector<112x64xbf16>
    %c0_190 = arith.constant 0 : index
    %c0_191 = arith.constant 0 : index
    %213 = vector.load %arg2[%c0_190, %c0_191] : memref<64x128xbf16, #tpu.memory_space<vmem>>, vector<64x128xbf16>
    %cst_192 = arith.constant dense<0.000000e+00> : vector<112x128xf32>
    %214 = tpu.matmul %212, %213, %cst_192 {dimension_numbers = #tpu.dot_dimension_numbers<[1], [0], [0], [1], [0, 0, 1, 1], [], []>} : vector<112x64xbf16>, vector<64x128xbf16>, vector<112x128xf32> -> vector<112x128xf32>
    %c0_193 = arith.constant 0 : index
    %c0_194 = arith.constant 0 : index
    %215 = vector.load %arg3[%c0_193, %c0_194] : memref<1x128xf32, #tpu.memory_space<vmem>>, vector<1x128xf32>
    %216 = vector.broadcast %215 : vector<1x128xf32> to vector<112x128xf32>
    %217 = arith.addf %214, %216 : vector<112x128xf32>
    %cst_195 = arith.constant 3.000000e-01 : f32
    %218 = vector.broadcast %cst_195 : f32 to vector<112x128xf32>
    %219 = arith.mulf %218, %217 : vector<112x128xf32>
    %220 = arith.maximumf %217, %219 : vector<112x128xf32>
    %221 = arith.truncf %220 : vector<112x128xf32> to vector<112x128xbf16>
    %222 = vector.shape_cast %221 : vector<112x128xbf16> to vector<7x16x128xbf16>
    %c7_196 = arith.constant 7 : index
    %c1_197 = arith.constant 1 : index
    %c1_198 = arith.constant 1 : index
    %c0_199 = arith.constant 0 : index
    %c0_200 = arith.constant 0 : index
    %223 = vector.load %arg9[%c7_196, %c1_197, %c1_198, %c0_199, %c0_200] : memref<10x2x10x16x128xbf16, #tpu.memory_space<vmem>>, vector<1x1x7x16x128xbf16>
    %224 = vector.shape_cast %223 : vector<1x1x7x16x128xbf16> to vector<7x16x128xbf16>
    %225 = vector.shape_cast %222 : vector<7x16x128xbf16> to vector<1x1x7x16x128xbf16>
    tpu.vector_store %arg9[%c7_196, %c1_197, %c1_198, %c0_199, %c0_200], %225 {strides = array<i32>} : memref<10x2x10x16x128xbf16, #tpu.memory_space<vmem>>, vector<1x1x7x16x128xbf16>,
    %c0_201 = arith.constant 0 : index
    %c0_202 = arith.constant 0 : index
    %226 = vector.load %arg7[%c0_201, %c0_202] : memref<1x1xf32, #tpu.memory_space<vmem>>, vector<1x1xf32>
    %227 = vector.shape_cast %226 : vector<1x1xf32> to vector<1x1xf32>
    %228 = vector.broadcast %227 : vector<1x1xf32> to vector<16x1xf32>
    %c0_203 = arith.constant 0 : index
    %c0_204 = arith.constant 0 : index
    %229 = vector.load %arg8[%c0_203, %c0_204] : memref<16x1xf32, #tpu.memory_space<vmem>>, vector<16x1xf32>
    tpu.vector_store %arg8[%c0_203, %c0_204], %228 {strides = array<i32>} : memref<16x1xf32, #tpu.memory_space<vmem>>, vector<16x1xf32>,
    %c0_i32 = arith.constant 0 : i32
    %c7_i32 = arith.constant 7 : i32
    %230 = arith.addi %c0_i32, %c7_i32 : i32
    %c1_i32 = arith.constant 1 : i32
    scf.for %arg10 = %c0_i32 to %230 step %c1_i32  : i32 {
      %c1_i32_206 = arith.constant 1 : i32
      %231 = arith.muli %arg10, %c1_i32_206 : i32
      %c0_i32_207 = arith.constant 0 : i32
      %232 = arith.addi %c0_i32_207, %231 : i32
      %cst_208 = arith.constant 0.000000e+00 : f32
      %233 = vector.broadcast %cst_208 : f32 to vector<128x128xf32>
      %c0_i32_209 = arith.constant 0 : i32
      %234 = arith.addi %232, %c0_i32_209 : i32
      %235 = arith.index_cast %234 : i32 to index
      %c0_210 = arith.constant 0 : index
      %c0_211 = arith.constant 0 : index
      %c0_212 = arith.constant 0 : index
      %c0_213 = arith.constant 0 : index
      %236 = vector.load %arg9[%235, %c0_210, %c0_211, %c0_212, %c0_213] : memref<10x2x10x16x128xbf16, #tpu.memory_space<vmem>>, vector<1x1x8x16x128xbf16>
      %237 = vector.shape_cast %236 : vector<1x1x8x16x128xbf16> to vector<8x16x128xbf16>
      %238 = vector.shape_cast %237 : vector<8x16x128xbf16> to vector<128x128xbf16>
      %c0_214 = arith.constant 0 : index
      %c0_215 = arith.constant 0 : index
      %c0_216 = arith.constant 0 : index
      %c0_217 = arith.constant 0 : index
      %239 = vector.load %arg4[%c0_214, %c0_215, %c0_216, %c0_217] : memref<5x3x128x128xbf16, #tpu.memory_space<vmem>>, vector<1x1x128x128xbf16>
      %240 = vector.shape_cast %239 : vector<1x1x128x128xbf16> to vector<128x128xbf16>
      %cst_218 = arith.constant dense<0.000000e+00> : vector<128x128xf32>
      %241 = tpu.matmul %238, %240, %cst_218 {dimension_numbers = #tpu.dot_dimension_numbers<[1], [0], [0], [1], [0, 0, 1, 1], [], []>} : vector<128x128xbf16>, vector<128x128xbf16>, vector<128x128xf32> -> vector<128x128xf32>
      %242 = arith.addf %233, %241 : vector<128x128xf32>
      %c0_i32_219 = arith.constant 0 : i32
      %243 = arith.addi %232, %c0_i32_219 : i32
      %244 = arith.index_cast %243 : i32 to index
      %c0_220 = arith.constant 0 : index
      %c1_221 = arith.constant 1 : index
      %c0_222 = arith.constant 0 : index
      %c0_223 = arith.constant 0 : index
      %245 = vector.load %arg9[%244, %c0_220, %c1_221, %c0_222, %c0_223] : memref<10x2x10x16x128xbf16, #tpu.memory_space<vmem>>, vector<1x1x8x16x128xbf16>
      %246 = vector.shape_cast %245 : vector<1x1x8x16x128xbf16> to vector<8x16x128xbf16>
      %247 = vector.shape_cast %246 : vector<8x16x128xbf16> to vector<128x128xbf16>
      %c0_224 = arith.constant 0 : index
      %c1_225 = arith.constant 1 : index
      %c0_226 = arith.constant 0 : index
      %c0_227 = arith.constant 0 : index
      %248 = vector.load %arg4[%c0_224, %c1_225, %c0_226, %c0_227] : memref<5x3x128x128xbf16, #tpu.memory_space<vmem>>, vector<1x1x128x128xbf16>
      %249 = vector.shape_cast %248 : vector<1x1x128x128xbf16> to vector<128x128xbf16>
      %cst_228 = arith.constant dense<0.000000e+00> : vector<128x128xf32>
      %250 = tpu.matmul %247, %249, %cst_228 {dimension_numbers = #tpu.dot_dimension_numbers<[1], [0], [0], [1], [0, 0, 1, 1], [], []>} : vector<128x128xbf16>, vector<128x128xbf16>, vector<128x128xf32> -> vector<128x128xf32>
      %251 = arith.addf %242, %250 : vector<128x128xf32>
      %c0_i32_229 = arith.constant 0 : i32
      %252 = arith.addi %232, %c0_i32_229 : i32
      %253 = arith.index_cast %252 : i32 to index
      %c0_230 = arith.constant 0 : index
      %c2_231 = arith.constant 2 : index
      %c0_232 = arith.constant 0 : index
      %c0_233 = arith.constant 0 : index
      %254 = vector.load %arg9[%253, %c0_230, %c2_231, %c0_232, %c0_233] : memref<10x2x10x16x128xbf16, #tpu.memory_space<vmem>>, vector<1x1x8x16x128xbf16>
      %255 = vector.shape_cast %254 : vector<1x1x8x16x128xbf16> to vector<8x16x128xbf16>
      %256 = vector.shape_cast %255 : vector<8x16x128xbf16> to vector<128x128xbf16>
      %c0_234 = arith.constant 0 : index
      %c2_235 = arith.constant 2 : index
      %c0_236 = arith.constant 0 : index
      %c0_237 = arith.constant 0 : index
      %257 = vector.load %arg4[%c0_234, %c2_235, %c0_236, %c0_237] : memref<5x3x128x128xbf16, #tpu.memory_space<vmem>>, vector<1x1x128x128xbf16>
      %258 = vector.shape_cast %257 : vector<1x1x128x128xbf16> to vector<128x128xbf16>
      %cst_238 = arith.constant dense<0.000000e+00> : vector<128x128xf32>
      %259 = tpu.matmul %256, %258, %cst_238 {dimension_numbers = #tpu.dot_dimension_numbers<[1], [0], [0], [1], [0, 0, 1, 1], [], []>} : vector<128x128xbf16>, vector<128x128xbf16>, vector<128x128xf32> -> vector<128x128xf32>
      %260 = arith.addf %251, %259 : vector<128x128xf32>
      %c0_i32_239 = arith.constant 0 : i32
      %261 = arith.addi %232, %c0_i32_239 : i32
      %262 = arith.index_cast %261 : i32 to index
      %c1_240 = arith.constant 1 : index
      %c0_241 = arith.constant 0 : index
      %c0_242 = arith.constant 0 : index
      %c0_243 = arith.constant 0 : index
      %263 = vector.load %arg9[%262, %c1_240, %c0_241, %c0_242, %c0_243] : memref<10x2x10x16x128xbf16, #tpu.memory_space<vmem>>, vector<1x1x8x16x128xbf16>
      %264 = vector.shape_cast %263 : vector<1x1x8x16x128xbf16> to vector<8x16x128xbf16>
      %265 = vector.shape_cast %264 : vector<8x16x128xbf16> to vector<128x128xbf16>
      %c1_244 = arith.constant 1 : index
      %c0_245 = arith.constant 0 : index
      %c0_246 = arith.constant 0 : index
      %c0_247 = arith.constant 0 : index
      %266 = vector.load %arg4[%c1_244, %c0_245, %c0_246, %c0_247] : memref<5x3x128x128xbf16, #tpu.memory_space<vmem>>, vector<1x1x128x128xbf16>
      %267 = vector.shape_cast %266 : vector<1x1x128x128xbf16> to vector<128x128xbf16>
      %cst_248 = arith.constant dense<0.000000e+00> : vector<128x128xf32>
      %268 = tpu.matmul %265, %267, %cst_248 {dimension_numbers = #tpu.dot_dimension_numbers<[1], [0], [0], [1], [0, 0, 1, 1], [], []>} : vector<128x128xbf16>, vector<128x128xbf16>, vector<128x128xf32> -> vector<128x128xf32>
      %269 = arith.addf %260, %268 : vector<128x128xf32>
      %c0_i32_249 = arith.constant 0 : i32
      %270 = arith.addi %232, %c0_i32_249 : i32
      %271 = arith.index_cast %270 : i32 to index
      %c1_250 = arith.constant 1 : index
      %c1_251 = arith.constant 1 : index
      %c0_252 = arith.constant 0 : index
      %c0_253 = arith.constant 0 : index
      %272 = vector.load %arg9[%271, %c1_250, %c1_251, %c0_252, %c0_253] : memref<10x2x10x16x128xbf16, #tpu.memory_space<vmem>>, vector<1x1x8x16x128xbf16>
      %273 = vector.shape_cast %272 : vector<1x1x8x16x128xbf16> to vector<8x16x128xbf16>
      %274 = vector.shape_cast %273 : vector<8x16x128xbf16> to vector<128x128xbf16>
      %c1_254 = arith.constant 1 : index
      %c1_255 = arith.constant 1 : index
      %c0_256 = arith.constant 0 : index
      %c0_257 = arith.constant 0 : index
      %275 = vector.load %arg4[%c1_254, %c1_255, %c0_256, %c0_257] : memref<5x3x128x128xbf16, #tpu.memory_space<vmem>>, vector<1x1x128x128xbf16>
      %276 = vector.shape_cast %275 : vector<1x1x128x128xbf16> to vector<128x128xbf16>
      %cst_258 = arith.constant dense<0.000000e+00> : vector<128x128xf32>
      %277 = tpu.matmul %274, %276, %cst_258 {dimension_numbers = #tpu.dot_dimension_numbers<[1], [0], [0], [1], [0, 0, 1, 1], [], []>} : vector<128x128xbf16>, vector<128x128xbf16>, vector<128x128xf32> -> vector<128x128xf32>
      %278 = arith.addf %269, %277 : vector<128x128xf32>
      %c0_i32_259 = arith.constant 0 : i32
      %279 = arith.addi %232, %c0_i32_259 : i32
      %280 = arith.index_cast %279 : i32 to index
      %c1_260 = arith.constant 1 : index
      %c2_261 = arith.constant 2 : index
      %c0_262 = arith.constant 0 : index
      %c0_263 = arith.constant 0 : index
      %281 = vector.load %arg9[%280, %c1_260, %c2_261, %c0_262, %c0_263] : memref<10x2x10x16x128xbf16, #tpu.memory_space<vmem>>, vector<1x1x8x16x128xbf16>
      %282 = vector.shape_cast %281 : vector<1x1x8x16x128xbf16> to vector<8x16x128xbf16>
      %283 = vector.shape_cast %282 : vector<8x16x128xbf16> to vector<128x128xbf16>
      %c1_264 = arith.constant 1 : index
      %c2_265 = arith.constant 2 : index
      %c0_266 = arith.constant 0 : index
      %c0_267 = arith.constant 0 : index
      %284 = vector.load %arg4[%c1_264, %c2_265, %c0_266, %c0_267] : memref<5x3x128x128xbf16, #tpu.memory_space<vmem>>, vector<1x1x128x128xbf16>
      %285 = vector.shape_cast %284 : vector<1x1x128x128xbf16> to vector<128x128xbf16>
      %cst_268 = arith.constant dense<0.000000e+00> : vector<128x128xf32>
      %286 = tpu.matmul %283, %285, %cst_268 {dimension_numbers = #tpu.dot_dimension_numbers<[1], [0], [0], [1], [0, 0, 1, 1], [], []>} : vector<128x128xbf16>, vector<128x128xbf16>, vector<128x128xf32> -> vector<128x128xf32>
      %287 = arith.addf %278, %286 : vector<128x128xf32>
      %c1_i32_269 = arith.constant 1 : i32
      %288 = arith.addi %232, %c1_i32_269 : i32
      %289 = arith.index_cast %288 : i32 to index
      %c0_270 = arith.constant 0 : index
      %c0_271 = arith.constant 0 : index
      %c0_272 = arith.constant 0 : index
      %c0_273 = arith.constant 0 : index
      %290 = vector.load %arg9[%289, %c0_270, %c0_271, %c0_272, %c0_273] : memref<10x2x10x16x128xbf16, #tpu.memory_space<vmem>>, vector<1x1x8x16x128xbf16>
      %291 = vector.shape_cast %290 : vector<1x1x8x16x128xbf16> to vector<8x16x128xbf16>
      %292 = vector.shape_cast %291 : vector<8x16x128xbf16> to vector<128x128xbf16>
      %c2_274 = arith.constant 2 : index
      %c0_275 = arith.constant 0 : index
      %c0_276 = arith.constant 0 : index
      %c0_277 = arith.constant 0 : index
      %293 = vector.load %arg4[%c2_274, %c0_275, %c0_276, %c0_277] : memref<5x3x128x128xbf16, #tpu.memory_space<vmem>>, vector<1x1x128x128xbf16>
      %294 = vector.shape_cast %293 : vector<1x1x128x128xbf16> to vector<128x128xbf16>
      %cst_278 = arith.constant dense<0.000000e+00> : vector<128x128xf32>
      %295 = tpu.matmul %292, %294, %cst_278 {dimension_numbers = #tpu.dot_dimension_numbers<[1], [0], [0], [1], [0, 0, 1, 1], [], []>} : vector<128x128xbf16>, vector<128x128xbf16>, vector<128x128xf32> -> vector<128x128xf32>
      %296 = arith.addf %287, %295 : vector<128x128xf32>
      %c1_i32_279 = arith.constant 1 : i32
      %297 = arith.addi %232, %c1_i32_279 : i32
      %298 = arith.index_cast %297 : i32 to index
      %c0_280 = arith.constant 0 : index
      %c1_281 = arith.constant 1 : index
      %c0_282 = arith.constant 0 : index
      %c0_283 = arith.constant 0 : index
      %299 = vector.load %arg9[%298, %c0_280, %c1_281, %c0_282, %c0_283] : memref<10x2x10x16x128xbf16, #tpu.memory_space<vmem>>, vector<1x1x8x16x128xbf16>
      %300 = vector.shape_cast %299 : vector<1x1x8x16x128xbf16> to vector<8x16x128xbf16>
      %301 = vector.shape_cast %300 : vector<8x16x128xbf16> to vector<128x128xbf16>
      %c2_284 = arith.constant 2 : index
      %c1_285 = arith.constant 1 : index
      %c0_286 = arith.constant 0 : index
      %c0_287 = arith.constant 0 : index
      %302 = vector.load %arg4[%c2_284, %c1_285, %c0_286, %c0_287] : memref<5x3x128x128xbf16, #tpu.memory_space<vmem>>, vector<1x1x128x128xbf16>
      %303 = vector.shape_cast %302 : vector<1x1x128x128xbf16> to vector<128x128xbf16>
      %cst_288 = arith.constant dense<0.000000e+00> : vector<128x128xf32>
      %304 = tpu.matmul %301, %303, %cst_288 {dimension_numbers = #tpu.dot_dimension_numbers<[1], [0], [0], [1], [0, 0, 1, 1], [], []>} : vector<128x128xbf16>, vector<128x128xbf16>, vector<128x128xf32> -> vector<128x128xf32>
      %305 = arith.addf %296, %304 : vector<128x128xf32>
      %c1_i32_289 = arith.constant 1 : i32
      %306 = arith.addi %232, %c1_i32_289 : i32
      %307 = arith.index_cast %306 : i32 to index
      %c0_290 = arith.constant 0 : index
      %c2_291 = arith.constant 2 : index
      %c0_292 = arith.constant 0 : index
      %c0_293 = arith.constant 0 : index
      %308 = vector.load %arg9[%307, %c0_290, %c2_291, %c0_292, %c0_293] : memref<10x2x10x16x128xbf16, #tpu.memory_space<vmem>>, vector<1x1x8x16x128xbf16>
      %309 = vector.shape_cast %308 : vector<1x1x8x16x128xbf16> to vector<8x16x128xbf16>
      %310 = vector.shape_cast %309 : vector<8x16x128xbf16> to vector<128x128xbf16>
      %c2_294 = arith.constant 2 : index
      %c2_295 = arith.constant 2 : index
      %c0_296 = arith.constant 0 : index
      %c0_297 = arith.constant 0 : index
      %311 = vector.load %arg4[%c2_294, %c2_295, %c0_296, %c0_297] : memref<5x3x128x128xbf16, #tpu.memory_space<vmem>>, vector<1x1x128x128xbf16>
      %312 = vector.shape_cast %311 : vector<1x1x128x128xbf16> to vector<128x128xbf16>
      %cst_298 = arith.constant dense<0.000000e+00> : vector<128x128xf32>
      %313 = tpu.matmul %310, %312, %cst_298 {dimension_numbers = #tpu.dot_dimension_numbers<[1], [0], [0], [1], [0, 0, 1, 1], [], []>} : vector<128x128xbf16>, vector<128x128xbf16>, vector<128x128xf32> -> vector<128x128xf32>
      %314 = arith.addf %305, %313 : vector<128x128xf32>
      %c1_i32_299 = arith.constant 1 : i32
      %315 = arith.addi %232, %c1_i32_299 : i32
      %316 = arith.index_cast %315 : i32 to index
      %c1_300 = arith.constant 1 : index
      %c0_301 = arith.constant 0 : index
      %c0_302 = arith.constant 0 : index
      %c0_303 = arith.constant 0 : index
      %317 = vector.load %arg9[%316, %c1_300, %c0_301, %c0_302, %c0_303] : memref<10x2x10x16x128xbf16, #tpu.memory_space<vmem>>, vector<1x1x8x16x128xbf16>
      %318 = vector.shape_cast %317 : vector<1x1x8x16x128xbf16> to vector<8x16x128xbf16>
      %319 = vector.shape_cast %318 : vector<8x16x128xbf16> to vector<128x128xbf16>
      %c3_304 = arith.constant 3 : index
      %c0_305 = arith.constant 0 : index
      %c0_306 = arith.constant 0 : index
      %c0_307 = arith.constant 0 : index
      %320 = vector.load %arg4[%c3_304, %c0_305, %c0_306, %c0_307] : memref<5x3x128x128xbf16, #tpu.memory_space<vmem>>, vector<1x1x128x128xbf16>
      %321 = vector.shape_cast %320 : vector<1x1x128x128xbf16> to vector<128x128xbf16>
      %cst_308 = arith.constant dense<0.000000e+00> : vector<128x128xf32>
      %322 = tpu.matmul %319, %321, %cst_308 {dimension_numbers = #tpu.dot_dimension_numbers<[1], [0], [0], [1], [0, 0, 1, 1], [], []>} : vector<128x128xbf16>, vector<128x128xbf16>, vector<128x128xf32> -> vector<128x128xf32>
      %323 = arith.addf %314, %322 : vector<128x128xf32>
      %c1_i32_309 = arith.constant 1 : i32
      %324 = arith.addi %232, %c1_i32_309 : i32
      %325 = arith.index_cast %324 : i32 to index
      %c1_310 = arith.constant 1 : index
      %c1_311 = arith.constant 1 : index
      %c0_312 = arith.constant 0 : index
      %c0_313 = arith.constant 0 : index
      %326 = vector.load %arg9[%325, %c1_310, %c1_311, %c0_312, %c0_313] : memref<10x2x10x16x128xbf16, #tpu.memory_space<vmem>>, vector<1x1x8x16x128xbf16>
      %327 = vector.shape_cast %326 : vector<1x1x8x16x128xbf16> to vector<8x16x128xbf16>
      %328 = vector.shape_cast %327 : vector<8x16x128xbf16> to vector<128x128xbf16>
      %c3_314 = arith.constant 3 : index
      %c1_315 = arith.constant 1 : index
      %c0_316 = arith.constant 0 : index
      %c0_317 = arith.constant 0 : index
      %329 = vector.load %arg4[%c3_314, %c1_315, %c0_316, %c0_317] : memref<5x3x128x128xbf16, #tpu.memory_space<vmem>>, vector<1x1x128x128xbf16>
      %330 = vector.shape_cast %329 : vector<1x1x128x128xbf16> to vector<128x128xbf16>
      %cst_318 = arith.constant dense<0.000000e+00> : vector<128x128xf32>
      %331 = tpu.matmul %328, %330, %cst_318 {dimension_numbers = #tpu.dot_dimension_numbers<[1], [0], [0], [1], [0, 0, 1, 1], [], []>} : vector<128x128xbf16>, vector<128x128xbf16>, vector<128x128xf32> -> vector<128x128xf32>
      %332 = arith.addf %323, %331 : vector<128x128xf32>
      %c1_i32_319 = arith.constant 1 : i32
      %333 = arith.addi %232, %c1_i32_319 : i32
      %334 = arith.index_cast %333 : i32 to index
      %c1_320 = arith.constant 1 : index
      %c2_321 = arith.constant 2 : index
      %c0_322 = arith.constant 0 : index
      %c0_323 = arith.constant 0 : index
      %335 = vector.load %arg9[%334, %c1_320, %c2_321, %c0_322, %c0_323] : memref<10x2x10x16x128xbf16, #tpu.memory_space<vmem>>, vector<1x1x8x16x128xbf16>
      %336 = vector.shape_cast %335 : vector<1x1x8x16x128xbf16> to vector<8x16x128xbf16>
      %337 = vector.shape_cast %336 : vector<8x16x128xbf16> to vector<128x128xbf16>
      %c3_324 = arith.constant 3 : index
      %c2_325 = arith.constant 2 : index
      %c0_326 = arith.constant 0 : index
      %c0_327 = arith.constant 0 : index
      %338 = vector.load %arg4[%c3_324, %c2_325, %c0_326, %c0_327] : memref<5x3x128x128xbf16, #tpu.memory_space<vmem>>, vector<1x1x128x128xbf16>
      %339 = vector.shape_cast %338 : vector<1x1x128x128xbf16> to vector<128x128xbf16>
      %cst_328 = arith.constant dense<0.000000e+00> : vector<128x128xf32>
      %340 = tpu.matmul %337, %339, %cst_328 {dimension_numbers = #tpu.dot_dimension_numbers<[1], [0], [0], [1], [0, 0, 1, 1], [], []>} : vector<128x128xbf16>, vector<128x128xbf16>, vector<128x128xf32> -> vector<128x128xf32>
      %341 = arith.addf %332, %340 : vector<128x128xf32>
      %c2_i32 = arith.constant 2 : i32
      %342 = arith.addi %232, %c2_i32 : i32
      %343 = arith.index_cast %342 : i32 to index
      %c0_329 = arith.constant 0 : index
      %c0_330 = arith.constant 0 : index
      %c0_331 = arith.constant 0 : index
      %c0_332 = arith.constant 0 : index
      %344 = vector.load %arg9[%343, %c0_329, %c0_330, %c0_331, %c0_332] : memref<10x2x10x16x128xbf16, #tpu.memory_space<vmem>>, vector<1x1x8x16x128xbf16>
      %345 = vector.shape_cast %344 : vector<1x1x8x16x128xbf16> to vector<8x16x128xbf16>
      %346 = vector.shape_cast %345 : vector<8x16x128xbf16> to vector<128x128xbf16>
      %c4_333 = arith.constant 4 : index
      %c0_334 = arith.constant 0 : index
      %c0_335 = arith.constant 0 : index
      %c0_336 = arith.constant 0 : index
      %347 = vector.load %arg4[%c4_333, %c0_334, %c0_335, %c0_336] : memref<5x3x128x128xbf16, #tpu.memory_space<vmem>>, vector<1x1x128x128xbf16>
      %348 = vector.shape_cast %347 : vector<1x1x128x128xbf16> to vector<128x128xbf16>
      %cst_337 = arith.constant dense<0.000000e+00> : vector<128x128xf32>
      %349 = tpu.matmul %346, %348, %cst_337 {dimension_numbers = #tpu.dot_dimension_numbers<[1], [0], [0], [1], [0, 0, 1, 1], [], []>} : vector<128x128xbf16>, vector<128x128xbf16>, vector<128x128xf32> -> vector<128x128xf32>
      %350 = arith.addf %341, %349 : vector<128x128xf32>
      %c2_i32_338 = arith.constant 2 : i32
      %351 = arith.addi %232, %c2_i32_338 : i32
      %352 = arith.index_cast %351 : i32 to index
      %c0_339 = arith.constant 0 : index
      %c1_340 = arith.constant 1 : index
      %c0_341 = arith.constant 0 : index
      %c0_342 = arith.constant 0 : index
      %353 = vector.load %arg9[%352, %c0_339, %c1_340, %c0_341, %c0_342] : memref<10x2x10x16x128xbf16, #tpu.memory_space<vmem>>, vector<1x1x8x16x128xbf16>
      %354 = vector.shape_cast %353 : vector<1x1x8x16x128xbf16> to vector<8x16x128xbf16>
      %355 = vector.shape_cast %354 : vector<8x16x128xbf16> to vector<128x128xbf16>
      %c4_343 = arith.constant 4 : index
      %c1_344 = arith.constant 1 : index
      %c0_345 = arith.constant 0 : index
      %c0_346 = arith.constant 0 : index
      %356 = vector.load %arg4[%c4_343, %c1_344, %c0_345, %c0_346] : memref<5x3x128x128xbf16, #tpu.memory_space<vmem>>, vector<1x1x128x128xbf16>
      %357 = vector.shape_cast %356 : vector<1x1x128x128xbf16> to vector<128x128xbf16>
      %cst_347 = arith.constant dense<0.000000e+00> : vector<128x128xf32>
      %358 = tpu.matmul %355, %357, %cst_347 {dimension_numbers = #tpu.dot_dimension_numbers<[1], [0], [0], [1], [0, 0, 1, 1], [], []>} : vector<128x128xbf16>, vector<128x128xbf16>, vector<128x128xf32> -> vector<128x128xf32>
      %359 = arith.addf %350, %358 : vector<128x128xf32>
      %c2_i32_348 = arith.constant 2 : i32
      %360 = arith.addi %232, %c2_i32_348 : i32
      %361 = arith.index_cast %360 : i32 to index
      %c0_349 = arith.constant 0 : index
      %c2_350 = arith.constant 2 : index
      %c0_351 = arith.constant 0 : index
      %c0_352 = arith.constant 0 : index
      %362 = vector.load %arg9[%361, %c0_349, %c2_350, %c0_351, %c0_352] : memref<10x2x10x16x128xbf16, #tpu.memory_space<vmem>>, vector<1x1x8x16x128xbf16>
      %363 = vector.shape_cast %362 : vector<1x1x8x16x128xbf16> to vector<8x16x128xbf16>
      %364 = vector.shape_cast %363 : vector<8x16x128xbf16> to vector<128x128xbf16>
      %c4_353 = arith.constant 4 : index
      %c2_354 = arith.constant 2 : index
      %c0_355 = arith.constant 0 : index
      %c0_356 = arith.constant 0 : index
      %365 = vector.load %arg4[%c4_353, %c2_354, %c0_355, %c0_356] : memref<5x3x128x128xbf16, #tpu.memory_space<vmem>>, vector<1x1x128x128xbf16>
      %366 = vector.shape_cast %365 : vector<1x1x128x128xbf16> to vector<128x128xbf16>
      %cst_357 = arith.constant dense<0.000000e+00> : vector<128x128xf32>
      %367 = tpu.matmul %364, %366, %cst_357 {dimension_numbers = #tpu.dot_dimension_numbers<[1], [0], [0], [1], [0, 0, 1, 1], [], []>} : vector<128x128xbf16>, vector<128x128xbf16>, vector<128x128xf32> -> vector<128x128xf32>
      %368 = arith.addf %359, %367 : vector<128x128xf32>
      %c0_358 = arith.constant 0 : index
      %c0_359 = arith.constant 0 : index
      %369 = vector.load %arg5[%c0_358, %c0_359] : memref<1x128xf32, #tpu.memory_space<vmem>>, vector<1x128xf32>
      %370 = vector.broadcast %369 : vector<1x128xf32> to vector<128x128xf32>
      %371 = arith.addf %368, %370 : vector<128x128xf32>
      %cst_360 = arith.constant 3.000000e-01 : f32
      %372 = vector.broadcast %cst_360 : f32 to vector<128x128xf32>
      %373 = arith.mulf %372, %371 : vector<128x128xf32>
      %374 = arith.maximumf %371, %373 : vector<128x128xf32>
      %375 = arith.index_cast %232 : i32 to index
      %c0_361 = arith.constant 0 : index
      %c0_362 = arith.constant 0 : index
      %376 = vector.load %arg6[%375, %c0_361, %c0_362] : memref<8x8x128xf32, #tpu.memory_space<vmem>>, vector<1x8x128xf32>
      %377 = vector.shape_cast %376 : vector<1x8x128xf32> to vector<8x128xf32>
      %378 = vector.shape_cast %374 : vector<128x128xf32> to vector<8x16x128xf32>
      %379 = vector.shape_cast %377 : vector<8x128xf32> to vector<8x1x128xf32>
      %380 = vector.broadcast %379 : vector<8x1x128xf32> to vector<8x16x128xf32>
      %381 = arith.mulf %378, %380 : vector<8x16x128xf32>
      %cst_363 = arith.constant dense<0.000000e+00> : vector<8x16xf32>
      %382 = vector.multi_reduction <add>, %381, %cst_363 [2] : vector<8x16x128xf32> to vector<8x16xf32>
      %383 = vector.shape_cast %382 : vector<8x16xf32> to vector<8x16x1xf32>
      %cst_364 = arith.constant dense<0.000000e+00> : vector<16x1xf32>
      %384 = vector.multi_reduction <add>, %383, %cst_364 [0] : vector<8x16x1xf32> to vector<16x1xf32>
      %c0_365 = arith.constant 0 : index
      %c0_366 = arith.constant 0 : index
      %385 = vector.load %arg8[%c0_365, %c0_366] : memref<16x1xf32, #tpu.memory_space<vmem>>, vector<16x1xf32>
      %386 = arith.addf %385, %384 : vector<16x1xf32>
      %c0_367 = arith.constant 0 : index
      %c0_368 = arith.constant 0 : index
      %387 = vector.load %arg8[%c0_367, %c0_368] : memref<16x1xf32, #tpu.memory_space<vmem>>, vector<16x1xf32>
      tpu.vector_store %arg8[%c0_367, %c0_368], %386 {strides = array<i32>} : memref<16x1xf32, #tpu.memory_space<vmem>>, vector<16x1xf32>,
    }
    %c7_i32_205 = arith.constant 7 : i32
    return
  }
  func.func @transform_0(%arg0: i32) -> (i32, i32, i32, i32) {
    %c0_i32 = arith.constant 0 : i32
    %c0_i32_0 = arith.constant 0 : i32
    %c0_i32_1 = arith.constant 0 : i32
    %c0_i32_2 = arith.constant 0 : i32
    return %c0_i32, %c0_i32_0, %arg0, %c0_i32_1 : i32, i32, i32, i32
  }
  func.func @transform_1(%arg0: i32) -> (i32, i32) {
    %c0_i32 = arith.constant 0 : i32
    %c0_i32_0 = arith.constant 0 : i32
    %c0_i32_1 = arith.constant 0 : i32
    return %c0_i32, %c0_i32_0 : i32, i32
  }
  func.func @transform_2(%arg0: i32) -> (i32, i32) {
    %c0_i32 = arith.constant 0 : i32
    %c0_i32_0 = arith.constant 0 : i32
    %c0_i32_1 = arith.constant 0 : i32
    return %c0_i32, %c0_i32_0 : i32, i32
  }
  func.func @transform_3(%arg0: i32) -> (i32, i32, i32, i32) {
    %c0_i32 = arith.constant 0 : i32
    %c0_i32_0 = arith.constant 0 : i32
    %c0_i32_1 = arith.constant 0 : i32
    %c0_i32_2 = arith.constant 0 : i32
    %c0_i32_3 = arith.constant 0 : i32
    return %c0_i32, %c0_i32_0, %c0_i32_1, %c0_i32_2 : i32, i32, i32, i32
  }
  func.func @transform_4(%arg0: i32) -> (i32, i32) {
    %c0_i32 = arith.constant 0 : i32
    %c0_i32_0 = arith.constant 0 : i32
    %c0_i32_1 = arith.constant 0 : i32
    return %c0_i32, %c0_i32_0 : i32, i32
  }
  func.func @transform_5(%arg0: i32) -> (i32, i32, i32) {
    %c0_i32 = arith.constant 0 : i32
    %c0_i32_0 = arith.constant 0 : i32
    %c0_i32_1 = arith.constant 0 : i32
    %c0_i32_2 = arith.constant 0 : i32
    return %c0_i32, %c0_i32_0, %c0_i32_1 : i32, i32, i32
  }
  func.func @transform_6(%arg0: i32) -> (i32, i32) {
    %c0_i32 = arith.constant 0 : i32
    %c0_i32_0 = arith.constant 0 : i32
    %c0_i32_1 = arith.constant 0 : i32
    return %c0_i32, %c0_i32_0 : i32, i32
  }
  func.func @transform_7(%arg0: i32) -> (i32, i32) {
    %c0_i32 = arith.constant 0 : i32
    %c0_i32_0 = arith.constant 0 : i32
    return %arg0, %c0_i32 : i32, i32
  }
}

</mosaic_0001>

<bundles_post_ra>
// kernel: discriminator_forward.1
= control target key start
LH: loop header
LB: loop body
LE: loop exit
PB: predicated region body
PF: predicated region fallthrough
CT: control target
= control target key end

     0   :  { %vm514_vm0 = vcmask 523264   ;;  %vm3345_vm1 = vcmask 7168   ;;  %s11212_s24 = smov 0   ;;  %s11956_s1 = inlined_call_operand.vmem [shape: bf16[64,128], index: 1, kind: input, shape index: {}]   ;;  %s11957_s3 = inlined_call_operand.vmem [shape: bf16[5,3,128,128], index: 3, kind: input, shape index: {}]   ;;  %s11958_s4 = inlined_call_operand.vmem [shape: f32[1,128], index: 4, kind: input, shape index: {}]   ;;  %s11959_s5 = inlined_call_operand.vmem [shape: f32[8,8,128], index: 5, kind: input, shape index: {}]   ;;  %s11960_s6 = inlined_call_operand.<no memory space> [shape: f32[1,1], index: 6, kind: input, shape index: {}]   ;;  %s11961_s2 = inlined_call_operand.vmem [shape: f32[1,128], index: 2, kind: input, shape index: {}]   ;;  %s11962_s0 = inlined_call_operand.vmem [shape: bf16[14,7,16,64], index: 0, kind: input, shape index: {}]   ;;  %s11963_s7 = inlined_call_operand.vmem [shape: f32[16,1], index: 7, kind: output, shape index: {}]  }
   0x1   :  { %v12_v0 = vstv %s11960_s6  ;;  %v8820_v1 = vld [vmem:[%s11956_s1 + $0x18] sm:$0xff]  ;;  %v8819_v3 = vld [vmem:[%s11956_s1 + $0x10] sm:$0xff]  ;;  %v8818_v5 = vld [vmem:[%s11956_s1 + $0x8] sm:$0xff] }
   0x2   :  { %v8831_v2 = vld [vmem:[%s11956_s1 + $0x18] sm:$0xff]  ;;  %13 = vst [vmem:[#allocation3] sm:$0x1] %v12_v0  ;;  %540 = vmatpush.bf16.msra.mxu0 %v8820_v1  ;;  %9779 = vmatpush.bf16.msra.mxu2 %v8820_v1  ;;  %v8830_v4 = vld [vmem:[%s11956_s1 + $0x10] sm:$0xff]  ;;  %v8829_v6 = vld [vmem:[%s11956_s1 + $0x8] sm:$0xff]  ;;  %v9844_v1 = vmov 0  }
   0x3   :  { %748 = vmatpush.bf16.msra.mxu1 %v8831_v2  ;;  %9783 = vmatpush.bf16.msra.mxu3 %v8831_v2  ;;  %v8817_v7 = vld [vmem:[%s11956_s1] sm:$0xff]  ;;  %v8864_v9 = vld [vmem:[%s11956_s1 + $0x18] sm:$0xff]  ;;  %v8863_v17 = vld [vmem:[%s11956_s1 + $0x10] sm:$0xff]  ;;  %29 = vst [vmem:[#allocation2] sm:$0xf] %v9844_v1 }
   0x4   :  { %v8828_v8 = vld [vmem:[%s11956_s1] sm:$0xff]  ;;  %v8875_v10 = vld [vmem:[%s11956_s1 + $0x18] sm:$0xff]  ;;  %v8874_v18 = vld [vmem:[%s11956_s1 + $0x10] sm:$0xff]  ;;  %30 = vst [vmem:[#allocation2 + $0x4] sm:$0xf] %v9844_v1 }
   0x5   :  { %v8810_v11 = vld [vmem:[%s11962_s0] sm:$0xff]  ;;  %v8821_v13 = vld [vmem:[%s11962_s0 + $0x38] sm:$0xff]  ;;  %v8841_v19 = vld [vmem:[%s11956_s1 + $0x10] sm:$0xff]  ;;  %31 = vst [vmem:[#allocation2 + $0x8] sm:$0xf] %v9844_v1 }
   0x6   :  { %541 = vmatpush.bf16.msra.mxu0 %v8819_v3  ;;  %9780 = vmatpush.bf16.msra.mxu2 %v8819_v3  ;;  %v8814_v12 = vld [vmem:[%s11962_s0 + $0x20] sm:$0xff]  ;;  %v8825_v14 = vld [vmem:[%s11962_s0 + $0x58] sm:$0xff]  ;;  %v8852_v20 = vld [vmem:[%s11956_s1 + $0x10] sm:$0xff]  ;;  %32 = vst [vmem:[#allocation2 + $0xc] sm:$0xf] %v9844_v1 }
   0x7   :  { %749 = vmatpush.bf16.msra.mxu1 %v8830_v4  ;;  %9784 = vmatpush.bf16.msra.mxu3 %v8830_v4  ;;  %v8842_v15 = vld [vmem:[%s11956_s1 + $0x18] sm:$0xff]  ;;  %v8862_v21 = vld [vmem:[%s11956_s1 + $0x8] sm:$0xff]  ;;  %v8839_v25 = vld [vmem:[%s11956_s1] sm:$0xff]  ;;  %33 = vst [vmem:[#allocation2 + $0x10] sm:$0xf] %v9844_v1 }
   0x8   :  { %v8853_v16 = vld [vmem:[%s11956_s1 + $0x18] sm:$0xff]  ;;  %v8873_v22 = vld [vmem:[%s11956_s1 + $0x8] sm:$0xff]  ;;  %v8850_v26 = vld [vmem:[%s11956_s1] sm:$0xff]  ;;  %34 = vst [vmem:[#allocation2 + $0x14] sm:$0xf] %v9844_v1 }
   0x9   :  { %v8840_v23 = vld [vmem:[%s11956_s1 + $0x8] sm:$0xff]  ;;  %v8822_v29 = vld [vmem:[%s11962_s0 + $0x40] sm:$0xff]  ;;  %v8886_v33 = vld [vmem:[%s11956_s1 + $0x18] sm:$0xff]  ;;  %35 = vst [vmem:[#allocation2 + $0x18] sm:$0xf] %v9844_v1 }
   0xa   :  { %542 = vmatpush.bf16.msra.mxu0 %v8818_v5  ;;  %9781 = vmatpush.bf16.msra.mxu2 %v8818_v5  ;;  %v8851_v24 = vld [vmem:[%s11956_s1 + $0x8] sm:$0xff]  ;;  %v8826_v30 = vld [vmem:[%s11962_s0 + $0x60] sm:$0xff]  ;;  %v8897_v34 = vld [vmem:[%s11956_s1 + $0x18] sm:$0xff]  ;;  %36 = vst [vmem:[#allocation2 + $0x1c] sm:$0xf] %v9844_v1 }
   0xb   :  { %750 = vmatpush.bf16.msra.mxu1 %v8829_v6  ;;  %9785 = vmatpush.bf16.msra.mxu3 %v8829_v6  ;;  %v8811_v27 = vld [vmem:[%s11962_s0 + $0x8] sm:$0xff]  ;;  %v8861_v31 = vld [vmem:[%s11956_s1] sm:$0xff]  ;;  %v8812_v35 = vld [vmem:[%s11962_s0 + $0x10] sm:$0xff]  ;;  %37 = vst [vmem:[#allocation2 + $0x20] sm:$0xf] %v9844_v1 }
   0xc   :  { %v8815_v28 = vld [vmem:[%s11962_s0 + $0x28] sm:$0xff]  ;;  %v8872_v32 = vld [vmem:[%s11956_s1] sm:$0xff]  ;;  %v8816_v36 = vld [vmem:[%s11962_s0 + $0x30] sm:$0xff]  ;;  %38 = vst [vmem:[#allocation2 + $0x24] sm:$0xf] %v9844_v1 }
   0xd   :  { %v8823_v37 = vld [vmem:[%s11962_s0 + $0x48] sm:$0xff]  ;;  %v8908_v39 = vld [vmem:[%s11956_s1 + $0x18] sm:$0xff]  ;;  %v8832_v42 = vld [vmem:[%s11962_s0 + $0x70] sm:$0xff]  ;;  %39 = vst [vmem:[#allocation2 + $0x28] sm:$0xf] %v9844_v1 }
   0xe   :  { %543 = vmatpush.bf16.msra.mxu0 %v8817_v7  ;;  %9782 = vmatpush.bf16.msra.mxu2 %v8817_v7  ;;  %v8827_v38 = vld [vmem:[%s11962_s0 + $0x68] sm:$0xff]  ;;  %v8919_v40 = vld [vmem:[%s11956_s1 + $0x18] sm:$0xff]  ;;  %v8824_v43 = vld [vmem:[%s11962_s0 + $0x50] sm:$0xff]  ;;  %40 = vst [vmem:[#allocation2 + $0x2c] sm:$0xf] %v9844_v1 }
   0xf   :  { %751 = vmatpush.bf16.msra.mxu1 %v8828_v8  ;;  %9786 = vmatpush.bf16.msra.mxu3 %v8828_v8  ;;  %v8813_v41 = vld [vmem:[%s11962_s0 + $0x18] sm:$0xff]  ;;  %v8843_v44 = vld [vmem:[%s11962_s0 + $0xa8] sm:$0xff]  ;;  %v8885_v45 = vld [vmem:[%s11956_s1 + $0x10] sm:$0xff]  ;;  %41 = vst [vmem:[#allocation2 + $0x30] sm:$0xf] %v9844_v1 }
  0x10   :  { %v8896_v46 = vld [vmem:[%s11956_s1 + $0x10] sm:$0xff]  ;;  %v8833_v49 = vld [vmem:[%s11962_s0 + $0x78] sm:$0xff]  ;;  %v8854_v50 = vld [vmem:[%s11962_s0 + $0xe0] sm:$0xff]  ;;  %42 = vst [vmem:[#allocation2 + $0x34] sm:$0xf] %v9844_v1 }
  0x11   :  { %6536 = vmatmul.msk.bf16.vlgmr.msra.gmra.mxu0 %vm514_vm0, %v8810_v11  ;;  %6540 = vmatmul.msk.bf16.vlgmr.msra.gmra.mxu2 %vm514_vm0, %v8814_v12  ;;  %v8907_v47 = vld [vmem:[%s11956_s1 + $0x10] sm:$0xff]  ;;  %v8865_v52 = vld [vmem:[%s11962_s0 + $0x118] sm:$0xff]  ;;  %v8834_v53 = vld [vmem:[%s11962_s0 + $0x80] sm:$0xff]  ;;  %43 = vst [vmem:[#allocation2 + $0x38] sm:$0xf] %v9844_v1 }
  0x12   :  { %1372 = vmatpush.bf16.msrb.mxu0 %v8864_v9  ;;  %6601 = vmatmul.msk.bf16.vlgmr.msra.gmra.mxu1 %vm514_vm0, %v8821_v13  ;;  %v8918_v48 = vld [vmem:[%s11956_s1 + $0x10] sm:$0xff]  ;;  %v8855_v54 = vld [vmem:[%s11962_s0 + $0xe8] sm:$0xff]  ;;  %v8845_v55 = vld [vmem:[%s11962_s0 + $0xb8] sm:$0xff]  ;;  %44 = vst [vmem:[#allocation2 + $0x3c] sm:$0xf] %v9844_v1 }
  0x13   :  { %1580 = vmatpush.bf16.msrb.mxu1 %v8875_v10  ;;  %6605 = vmatmul.msk.bf16.vlgmr.msra.gmra.mxu3 %vm514_vm0, %v8825_v14  ;;  %v8844_v51 = vld [vmem:[%s11962_s0 + $0xb0] sm:$0xff]  ;;  %v8866_v56 = vld [vmem:[%s11962_s0 + $0x120] sm:$0xff]  ;;  %v8884_v57 = vld [vmem:[%s11956_s1 + $0x8] sm:$0xff]  ;;  %45 = vst [vmem:[#allocation2 + $0x40] sm:$0xf] %v9844_v1 }
  0x14   :  { %956 = vmatpush.bf16.msrb.mxu2 %v8842_v15  ;;  %1164 = vmatpush.bf16.msrb.mxu3 %v8853_v16  ;;  %v8895_v58 = vld [vmem:[%s11956_s1 + $0x8] sm:$0xff]  ;;  %v8856_v62 = vld [vmem:[%s11962_s0 + $0xf0] sm:$0xff]  ;;  %v8846_v63 = vld [vmem:[%s11962_s0 + $0xc0] sm:$0xff]  ;;  %46 = vst [vmem:[#allocation2 + $0x44] sm:$0xf] %v9844_v1 }
  0x15   :  { %v8906_v59 = vld [vmem:[%s11956_s1 + $0x8] sm:$0xff]  ;;  %v8836_v2 = vld [vmem:[%s11962_s0 + $0x90] sm:$0xff]  ;;  %v8857_v3 = vld [vmem:[%s11962_s0 + $0xf8] sm:$0xff]  ;;  %47 = vst [vmem:[#allocation2 + $0x48] sm:$0xf] %v9844_v1 }
  0x16   :  { %1373 = vmatpush.bf16.msrb.mxu0 %v8863_v17  ;;  %v8917_v60 = vld [vmem:[%s11956_s1 + $0x8] sm:$0xff]  ;;  %v8868_v5 = vld [vmem:[%s11962_s0 + $0x130] sm:$0xff]  ;;  %v8837_v6 = vld [vmem:[%s11962_s0 + $0x98] sm:$0xff]  ;;  %48 = vst [vmem:[#allocation2 + $0x4c] sm:$0xf] %v9844_v1 }
  0x17   :  { %1581 = vmatpush.bf16.msrb.mxu1 %v8874_v18  ;;  %v8835_v61 = vld [vmem:[%s11962_s0 + $0x88] sm:$0xff]  ;;  %v8858_v7 = vld [vmem:[%s11962_s0 + $0x100] sm:$0xff]  ;;  %v8848_v8 = vld [vmem:[%s11962_s0 + $0xd0] sm:$0xff]  ;;  %49 = vst [vmem:[#allocation2 + $0x50] sm:$0xf] %v9844_v1 }
  0x18   :  { %957 = vmatpush.bf16.msrb.mxu2 %v8841_v19  ;;  %1165 = vmatpush.bf16.msrb.mxu3 %v8852_v20  ;;  %v8867_v0 = vld [vmem:[%s11962_s0 + $0x128] sm:$0xff]  ;;  %v8869_v9 = vld [vmem:[%s11962_s0 + $0x138] sm:$0xff]  ;;  %50 = vst [vmem:[#allocation2 + $0x54] sm:$0xf] %v9844_v1  ;;  %v10331_v12 = vld [vmem:[%s11961_s2] ss:$0 sm:$0xff] }
  0x19   :  { %v8847_v4 = vld [vmem:[%s11962_s0 + $0xc8] sm:$0xff]  ;;  %51 = vst [vmem:[#allocation2 + $0x58] sm:$0xf] %v9844_v1 }
  0x1a   :  { %1374 = vmatpush.bf16.msrb.mxu0 %v8862_v21  ;;  %52 = vst [vmem:[#allocation2 + $0x5c] sm:$0xf] %v9844_v1 }
  0x1b   :  { %1582 = vmatpush.bf16.msrb.mxu1 %v8873_v22  ;;  %53 = vst [vmem:[#allocation2 + $0x60] sm:$0xf] %v9844_v1 }
  0x1c   :  { %958 = vmatpush.bf16.msrb.mxu2 %v8840_v23  ;;  %1166 = vmatpush.bf16.msrb.mxu3 %v8851_v24  ;;  %54 = vst [vmem:[#allocation2 + $0x64] sm:$0xf] %v9844_v1 }
  0x1d   :  { %55 = vst [vmem:[#allocation2 + $0x68] sm:$0xf] %v9844_v1 }
  0x1e   :  { %1375 = vmatpush.bf16.msrb.mxu0 %v8861_v31  ;;  %56 = vst [vmem:[#allocation2 + $0x6c] sm:$0xf] %v9844_v1  ;;  %v8883_v31 = vld [vmem:[%s11956_s1] sm:$0xff] }
  0x1f   :  { %1583 = vmatpush.bf16.msrb.mxu1 %v8872_v32  ;;  %57 = vst [vmem:[#allocation2 + $0x70] sm:$0xf] %v9844_v1  ;;  %v8894_v32 = vld [vmem:[%s11956_s1] sm:$0xff] }
  0x20   :  { %959 = vmatpush.bf16.msrb.mxu2 %v8839_v25  ;;  %1167 = vmatpush.bf16.msrb.mxu3 %v8850_v26  ;;  %58 = vst [vmem:[#allocation2 + $0x74] sm:$0xf] %v9844_v1 }
  0x21   :  { %6537 = vmatmul.msk.bf16.gmra.mxu0 %vm514_vm0, %v8811_v27  ;;  %6541 = vmatmul.msk.bf16.gmra.mxu2 %vm514_vm0, %v8815_v28  ;;  %59 = vst [vmem:[#allocation2 + $0x78] sm:$0xf] %v9844_v1  ;;  %v8838_v28 = vld [vmem:[%s11962_s0 + $0xa0] sm:$0xff] }
  0x22   :  { %6602 = vmatmul.msk.bf16.gmra.mxu1 %vm514_vm0, %v8822_v29  ;;  %2204 = vmatpush.bf16.msra.mxu0 %v8908_v39  ;;  %60 = vst [vmem:[#allocation2 + $0x7c] sm:$0xf] %v9844_v1  ;;  %v8849_v29 = vld [vmem:[%s11962_s0 + $0xd8] sm:$0xff] }
  0x23   :  { %6606 = vmatmul.msk.bf16.gmra.mxu3 %vm514_vm0, %v8826_v30  ;;  %2412 = vmatpush.bf16.msra.mxu1 %v8919_v40  ;;  %61 = vst [vmem:[#allocation2 + $0x80] sm:$0xf] %v9844_v1  ;;  %v8859_v30 = vld [vmem:[%s11962_s0 + $0x108] sm:$0xff]  ;;  %v10564_v40 = vld [vmem:[%s11961_s2] ss:$0 sm:$0xff] }
  0x24   :  { %1788 = vmatpush.bf16.msra.mxu2 %v8886_v33  ;;  %1996 = vmatpush.bf16.msra.mxu3 %v8897_v34  ;;  %62 = vst [vmem:[#allocation2 + $0x84] sm:$0xf] %v9844_v1  ;;  %v8870_v33 = vld [vmem:[%s11962_s0 + $0x140] sm:$0xff] }
  0x25   :  { %63 = vst [vmem:[#allocation2 + $0x88] sm:$0xf] %v9844_v1  ;;  %v8905_v34 = vld [vmem:[%s11956_s1] sm:$0xff] }
  0x26   :  { %2205 = vmatpush.bf16.msra.mxu0 %v8907_v47  ;;  %64 = vst [vmem:[#allocation2 + $0x8c] sm:$0xf] %v9844_v1 }
  0x27   :  { %2413 = vmatpush.bf16.msra.mxu1 %v8918_v48  ;;  %65 = vst [vmem:[#allocation2 + $0x90] sm:$0xf] %v9844_v1 }
  0x28   :  { %1789 = vmatpush.bf16.msra.mxu2 %v8885_v45  ;;  %1997 = vmatpush.bf16.msra.mxu3 %v8896_v46  ;;  %66 = vst [vmem:[#allocation2 + $0x94] sm:$0xf] %v9844_v1  ;;  %v8952_v45 = vld [vmem:[%s11956_s1 + $0x18] sm:$0xff] }
  0x29   :  { %67 = vst [vmem:[#allocation2 + $0x98] sm:$0xf] %v9844_v1  ;;  %v8963_v46 = vld [vmem:[%s11956_s1 + $0x18] sm:$0xff] }
  0x2a   :  { %2206 = vmatpush.bf16.msra.mxu0 %v8906_v59  ;;  %68 = vst [vmem:[#allocation2 + $0x9c] sm:$0xf] %v9844_v1 }
  0x2b   :  { %2414 = vmatpush.bf16.msra.mxu1 %v8917_v60  ;;  %69 = vst [vmem:[#allocation2 + $0xa0] sm:$0xf] %v9844_v1 }
  0x2c   :  { %1790 = vmatpush.bf16.msra.mxu2 %v8884_v57  ;;  %1998 = vmatpush.bf16.msra.mxu3 %v8895_v58  ;;  %70 = vst [vmem:[#allocation2 + $0xa4] sm:$0xf] %v9844_v1 }
  0x2d   :  { %71 = vst [vmem:[#allocation2 + $0xa8] sm:$0xf] %v9844_v1 }
  0x2e   :  { %72 = vst [vmem:[#allocation2 + $0xac] sm:$0xf] %v9844_v1  ;;  %2207 = vmatpush.bf16.msra.mxu0 %v8905_v34 }
  0x2f   :  { %85 = vst [vmem:[#allocation2 + $0xe0] sm:$0xf] %v9844_v1 }
  0x30   :  { %86 = vst [vmem:[#allocation2 + $0xe4] sm:$0xf] %v9844_v1  ;;  %1791 = vmatpush.bf16.msra.mxu2 %v8883_v31  ;;  %1999 = vmatpush.bf16.msra.mxu3 %v8894_v32 }
  0x31   :  { %6538 = vmatmul.msk.bf16.gmra.mxu0 %vm514_vm0, %v8812_v35  ;;  %6542 = vmatmul.msk.bf16.gmra.mxu2 %vm514_vm0, %v8816_v36  ;;  %87 = vst [vmem:[#allocation2 + $0xe8] sm:$0xf] %v9844_v1  ;;  %v8916_v35 = vld [vmem:[%s11956_s1] sm:$0xff] }
  0x32   :  { %6603 = vmatmul.msk.bf16.gmra.mxu1 %vm514_vm0, %v8823_v37  ;;  %88 = vst [vmem:[#allocation2 + $0xec] sm:$0xf] %v9844_v1 }
  0x33   :  { %6607 = vmatmul.msk.bf16.gmra.mxu3 %vm514_vm0, %v8827_v38  ;;  %89 = vst [vmem:[#allocation2 + $0xf0] sm:$0xf] %v9844_v1  ;;  %2415 = vmatpush.bf16.msra.mxu1 %v8916_v35 }
  0x34   :  { %90 = vst [vmem:[#allocation2 + $0xf4] sm:$0xf] %v9844_v1 }
  0x35   :  { %105 = vst [vmem:[#allocation2 + $0x130] sm:$0xf] %v9844_v1 }
  0x36   :  { %106 = vst [vmem:[#allocation2 + $0x134] sm:$0xf] %v9844_v1 }
  0x37   :  { %107 = vst [vmem:[#allocation2 + $0x138] sm:$0xf] %v9844_v1 }
  0x38   :  { %108 = vst [vmem:[#allocation2 + $0x13c] sm:$0xf] %v9844_v1 }
  0x39   :  { %109 = vst [vmem:[#allocation2 + $0x140] sm:$0xf] %v9844_v1 }
  0x3a   :  { %110 = vst [vmem:[#allocation2 + $0x144] sm:$0xf] %v9844_v1 }
  0x3b   :  { %125 = vst [vmem:[#allocation2 + $0x180] sm:$0xf] %v9844_v1 }
  0x3c   :  { %126 = vst [vmem:[#allocation2 + $0x184] sm:$0xf] %v9844_v1 }
  0x3d   :  { %127 = vst [vmem:[#allocation2 + $0x188] sm:$0xf] %v9844_v1 }
  0x3e   :  { %128 = vst [vmem:[#allocation2 + $0x18c] sm:$0xf] %v9844_v1 }
  0x3f   :  { %129 = vst [vmem:[#allocation2 + $0x190] sm:$0xf] %v9844_v1 }
  0x40   :  { %130 = vst [vmem:[#allocation2 + $0x194] sm:$0xf] %v9844_v1 }
  0x41   :  { %6539 = vmatmul.msk.bf16.gmra.mxu0 %vm514_vm0, %v8813_v41  ;;  %6666 = vmatmul.msk.bf16.vlgmr.msrb.gmra.mxu2 %vm514_vm0, %v8832_v42  ;;  %145 = vst [vmem:[#allocation2 + $0x1d0] sm:$0xf] %v9844_v1  ;;  %v8930_v41 = vld [vmem:[%s11956_s1 + $0x18] sm:$0xff] }
  0x42   :  { %6604 = vmatmul.msk.bf16.gmra.mxu1 %vm514_vm0, %v8824_v43  ;;  %146 = vst [vmem:[#allocation2 + $0x1d4] sm:$0xf] %v9844_v1  ;;  %v8941_v42 = vld [vmem:[%s11956_s1 + $0x18] sm:$0xff]  ;;  %2620 = vmatpush.bf16.msrb.mxu2 %v8930_v41 }
  0x43   :  { %6731 = vmatmul.msk.bf16.vlgmr.msrb.gmra.mxu3 %vm514_vm0, %v8843_v44  ;;  %147 = vst [vmem:[#allocation2 + $0x1d8] sm:$0xf] %v9844_v1 }
  0x44   :  { %148 = vst [vmem:[#allocation2 + $0x1dc] sm:$0xf] %v9844_v1  ;;  %2828 = vmatpush.bf16.msrb.mxu3 %v8941_v42 }
  0x45   :  { %149 = vst [vmem:[#allocation2 + $0x1e0] sm:$0xf] %v9844_v1 }
  0x46   :  { %150 = vst [vmem:[#allocation2 + $0x1e4] sm:$0xf] %v9844_v1 }
  0x47   :  { %165 = vst [vmem:[#allocation2 + $0x220] sm:$0xf] %v9844_v1 }
  0x48   :  { %166 = vst [vmem:[#allocation2 + $0x224] sm:$0xf] %v9844_v1 }
  0x49   :  { %167 = vst [vmem:[#allocation2 + $0x228] sm:$0xf] %v9844_v1 }
  0x4a   :  { %168 = vst [vmem:[#allocation2 + $0x22c] sm:$0xf] %v9844_v1 }
  0x4b   :  { %169 = vst [vmem:[#allocation2 + $0x230] sm:$0xf] %v9844_v1 }
  0x4c   :  { %170 = vst [vmem:[#allocation2 + $0x234] sm:$0xf] %v9844_v1 }
  0x4d   :  { %185 = vst [vmem:[#allocation2 + $0x270] sm:$0xf] %v9844_v1 }
  0x4e   :  { %186 = vst [vmem:[#allocation2 + $0x274] sm:$0xf] %v9844_v1 }
  0x4f   :  { %187 = vst [vmem:[#allocation2 + $0x278] sm:$0xf] %v9844_v1 }
  0x50   :  { %188 = vst [vmem:[#allocation2 + $0x27c] sm:$0xf] %v9844_v1 }
  0x51   :  { %6667 = vmatmul.msk.bf16.gmra.mxu2 %vm514_vm0, %v8833_v49  ;;  %6796 = vmatmul.msk.bf16.vlgmr.msrb.gmra.mxu0 %vm514_vm0, %v8854_v50  ;;  %189 = vst [vmem:[#allocation2 + $0x280] sm:$0xf] %v9844_v1 }
  0x52   :  { %6861 = vmatmul.msk.bf16.vlgmr.msrb.gmra.mxu1 %vm514_vm0, %v8865_v52  ;;  %190 = vst [vmem:[#allocation2 + $0x284] sm:$0xf] %v9844_v1  ;;  %3036 = vmatpush.bf16.msrb.mxu0 %v8952_v45 }
  0x53   :  { %6732 = vmatmul.msk.bf16.gmra.mxu3 %vm514_vm0, %v8844_v51  ;;  %205 = vst [vmem:[#allocation2 + $0x2c0] sm:$0xf] %v9844_v1  ;;  %3244 = vmatpush.bf16.msrb.mxu1 %v8963_v46 }
  0x54   :  { %206 = vst [vmem:[#allocation2 + $0x2c4] sm:$0xf] %v9844_v1 }
  0x55   :  { %207 = vst [vmem:[#allocation2 + $0x2c8] sm:$0xf] %v9844_v1 }
  0x56   :  { %208 = vst [vmem:[#allocation2 + $0x2cc] sm:$0xf] %v9844_v1 }
  0x57   :  { %209 = vst [vmem:[#allocation2 + $0x2d0] sm:$0xf] %v9844_v1 }
  0x58   :  { %210 = vst [vmem:[#allocation2 + $0x2d4] sm:$0xf] %v9844_v1 }
  0x59   :  { %225 = vst [vmem:[#allocation2 + $0x310] sm:$0xf] %v9844_v1 }
  0x5a   :  { %226 = vst [vmem:[#allocation2 + $0x314] sm:$0xf] %v9844_v1 }
  0x5b   :  { %227 = vst [vmem:[#allocation2 + $0x318] sm:$0xf] %v9844_v1 }
  0x5c   :  { %228 = vst [vmem:[#allocation2 + $0x31c] sm:$0xf] %v9844_v1 }
  0x5d   :  { %229 = vst [vmem:[#allocation2 + $0x320] sm:$0xf] %v9844_v1 }
  0x5e   :  { %230 = vst [vmem:[#allocation2 + $0x324] sm:$0xf] %v9844_v1 }
  0x5f   :  { %245 = vst [vmem:[#allocation2 + $0x360] sm:$0xf] %v9844_v1 }
  0x60   :  { %246 = vst [vmem:[#allocation2 + $0x364] sm:$0xf] %v9844_v1 }
  0x61   :  { %6668 = vmatmul.msk.bf16.gmra.mxu2 %vm514_vm0, %v8834_v53  ;;  %6797 = vmatmul.msk.bf16.gmra.mxu0 %vm514_vm0, %v8855_v54  ;;  %247 = vst [vmem:[#allocation2 + $0x368] sm:$0xf] %v9844_v1 }
  0x62   :  { %6862 = vmatmul.msk.bf16.gmra.mxu1 %vm514_vm0, %v8866_v56  ;;  %248 = vst [vmem:[#allocation2 + $0x36c] sm:$0xf] %v9844_v1  ;;  %v8887_v56 = vld [vmem:[%s11962_s0 + $0x188] sm:$0xff] }
  0x63   :  { %6733 = vmatmul.msk.bf16.gmra.mxu3 %vm514_vm0, %v8845_v55  ;;  %249 = vst [vmem:[#allocation2 + $0x370] sm:$0xf] %v9844_v1  ;;  %v8876_v55 = vld [vmem:[%s11962_s0 + $0x150] sm:$0xff] }
  0x64   :  { %250 = vst [vmem:[#allocation2 + $0x374] sm:$0xf] %v9844_v1 }
  0x65   :  { %265 = vst [vmem:[#allocation2 + $0x3b0] sm:$0xf] %v9844_v1 }
  0x66   :  { %266 = vst [vmem:[#allocation2 + $0x3b4] sm:$0xf] %v9844_v1 }
  0x67   :  { %267 = vst [vmem:[#allocation2 + $0x3b8] sm:$0xf] %v9844_v1 }
  0x68   :  { %268 = vst [vmem:[#allocation2 + $0x3bc] sm:$0xf] %v9844_v1 }
  0x69   :  { %269 = vst [vmem:[#allocation2 + $0x3c0] sm:$0xf] %v9844_v1 }
  0x6a   :  { %270 = vst [vmem:[#allocation2 + $0x3c4] sm:$0xf] %v9844_v1 }
  0x6b   :  { %285 = vst [vmem:[#allocation2 + $0x400] sm:$0xf] %v9844_v1 }
  0x6c   :  { %286 = vst [vmem:[#allocation2 + $0x404] sm:$0xf] %v9844_v1 }
  0x6d   :  { %287 = vst [vmem:[#allocation2 + $0x408] sm:$0xf] %v9844_v1 }
  0x6e   :  { %288 = vst [vmem:[#allocation2 + $0x40c] sm:$0xf] %v9844_v1 }
  0x6f   :  { %289 = vst [vmem:[#allocation2 + $0x410] sm:$0xf] %v9844_v1 }
  0x70   :  { %290 = vst [vmem:[#allocation2 + $0x414] sm:$0xf] %v9844_v1 }
  0x71   :  { %6669 = vmatmul.msk.bf16.gmra.mxu2 %vm514_vm0, %v8835_v61  ;;  %6798 = vmatmul.msk.bf16.gmra.mxu0 %vm514_vm0, %v8856_v62  ;;  %305 = vst [vmem:[#allocation2 + $0x450] sm:$0xf] %v9844_v1 }
  0x72   :  { %6863 = vmatmul.msk.bf16.gmra.mxu1 %vm514_vm0, %v8867_v0  ;;  %306 = vst [vmem:[#allocation2 + $0x454] sm:$0xf] %v9844_v1 }
  0x73   :  { %6734 = vmatmul.msk.bf16.gmra.mxu3 %vm514_vm0, %v8846_v63  ;;  %307 = vst [vmem:[#allocation2 + $0x458] sm:$0xf] %v9844_v1 }
  0x74   :  { %308 = vst [vmem:[#allocation2 + $0x45c] sm:$0xf] %v9844_v1 }
  0x75   :  { %309 = vst [vmem:[#allocation2 + $0x460] sm:$0xf] %v9844_v1 }
  0x76   :  { %310 = vst [vmem:[#allocation2 + $0x464] sm:$0xf] %v9844_v1 }
  0x77   :  { %325 = vst [vmem:[#allocation2 + $0x4a0] sm:$0xf] %v9844_v1 }
  0x78   :  { %326 = vst [vmem:[#allocation2 + $0x4a4] sm:$0xf] %v9844_v1 }
  0x79   :  { %327 = vst [vmem:[#allocation2 + $0x4a8] sm:$0xf] %v9844_v1 }
  0x7a   :  { %328 = vst [vmem:[#allocation2 + $0x4ac] sm:$0xf] %v9844_v1 }
  0x7b   :  { %329 = vst [vmem:[#allocation2 + $0x4b0] sm:$0xf] %v9844_v1 }
  0x7c   :  { %330 = vst [vmem:[#allocation2 + $0x4b4] sm:$0xf] %v9844_v1 }
  0x7d   :  { %345 = vst [vmem:[#allocation2 + $0x4f0] sm:$0xf] %v9844_v1 }
  0x7e   :  { %346 = vst [vmem:[#allocation2 + $0x4f4] sm:$0xf] %v9844_v1 }
  0x7f   :  { %347 = vst [vmem:[#allocation2 + $0x4f8] sm:$0xf] %v9844_v1 }
  0x80   :  { %348 = vst [vmem:[#allocation2 + $0x4fc] sm:$0xf] %v9844_v1 }
  0x81   :  { %6670 = vmatmul.msk.bf16.gmra.mxu2 %vm514_vm0, %v8836_v2  ;;  %6799 = vmatmul.msk.bf16.gmra.mxu0 %vm514_vm0, %v8857_v3  ;;  %349 = vst [vmem:[#allocation2 + $0x500] sm:$0xf] %v9844_v1  ;;  %v8860_v2 = vld [vmem:[%s11962_s0 + $0x110] sm:$0xff]  ;;  %v8871_v3 = vld [vmem:[%s11962_s0 + $0x148] sm:$0xff] }
  0x82   :  { %6864 = vmatmul.msk.bf16.gmra.mxu1 %vm514_vm0, %v8868_v5  ;;  %350 = vst [vmem:[#allocation2 + $0x504] sm:$0xf] %v9844_v1 }
  0x83   :  { %6735 = vmatmul.msk.bf16.gmra.mxu3 %vm514_vm0, %v8847_v4  ;;  %351 = vst [vmem:[#allocation2 + $0x508] sm:$0xf] %v9844_v1 }
  0x84   :  { %352 = vst [vmem:[#allocation2 + $0x50c] sm:$0xf] %v9844_v1 }
  0x85   :  { %353 = vst [vmem:[#allocation2 + $0x510] sm:$0xf] %v9844_v1 }
  0x86   :  { %354 = vst [vmem:[#allocation2 + $0x514] sm:$0xf] %v9844_v1 }
  0x87   :  { %355 = vst [vmem:[#allocation2 + $0x518] sm:$0xf] %v9844_v1 }
  0x88   :  { %356 = vst [vmem:[#allocation2 + $0x51c] sm:$0xf] %v9844_v1 }
  0x89   :  { %357 = vst [vmem:[#allocation2 + $0x520] sm:$0xf] %v9844_v1 }
  0x8a   :  { %358 = vst [vmem:[#allocation2 + $0x524] sm:$0xf] %v9844_v1 }
  0x8b   :  { %359 = vst [vmem:[#allocation2 + $0x528] sm:$0xf] %v9844_v1 }
  0x8c   :  { %360 = vst [vmem:[#allocation2 + $0x52c] sm:$0xf] %v9844_v1 }
  0x8d   :  { %361 = vst [vmem:[#allocation2 + $0x530] sm:$0xf] %v9844_v1 }
  0x8e   :  { %362 = vst [vmem:[#allocation2 + $0x534] sm:$0xf] %v9844_v1  ;;  %v545_v10 = vpop.f32.mrf.mxu0 }
  0x8f   :  { %363 = vst [vmem:[#allocation2 + $0x538] sm:$0xf] %v9844_v1  ;;  %v546_v14 = vadd.f32 %v10331_v12, %v545_v10  ;;  %v10494_v20 = vpop.f32.mrf.mxu1 }
  0x90   :  { %364 = vst [vmem:[#allocation2 + $0x53c] sm:$0xf] %v9844_v1  ;;  %v754_v44 = vadd.f32 %v10564_v40, %v10494_v20 }
  0x91   :  { %6671 = vmatmul.msk.bf16.gmra.mxu2 %vm514_vm0, %v8837_v6  ;;  %6800 = vmatmul.msk.bf16.gmra.mxu0 %vm514_vm0, %v8858_v7  ;;  %365 = vst [vmem:[#allocation2 + $0x540] sm:$0xf] %v9844_v1  ;;  %v580_v16 = vmul.f32 0.3, %v546_v14 }
  0x92   :  { %6865 = vmatmul.msk.bf16.gmra.mxu1 %vm514_vm0, %v8869_v9  ;;  %366 = vst [vmem:[#allocation2 + $0x544] sm:$0xf] %v9844_v1  ;;  %v788_v57 = vmul.f32 0.3, %v754_v44 }
  0x93   :  { %6736 = vmatmul.msk.bf16.gmra.mxu3 %vm514_vm0, %v8848_v8  ;;  %367 = vst [vmem:[#allocation2 + $0x548] sm:$0xf] %v9844_v1  ;;  %v594_v18 = vmax.f32 %v546_v14, %v580_v16 }
  0x94   :  { %368 = vst [vmem:[#allocation2 + $0x54c] sm:$0xf] %v9844_v1  ;;  %v565_v21 = vpop.f32.mrf.mxu2  ;;  %v802_v7 = vmax.f32 %v754_v44, %v788_v57 }
  0x95   :  { %369 = vst [vmem:[#allocation2 + $0x550] sm:$0xf] %v9844_v1  ;;  %v10587_v47 = vadd.f32 %v10331_v12, %v565_v21 }
  0x96   :  { %370 = vst [vmem:[#allocation2 + $0x554] sm:$0xf] %v9844_v1  ;;  %v547_v11 = vpop.f32.mrf.mxu0  ;;  %v773_v22 = vpop.f32.mrf.mxu3 }
  0x97   :  { %371 = vst [vmem:[#allocation2 + $0x558] sm:$0xf] %v9844_v1  ;;  %v548_v13 = vadd.f32 %v10331_v12, %v547_v11  ;;  %v755_v23 = vpop.f32.mrf.mxu1  ;;  %v10590_v48 = vadd.f32 %v10564_v40, %v773_v22  ;;  %v588_v58 = vmul.f32 0.3, %v10587_v47 }
  0x98   :  { %372 = vst [vmem:[#allocation2 + $0x55c] sm:$0xf] %v9844_v1  ;;  %v756_v43 = vadd.f32 %v10564_v40, %v755_v23 }
  0x99   :  { %373 = vst [vmem:[#allocation2 + $0x560] sm:$0xf] %v9844_v1  ;;  %v581_v15 = vmul.f32 0.3, %v548_v13  ;;  %v10607_v59 = vmul.f32 0.3, %v10590_v48  ;;  %v602_v16 = vmax.f32 %v10587_v47, %v588_v58 }
  0x9a   :  { %374 = vst [vmem:[#allocation2 + $0x564] sm:$0xf] %v9844_v1  ;;  %v789_v52 = vmul.f32 0.3, %v756_v43 }
  0x9b   :  { %375 = vst [vmem:[#allocation2 + $0x568] sm:$0xf] %v9844_v1  ;;  %v595_v17 = vmax.f32 %v548_v13, %v581_v15  ;;  %v810_v20 = vmax.f32 %v10590_v48, %v10607_v59 }
  0x9c   :  { %376 = vst [vmem:[#allocation2 + $0x56c] sm:$0xf] %v9844_v1  ;;  %v567_v24 = vpop.f32.mrf.mxu2  ;;  %v803_v4 = vmax.f32 %v756_v43, %v789_v52 }
  0x9d   :  { %377 = vst [vmem:[#allocation2 + $0x570] sm:$0xf] %v9844_v1  ;;  %v9208_v19 = vpack.c.bf16 %v595_v17, %v594_v18  ;;  %v10595_v51 = vadd.f32 %v10331_v12, %v567_v24 }
  0x9e   :  { %378 = vst [vmem:[#allocation2 + $0x574] sm:$0xf] %v9844_v1  ;;  %v10515_v25 = vpop.f32.mrf.mxu3  ;;  %v10519_v26 = vpop.f32.mrf.mxu0  ;;  %v9243_v21 = vpack.c.bf16 %v803_v4, %v802_v7 }
  0x9f   :  { %379 = vst [vmem:[#allocation2 + $0x578] sm:$0xf] %v9844_v1  ;;  %v10521_v27 = vpop.f32.mrf.mxu1  ;;  %v10612_v60 = vadd.f32 %v10564_v40, %v10515_v25  ;;  %v10616_v61 = vadd.f32 %v10331_v12, %v10519_v26  ;;  %v589_v62 = vmul.f32 0.3, %v10595_v51 }
  0xa0   :  { %380 = vst [vmem:[#allocation2 + $0x57c] sm:$0xf] %v9844_v1  ;;  %v10622_v63 = vadd.f32 %v10564_v40, %v10521_v27 }
  0xa1   :  { %381 = vst [vmem:[#allocation2 + $0x580] sm:$0xf] %v9844_v1  ;;  %6672 = vmatmul.msk.bf16.gmra.mxu2 %vm514_vm0, %v8838_v28  ;;  %6801 = vmatmul.msk.bf16.gmra.mxu0 %vm514_vm0, %v8859_v30  ;;  %v797_v9 = vmul.f32 0.3, %v10612_v60  ;;  %v582_v10 = vmul.f32 0.3, %v10616_v61  ;;  %v603_v17 = vmax.f32 %v10595_v51, %v589_v62 }
  0xa2   :  { %382 = vst [vmem:[#allocation2 + $0x584] sm:$0xf] %v9844_v1  ;;  %6866 = vmatmul.msk.bf16.gmra.mxu1 %vm514_vm0, %v8870_v33  ;;  %v790_v18 = vmul.f32 0.3, %v10622_v63  ;;  %v8877_v62 = vld [vmem:[%s11962_s0 + $0x158] sm:$0xff] }
  0xa3   :  { %383 = vst [vmem:[#allocation2 + $0x588] sm:$0xf] %v9844_v1  ;;  %6737 = vmatmul.msk.bf16.gmra.mxu3 %vm514_vm0, %v8849_v29  ;;  %v9228_v34 = vpack.c.bf16 %v603_v17, %v602_v16  ;;  %v811_v35 = vmax.f32 %v10612_v60, %v797_v9  ;;  %v8940_v9 = vld [vmem:[%s11956_s1 + $0x10] sm:$0xff]  ;;  %v8909_v16 = vld [vmem:[%s11962_s0 + $0x1f8] sm:$0xff] }
  0xa4   :  { %384 = vst [vmem:[#allocation2 + $0x58c] sm:$0xf] %v9844_v1  ;;  %v570_v36 = vpop.f32.mrf.mxu2  ;;  %2829 = vmatpush.bf16.msrb.mxu3 %v8940_v9 }
  0xa5   :  { %385 = vst [vmem:[#allocation2 + $0x590] sm:$0xf] %v9844_v1  ;;  %v10625_v0 = vadd.f32 %v10331_v12, %v570_v36  ;;  %v596_v36 = vmax.f32 %v10616_v61, %v582_v10 }
  0xa6   :  { %386 = vst [vmem:[#allocation2 + $0x594] sm:$0xf] %v9844_v1  ;;  %v10555_v37 = vpop.f32.mrf.mxu3  ;;  %v552_v38 = vpop.f32.mrf.mxu0 }
  0xa7   :  { %387 = vst [vmem:[#allocation2 + $0x598] sm:$0xf] %v9844_v1  ;;  %v760_v39 = vpop.f32.mrf.mxu1  ;;  %v10635_v5 = vadd.f32 %v10331_v12, %v552_v38  ;;  %v10651_v11 = vadd.f32 %v10564_v40, %v10555_v37  ;;  %v804_v38 = vmax.f32 %v10622_v63, %v790_v18  ;;  %v8888_v63 = vld [vmem:[%s11962_s0 + $0x190] sm:$0xff] }
  0xa8   :  { %388 = vst [vmem:[#allocation2 + $0x59c] sm:$0xf] %v9844_v1  ;;  %v10638_v6 = vadd.f32 %v10564_v40, %v760_v39 }
  0xa9   :  { %389 = vst [vmem:[#allocation2 + $0x5a0] sm:$0xf] %v9844_v1  ;;  %v583_v22 = vmul.f32 0.3, %v10635_v5  ;;  %v798_v30 = vmul.f32 0.3, %v10651_v11 }
  0xaa   :  { %390 = vst [vmem:[#allocation2 + $0x5a4] sm:$0xf] %v9844_v1  ;;  %v791_v23 = vmul.f32 0.3, %v10638_v6 }
  0xab   :  { %391 = vst [vmem:[#allocation2 + $0x5a8] sm:$0xf] %v9844_v1  ;;  %v597_v39 = vmax.f32 %v10635_v5, %v583_v22  ;;  %v812_v47 = vmax.f32 %v10651_v11, %v798_v30  ;;  %v8951_v30 = vld [vmem:[%s11956_s1 + $0x10] sm:$0xff] }
  0xac   :  { %392 = vst [vmem:[#allocation2 + $0x5ac] sm:$0xf] %v9844_v1  ;;  %v572_v49 = vpop.f32.mrf.mxu2  ;;  %v805_v41 = vmax.f32 %v10638_v6, %v791_v23  ;;  %3037 = vmatpush.bf16.msrb.mxu0 %v8951_v30 }
  0xad   :  { %393 = vst [vmem:[#allocation2 + $0x5b0] sm:$0xf] %v9844_v1  ;;  %v10644_v8 = vadd.f32 %v10331_v12, %v572_v49  ;;  %v9213_v57 = vpack.c.bf16 %v597_v39, %v596_v36 }
  0xae   :  { %394 = vst [vmem:[#allocation2 + $0x5b4] sm:$0xf] %v9844_v1  ;;  %v780_v50 = vpop.f32.mrf.mxu3  ;;  %v555_v53 = vpop.f32.mrf.mxu0  ;;  %v9248_v58 = vpack.c.bf16 %v805_v41, %v804_v38 }
  0xaf   :  { %395 = vst [vmem:[#allocation2 + $0x5b8] sm:$0xf] %v9844_v1  ;;  %v763_v54 = vpop.f32.mrf.mxu1  ;;  %v10654_v13 = vadd.f32 %v10564_v40, %v780_v50  ;;  %v591_v26 = vmul.f32 0.3, %v10644_v8  ;;  %v10671_v27 = vadd.f32 %v10331_v12, %v555_v53  ;;  %v9263_v53 = vpack.c.bf16 %v811_v35, %v810_v20  ;;  %v10745_v20 = vld [vmem:[%s11961_s2] ss:$0 sm:$0xff] }
  0xb0   :  { %396 = vst [vmem:[#allocation2 + $0x5bc] sm:$0xf] %v9844_v1  ;;  %v10683_v32 = vadd.f32 %v10564_v40, %v763_v54 }
  0xb1   :  { %397 = vst [vmem:[#allocation2 + $0x5c0] sm:$0xf] %v9844_v1  ;;  %6926 = vmatmul.msk.bf16.vlgmr.msra.gmra.mxu2 %vm514_vm0, %v8876_v55  ;;  %6802 = vmatmul.msk.bf16.gmra.mxu0 %vm514_vm0, %v8860_v2  ;;  %v799_v31 = vmul.f32 0.3, %v10654_v13  ;;  %v605_v44 = vmax.f32 %v10644_v8, %v591_v26  ;;  %v584_v45 = vmul.f32 0.3, %v10671_v27 }
  0xb2   :  { %398 = vst [vmem:[#allocation2 + $0x5c4] sm:$0xf] %v9844_v1  ;;  %6867 = vmatmul.msk.bf16.gmra.mxu1 %vm514_vm0, %v8871_v3  ;;  %v792_v49 = vmul.f32 0.3, %v10683_v32  ;;  %v8929_v8 = vld [vmem:[%s11956_s1 + $0x10] sm:$0xff] }
  0xb3   :  { %399 = vst [vmem:[#allocation2 + $0x5c8] sm:$0xf] %v9844_v1  ;;  %6991 = vmatmul.msk.bf16.vlgmr.msra.gmra.mxu3 %vm514_vm0, %v8887_v56  ;;  %v813_v48 = vmax.f32 %v10654_v13, %v799_v31  ;;  %v598_v5 = vmax.f32 %v10671_v27, %v584_v45  ;;  %2621 = vmatpush.bf16.msrb.mxu2 %v8929_v8  ;;  %v8962_v31 = vld [vmem:[%s11956_s1 + $0x10] sm:$0xff] }
  0xb4   :  { %400 = vst [vmem:[#allocation2 + $0x5cc] sm:$0xf] %v9844_v1  ;;  %v575_v14 = vpop.f32.mrf.mxu2  ;;  %v806_v6 = vmax.f32 %v10683_v32, %v792_v49  ;;  %3245 = vmatpush.bf16.msrb.mxu1 %v8962_v31  ;;  %v10769_v49 = vld [vmem:[%s11961_s2] ss:$0 sm:$0xff] }
  0xb5   :  { %401 = vst [vmem:[#allocation2 + $0x5d0] sm:$0xf] %v9844_v1  ;;  %v10686_v33 = vadd.f32 %v10331_v12, %v575_v14  ;;  %v9268_v4 = vpack.c.bf16 %v813_v48, %v812_v47 }
  0xb6   :  { %402 = vst [vmem:[#allocation2 + $0x5d4] sm:$0xf] %v9844_v1  ;;  %v783_v15 = vpop.f32.mrf.mxu3  ;;  %v557_v24 = vpop.f32.mrf.mxu0 }
  0xb7   :  { %403 = vst [vmem:[#allocation2 + $0x5d8] sm:$0xf] %v9844_v1  ;;  %v765_v25 = vpop.f32.mrf.mxu1  ;;  %v10674_v28 = vadd.f32 %v10331_v12, %v557_v24  ;;  %v10692_v37 = vadd.f32 %v10564_v40, %v783_v15  ;;  %v592_v50 = vmul.f32 0.3, %v10686_v33  ;;  %v8898_v15 = vld [vmem:[%s11962_s0 + $0x1c0] sm:$0xff] }
  0xb8   :  { %404 = vst [vmem:[#allocation2 + $0x5dc] sm:$0xf] %v9844_v1  ;;  %v10677_v29 = vadd.f32 %v10564_v40, %v765_v25 }
  0xb9   :  { %405 = vst [vmem:[#allocation2 + $0x5e0] sm:$0xf] %v9844_v1  ;;  %v585_v42 = vmul.f32 0.3, %v10674_v28  ;;  %v800_v54 = vmul.f32 0.3, %v10692_v37  ;;  %v606_v7 = vmax.f32 %v10686_v33, %v592_v50 }
  0xba   :  { %406 = vst [vmem:[#allocation2 + $0x5e4] sm:$0xf] %v9844_v1  ;;  %v793_v46 = vmul.f32 0.3, %v10677_v29 }
  0xbb   :  { %407 = vst [vmem:[#allocation2 + $0x5e8] sm:$0xf] %v9844_v1  ;;  %v599_v59 = vmax.f32 %v10674_v28, %v585_v42  ;;  %v814_v10 = vmax.f32 %v10692_v37, %v800_v54  ;;  %v8889_v54 = vld [vmem:[%s11962_s0 + $0x198] sm:$0xff] }
  0xbc   :  { %408 = vst [vmem:[#allocation2 + $0x5ec] sm:$0xf] %v9844_v1  ;;  %v577_v51 = vpop.f32.mrf.mxu2  ;;  %v807_v2 = vmax.f32 %v10677_v29, %v793_v46 }
  0xbd   :  { %409 = vst [vmem:[#allocation2 + $0x5f0] sm:$0xf] %v9844_v1  ;;  %v578_v55 = vadd.f32 %v10331_v12, %v577_v51  ;;  %v9218_v17 = vpack.c.bf16 %v599_v59, %v598_v5  ;;  %v10774_v51 = vld [vmem:[%s11961_s2] ss:$0 sm:$0xff] }
  0xbe   :  { %410 = vst [vmem:[#allocation2 + $0x5f4] sm:$0xf] %v9844_v1  ;;  %v785_v52 = vpop.f32.mrf.mxu3  ;;  %v560_v60 = vpop.f32.mrf.mxu0 }
  0xbf   :  { %411 = vst [vmem:[#allocation2 + $0x5f8] sm:$0xf] %v9844_v1  ;;  %v786_v56 = vadd.f32 %v10564_v40, %v785_v52  ;;  %v768_v61 = vpop.f32.mrf.mxu1  ;;  %v593_v3 = vmul.f32 0.3, %v578_v55  ;;  %v561_v14 = vadd.f32 %v10331_v12, %v560_v60 }
  0xc0   :  { %412 = vst [vmem:[#allocation2 + $0x5fc] sm:$0xf] %v9844_v1  ;;  %v769_v18 = vadd.f32 %v10564_v40, %v768_v61  ;;  %v8899_v61 = vld [vmem:[%s11962_s0 + $0x1c8] sm:$0xff] }
  0xc1   :  { %413 = vst [vmem:[#allocation2 + $0x600] sm:$0xf] %v9844_v1  ;;  %v607_v11 = vmax.f32 %v578_v55, %v593_v3  ;;  %6927 = vmatmul.msk.bf16.gmra.mxu2 %vm514_vm0, %v8877_v62  ;;  %v586_v26 = vmul.f32 0.3, %v561_v14  ;;  %7056 = vmatmul.msk.bf16.vlgmr.msra.gmra.mxu0 %vm514_vm0, %v8898_v15  ;;  %v8910_v62 = vld [vmem:[%s11962_s0 + $0x200] sm:$0xff]  ;;  %v8939_v15 = vld [vmem:[%s11956_s1 + $0x8] sm:$0xff] }
  0xc2   :  { %414 = vst [vmem:[#allocation2 + $0x604] sm:$0xf] %v9844_v1  ;;  %7121 = vmatmul.msk.bf16.vlgmr.msra.gmra.mxu1 %vm514_vm0, %v8909_v16  ;;  %v794_v27 = vmul.f32 0.3, %v769_v18  ;;  %2830 = vmatpush.bf16.msrb.mxu3 %v8939_v15  ;;  %v8891_v15 = vld [vmem:[%s11962_s0 + $0x1a8] sm:$0xff] }
  0xc3   :  { %415 = vst [vmem:[#allocation2 + $0x608] sm:$0xf] %v9844_v1  ;;  %6992 = vmatmul.msk.bf16.gmra.mxu3 %vm514_vm0, %v8888_v63  ;;  %v9238_v22 = vpack.c.bf16 %v607_v11, %v606_v7  ;;  %v600_v38 = vmax.f32 %v561_v14, %v586_v26  ;;  %v8928_v14 = vld [vmem:[%s11956_s1 + $0x8] sm:$0xff] }
  0xc4   :  { %416 = vst [vmem:[#allocation2 + $0x60c] sm:$0xf] %v9844_v1  ;;  %v961_v23 = vpop.f32.mrf.mxu2  ;;  %v808_v39 = vmax.f32 %v769_v18, %v794_v27  ;;  %2622 = vmatpush.bf16.msrb.mxu2 %v8928_v14  ;;  %v8880_v14 = vld [vmem:[%s11962_s0 + $0x170] sm:$0xff] }
  0xc5   :  { %417 = vst [vmem:[#allocation2 + $0x610] sm:$0xf] %v9844_v1  ;;  %v962_v32 = vadd.f32 %v10745_v20, %v961_v23 }
  0xc6   :  { %418 = vst [vmem:[#allocation2 + $0x614] sm:$0xf] %v9844_v1  ;;  %v1169_v24 = vpop.f32.mrf.mxu3  ;;  %v562_v28 = vpop.f32.mrf.mxu0 }
  0xc7   :  { %419 = vst [vmem:[#allocation2 + $0x618] sm:$0xf] %v9844_v1  ;;  %v770_v29 = vpop.f32.mrf.mxu1  ;;  %v996_v41 = vmul.f32 0.3, %v962_v32 }
  0xc8   :  { %420 = vst [vmem:[#allocation2 + $0x61c] sm:$0xf] %v9844_v1  ;;  %v771_v35 = vadd.f32 %v10564_v40, %v770_v29 }
  0xc9   :  { %421 = vst [vmem:[#allocation2 + $0x620] sm:$0xf] %v9844_v1  ;;  %v1010_v55 = vmax.f32 %v962_v32, %v996_v41  ;;  %v8950_v41 = vld [vmem:[%s11956_s1 + $0x8] sm:$0xff] }
  0xca   :  { %422 = vst [vmem:[#allocation2 + $0x624] sm:$0xf] %v9844_v1  ;;  %v795_v37 = vmul.f32 0.3, %v771_v35  ;;  %3038 = vmatpush.bf16.msrb.mxu0 %v8950_v41 }
  0xcb   :  { %423 = vst [vmem:[#allocation2 + $0x628] sm:$0xf] %v9844_v1 }
  0xcc   :  { %424 = vst [vmem:[#allocation2 + $0x62c] sm:$0xf] %v9844_v1  ;;  %v963_v45 = vpop.f32.mrf.mxu2 }
  0xcd   :  { %425 = vst [vmem:[#allocation2 + $0x630] sm:$0xf] %v9844_v1 }
  0xce   :  { %426 = vst [vmem:[#allocation2 + $0x634] sm:$0xf] %v9844_v1  ;;  %v1171_v46 = vpop.f32.mrf.mxu3  ;;  %v1377_v50 = vpop.f32.mrf.mxu0 }
  0xcf   :  { %427 = vst [vmem:[#allocation2 + $0x638] sm:$0xf] %v9844_v1  ;;  %v1585_v52 = vpop.f32.mrf.mxu1  ;;  %v1378_v63 = vadd.f32 %v10769_v49, %v1377_v50 }
  0xd0   :  { %428 = vst [vmem:[#allocation2 + $0x63c] sm:$0xf] %v9844_v1 }
  0xd1   :  { %9209 = vst [vmem:[#allocation2 + $0xa8] sm:$0xff] %v9208_v19   ;;  %v590_v19 = vmul.f32 0.3, %v10625_v0  ;;  %7057 = vmatmul.msk.bf16.gmra.mxu0 %vm514_vm0, %v8899_v61  ;;  %v1412_v5 = vmul.f32 0.3, %v1378_v63 }
  0xd2   :  { %73 = vst [vmem:[#allocation2 + $0xb0] sm:$0xf] %v9844_v1  ;;  %7122 = vmatmul.msk.bf16.gmra.mxu1 %vm514_vm0, %v8910_v62 }
  0xd3   :  { %74 = vst [vmem:[#allocation2 + $0xb4] sm:$0xf] %v9844_v1  ;;  %v604_v43 = vmax.f32 %v10625_v0, %v590_v19  ;;  %v9253_v19 = vpack.c.bf16 %v807_v2, %v806_v6  ;;  %6993 = vmatmul.msk.bf16.gmra.mxu3 %vm514_vm0, %v8889_v54  ;;  %v1426_v18 = vmax.f32 %v1378_v63, %v1412_v5 }
  0xd4   :  { %75 = vst [vmem:[#allocation2 + $0xb8] sm:$0xf] %v9844_v1 }
  0xd5   :  { %76 = vst [vmem:[#allocation2 + $0xbc] sm:$0xf] %v9844_v1  ;;  %v9233_v0 = vpack.c.bf16 %v605_v44, %v604_v43  ;;  %v809_v44 = vmax.f32 %v771_v35, %v795_v37  ;;  %v8890_v35 = vld [vmem:[%s11962_s0 + $0x1a0] sm:$0xff] }
  0xd6   :  { %77 = vst [vmem:[#allocation2 + $0xc0] sm:$0xf] %v9844_v1  ;;  %v1379_v7 = vpop.f32.mrf.mxu0 }
  0xd7   :  { %78 = vst [vmem:[#allocation2 + $0xc4] sm:$0xf] %v9844_v1  ;;  %v9258_v48 = vpack.c.bf16 %v809_v44, %v808_v39  ;;  %v1587_v8 = vpop.f32.mrf.mxu1  ;;  %v1380_v11 = vadd.f32 %v10769_v49, %v1379_v7 }
  0xd8   :  { %79 = vst [vmem:[#allocation2 + $0xc8] sm:$0xf] %v9844_v1 }
  0xd9   :  { %80 = vst [vmem:[#allocation2 + $0xcc] sm:$0xf] %v9844_v1  ;;  %v1413_v16 = vmul.f32 0.3, %v1380_v11 }
  0xda   :  { %81 = vst [vmem:[#allocation2 + $0xd0] sm:$0xf] %v9844_v1 }
  0xdb   :  { %82 = vst [vmem:[#allocation2 + $0xd4] sm:$0xf] %v9844_v1 }
  0xdc   :  { %83 = vst [vmem:[#allocation2 + $0xd8] sm:$0xf] %v9844_v1 }
  0xdd   :  { %84 = vst [vmem:[#allocation2 + $0xdc] sm:$0xf] %v9844_v1 }
  0xde   :  { %91 = vst [vmem:[#allocation2 + $0xf8] sm:$0xf] %v9844_v1  ;;  %v1382_v32 = vpop.f32.mrf.mxu0 }
  0xdf   :  { %92 = vst [vmem:[#allocation2 + $0xfc] sm:$0xf] %v9844_v1 }
  0xe0   :  { %93 = vst [vmem:[#allocation2 + $0x100] sm:$0xf] %v9844_v1 }
  0xe1   :  { %94 = vst [vmem:[#allocation2 + $0x104] sm:$0xf] %v9844_v1 }
  0xe2   :  { %95 = vst [vmem:[#allocation2 + $0x108] sm:$0xf] %v9844_v1 }
  0xe3   :  { %96 = vst [vmem:[#allocation2 + $0x10c] sm:$0xf] %v9844_v1  ;;  %6994 = vmatmul.msk.bf16.gmra.mxu3 %vm514_vm0, %v8890_v35 }
  0xe4   :  { %97 = vst [vmem:[#allocation2 + $0x110] sm:$0xf] %v9844_v1 }
  0xe5   :  { %98 = vst [vmem:[#allocation2 + $0x114] sm:$0xf] %v9844_v1 }
  0xe6   :  { %99 = vst [vmem:[#allocation2 + $0x118] sm:$0xf] %v9844_v1 }
  0xe7   :  { %100 = vst [vmem:[#allocation2 + $0x11c] sm:$0xf] %v9844_v1 }
  0xe8   :  { %101 = vst [vmem:[#allocation2 + $0x120] sm:$0xf] %v9844_v1 }
  0xe9   :  { %102 = vst [vmem:[#allocation2 + $0x124] sm:$0xf] %v9844_v1 }
  0xea   :  { %103 = vst [vmem:[#allocation2 + $0x128] sm:$0xf] %v9844_v1 }
  0xeb   :  { %104 = vst [vmem:[#allocation2 + $0x12c] sm:$0xf] %v9844_v1 }
  0xec   :  { %111 = vst [vmem:[#allocation2 + $0x148] sm:$0xf] %v9844_v1 }
  0xed   :  { %112 = vst [vmem:[#allocation2 + $0x14c] sm:$0xf] %v9844_v1 }
  0xee   :  { %113 = vst [vmem:[#allocation2 + $0x150] sm:$0xf] %v9844_v1 }
  0xef   :  { %114 = vst [vmem:[#allocation2 + $0x154] sm:$0xf] %v9844_v1 }
  0xf0   :  { %115 = vst [vmem:[#allocation2 + $0x158] sm:$0xf] %v9844_v1 }
  0xf1   :  { %116 = vst [vmem:[#allocation2 + $0x15c] sm:$0xf] %v9844_v1 }
  0xf2   :  { %117 = vst [vmem:[#allocation2 + $0x160] sm:$0xf] %v9844_v1 }
  0xf3   :  { %118 = vst [vmem:[#allocation2 + $0x164] sm:$0xf] %v9844_v1  ;;  %6995 = vmatmul.msk.bf16.gmra.mxu3 %vm514_vm0, %v8891_v15 }
  0xf4   :  { %119 = vst [vmem:[#allocation2 + $0x168] sm:$0xf] %v9844_v1 }
  0xf5   :  { %120 = vst [vmem:[#allocation2 + $0x16c] sm:$0xf] %v9844_v1 }
  0xf6   :  { %121 = vst [vmem:[#allocation2 + $0x170] sm:$0xf] %v9844_v1 }
  0xf7   :  { %122 = vst [vmem:[#allocation2 + $0x174] sm:$0xf] %v9844_v1 }
  0xf8   :  { %123 = vst [vmem:[#allocation2 + $0x178] sm:$0xf] %v9844_v1 }
  0xf9   :  { %124 = vst [vmem:[#allocation2 + $0x17c] sm:$0xf] %v9844_v1 }
  0xfa   :  { %131 = vst [vmem:[#allocation2 + $0x198] sm:$0xf] %v9844_v1 }
  0xfb   :  { %132 = vst [vmem:[#allocation2 + $0x19c] sm:$0xf] %v9844_v1 }
  0xfc   :  { %133 = vst [vmem:[#allocation2 + $0x1a0] sm:$0xf] %v9844_v1 }
  0xfd   :  { %134 = vst [vmem:[#allocation2 + $0x1a4] sm:$0xf] %v9844_v1 }
  0xfe   :  { %135 = vst [vmem:[#allocation2 + $0x1a8] sm:$0xf] %v9844_v1 }
  0xff   :  { %136 = vst [vmem:[#allocation2 + $0x1ac] sm:$0xf] %v9844_v1 }
 0x100   :  { %137 = vst [vmem:[#allocation2 + $0x1b0] sm:$0xf] %v9844_v1 }
 0x101   :  { %138 = vst [vmem:[#allocation2 + $0x1b4] sm:$0xf] %v9844_v1 }
 0x102   :  { %139 = vst [vmem:[#allocation2 + $0x1b8] sm:$0xf] %v9844_v1 }
 0x103   :  { %140 = vst [vmem:[#allocation2 + $0x1bc] sm:$0xf] %v9844_v1 }
 0x104   :  { %141 = vst [vmem:[#allocation2 + $0x1c0] sm:$0xf] %v9844_v1 }
 0x105   :  { %142 = vst [vmem:[#allocation2 + $0x1c4] sm:$0xf] %v9844_v1 }
 0x106   :  { %143 = vst [vmem:[#allocation2 + $0x1c8] sm:$0xf] %v9844_v1 }
 0x107   :  { %144 = vst [vmem:[#allocation2 + $0x1cc] sm:$0xf] %v9844_v1 }
 0x108   :  { %151 = vst [vmem:[#allocation2 + $0x1e8] sm:$0xf] %v9844_v1 }
 0x109   :  { %152 = vst [vmem:[#allocation2 + $0x1ec] sm:$0xf] %v9844_v1 }
 0x10a   :  { %153 = vst [vmem:[#allocation2 + $0x1f0] sm:$0xf] %v9844_v1 }
 0x10b   :  { %154 = vst [vmem:[#allocation2 + $0x1f4] sm:$0xf] %v9844_v1 }
 0x10c   :  { %155 = vst [vmem:[#allocation2 + $0x1f8] sm:$0xf] %v9844_v1 }
 0x10d   :  { %156 = vst [vmem:[#allocation2 + $0x1fc] sm:$0xf] %v9844_v1 }
 0x10e   :  { %157 = vst [vmem:[#allocation2 + $0x200] sm:$0xf] %v9844_v1 }
 0x10f   :  { %158 = vst [vmem:[#allocation2 + $0x204] sm:$0xf] %v9844_v1 }
 0x110   :  { %159 = vst [vmem:[#allocation2 + $0x208] sm:$0xf] %v9844_v1 }
 0x111   :  { %160 = vst [vmem:[#allocation2 + $0x20c] sm:$0xf] %v9844_v1 }
 0x112   :  { %161 = vst [vmem:[#allocation2 + $0x210] sm:$0xf] %v9844_v1 }
 0x113   :  { %162 = vst [vmem:[#allocation2 + $0x214] sm:$0xf] %v9844_v1 }
 0x114   :  { %163 = vst [vmem:[#allocation2 + $0x218] sm:$0xf] %v9844_v1 }
 0x115   :  { %164 = vst [vmem:[#allocation2 + $0x21c] sm:$0xf] %v9844_v1 }
 0x116   :  { %171 = vst [vmem:[#allocation2 + $0x238] sm:$0xf] %v9844_v1 }
 0x117   :  { %172 = vst [vmem:[#allocation2 + $0x23c] sm:$0xf] %v9844_v1 }
 0x118   :  { %173 = vst [vmem:[#allocation2 + $0x240] sm:$0xf] %v9844_v1 }
 0x119   :  { %174 = vst [vmem:[#allocation2 + $0x244] sm:$0xf] %v9844_v1 }
 0x11a   :  { %175 = vst [vmem:[#allocation2 + $0x248] sm:$0xf] %v9844_v1 }
 0x11b   :  { %176 = vst [vmem:[#allocation2 + $0x24c] sm:$0xf] %v9844_v1 }
 0x11c   :  { %177 = vst [vmem:[#allocation2 + $0x250] sm:$0xf] %v9844_v1 }
 0x11d   :  { %178 = vst [vmem:[#allocation2 + $0x254] sm:$0xf] %v9844_v1 }
 0x11e   :  { %179 = vst [vmem:[#allocation2 + $0x258] sm:$0xf] %v9844_v1 }
 0x11f   :  { %180 = vst [vmem:[#allocation2 + $0x25c] sm:$0xf] %v9844_v1 }
 0x120   :  { %181 = vst [vmem:[#allocation2 + $0x260] sm:$0xf] %v9844_v1 }
 0x121   :  { %182 = vst [vmem:[#allocation2 + $0x264] sm:$0xf] %v9844_v1 }
 0x122   :  { %183 = vst [vmem:[#allocation2 + $0x268] sm:$0xf] %v9844_v1 }
 0x123   :  { %184 = vst [vmem:[#allocation2 + $0x26c] sm:$0xf] %v9844_v1 }
 0x124   :  { %191 = vst [vmem:[#allocation2 + $0x288] sm:$0xf] %v9844_v1 }
 0x125   :  { %192 = vst [vmem:[#allocation2 + $0x28c] sm:$0xf] %v9844_v1 }
 0x126   :  { %193 = vst [vmem:[#allocation2 + $0x290] sm:$0xf] %v9844_v1 }
 0x127   :  { %194 = vst [vmem:[#allocation2 + $0x294] sm:$0xf] %v9844_v1 }
 0x128   :  { %195 = vst [vmem:[#allocation2 + $0x298] sm:$0xf] %v9844_v1 }
 0x129   :  { %196 = vst [vmem:[#allocation2 + $0x29c] sm:$0xf] %v9844_v1 }
 0x12a   :  { %197 = vst [vmem:[#allocation2 + $0x2a0] sm:$0xf] %v9844_v1 }
 0x12b   :  { %198 = vst [vmem:[#allocation2 + $0x2a4] sm:$0xf] %v9844_v1 }
 0x12c   :  { %199 = vst [vmem:[#allocation2 + $0x2a8] sm:$0xf] %v9844_v1 }
 0x12d   :  { %200 = vst [vmem:[#allocation2 + $0x2ac] sm:$0xf] %v9844_v1 }
 0x12e   :  { %201 = vst [vmem:[#allocation2 + $0x2b0] sm:$0xf] %v9844_v1 }
 0x12f   :  { %202 = vst [vmem:[#allocation2 + $0x2b4] sm:$0xf] %v9844_v1 }
 0x130   :  { %203 = vst [vmem:[#allocation2 + $0x2b8] sm:$0xf] %v9844_v1 }
 0x131   :  { %204 = vst [vmem:[#allocation2 + $0x2bc] sm:$0xf] %v9844_v1 }
 0x132   :  { %211 = vst [vmem:[#allocation2 + $0x2d8] sm:$0xf] %v9844_v1 }
 0x133   :  { %212 = vst [vmem:[#allocation2 + $0x2dc] sm:$0xf] %v9844_v1 }
 0x134   :  { %213 = vst [vmem:[#allocation2 + $0x2e0] sm:$0xf] %v9844_v1 }
 0x135   :  { %214 = vst [vmem:[#allocation2 + $0x2e4] sm:$0xf] %v9844_v1 }
 0x136   :  { %215 = vst [vmem:[#allocation2 + $0x2e8] sm:$0xf] %v9844_v1 }
 0x137   :  { %216 = vst [vmem:[#allocation2 + $0x2ec] sm:$0xf] %v9844_v1 }
 0x138   :  { %217 = vst [vmem:[#allocation2 + $0x2f0] sm:$0xf] %v9844_v1 }
 0x139   :  { %218 = vst [vmem:[#allocation2 + $0x2f4] sm:$0xf] %v9844_v1 }
 0x13a   :  { %219 = vst [vmem:[#allocation2 + $0x2f8] sm:$0xf] %v9844_v1 }
 0x13b   :  { %220 = vst [vmem:[#allocation2 + $0x2fc] sm:$0xf] %v9844_v1 }
 0x13c   :  { %221 = vst [vmem:[#allocation2 + $0x300] sm:$0xf] %v9844_v1 }
 0x13d   :  { %222 = vst [vmem:[#allocation2 + $0x304] sm:$0xf] %v9844_v1 }
 0x13e   :  { %223 = vst [vmem:[#allocation2 + $0x308] sm:$0xf] %v9844_v1 }
 0x13f   :  { %224 = vst [vmem:[#allocation2 + $0x30c] sm:$0xf] %v9844_v1 }
 0x140   :  { %231 = vst [vmem:[#allocation2 + $0x328] sm:$0xf] %v9844_v1 }
 0x141   :  { %232 = vst [vmem:[#allocation2 + $0x32c] sm:$0xf] %v9844_v1 }
 0x142   :  { %233 = vst [vmem:[#allocation2 + $0x330] sm:$0xf] %v9844_v1 }
 0x143   :  { %234 = vst [vmem:[#allocation2 + $0x334] sm:$0xf] %v9844_v1 }
 0x144   :  { %235 = vst [vmem:[#allocation2 + $0x338] sm:$0xf] %v9844_v1 }
 0x145   :  { %236 = vst [vmem:[#allocation2 + $0x33c] sm:$0xf] %v9844_v1 }
 0x146   :  { %237 = vst [vmem:[#allocation2 + $0x340] sm:$0xf] %v9844_v1 }
 0x147   :  { %238 = vst [vmem:[#allocation2 + $0x344] sm:$0xf] %v9844_v1 }
 0x148   :  { %239 = vst [vmem:[#allocation2 + $0x348] sm:$0xf] %v9844_v1 }
 0x149   :  { %240 = vst [vmem:[#allocation2 + $0x34c] sm:$0xf] %v9844_v1 }
 0x14a   :  { %241 = vst [vmem:[#allocation2 + $0x350] sm:$0xf] %v9844_v1 }
 0x14b   :  { %242 = vst [vmem:[#allocation2 + $0x354] sm:$0xf] %v9844_v1 }
 0x14c   :  { %243 = vst [vmem:[#allocation2 + $0x358] sm:$0xf] %v9844_v1 }
 0x14d   :  { %244 = vst [vmem:[#allocation2 + $0x35c] sm:$0xf] %v9844_v1 }
 0x14e   :  { %251 = vst [vmem:[#allocation2 + $0x378] sm:$0xf] %v9844_v1 }
 0x14f   :  { %252 = vst [vmem:[#allocation2 + $0x37c] sm:$0xf] %v9844_v1 }
 0x150   :  { %253 = vst [vmem:[#allocation2 + $0x380] sm:$0xf] %v9844_v1 }
 0x151   :  { %254 = vst [vmem:[#allocation2 + $0x384] sm:$0xf] %v9844_v1 }
 0x152   :  { %255 = vst [vmem:[#allocation2 + $0x388] sm:$0xf] %v9844_v1 }
 0x153   :  { %256 = vst [vmem:[#allocation2 + $0x38c] sm:$0xf] %v9844_v1 }
 0x154   :  { %257 = vst [vmem:[#allocation2 + $0x390] sm:$0xf] %v9844_v1 }
 0x155   :  { %258 = vst [vmem:[#allocation2 + $0x394] sm:$0xf] %v9844_v1 }
 0x156   :  { %259 = vst [vmem:[#allocation2 + $0x398] sm:$0xf] %v9844_v1 }
 0x157   :  { %260 = vst [vmem:[#allocation2 + $0x39c] sm:$0xf] %v9844_v1 }
 0x158   :  { %261 = vst [vmem:[#allocation2 + $0x3a0] sm:$0xf] %v9844_v1 }
 0x159   :  { %262 = vst [vmem:[#allocation2 + $0x3a4] sm:$0xf] %v9844_v1 }
 0x15a   :  { %263 = vst [vmem:[#allocation2 + $0x3a8] sm:$0xf] %v9844_v1 }
 0x15b   :  { %264 = vst [vmem:[#allocation2 + $0x3ac] sm:$0xf] %v9844_v1 }
 0x15c   :  { %271 = vst [vmem:[#allocation2 + $0x3c8] sm:$0xf] %v9844_v1 }
 0x15d   :  { %272 = vst [vmem:[#allocation2 + $0x3cc] sm:$0xf] %v9844_v1 }
 0x15e   :  { %273 = vst [vmem:[#allocation2 + $0x3d0] sm:$0xf] %v9844_v1 }
 0x15f   :  { %274 = vst [vmem:[#allocation2 + $0x3d4] sm:$0xf] %v9844_v1 }
 0x160   :  { %275 = vst [vmem:[#allocation2 + $0x3d8] sm:$0xf] %v9844_v1 }
 0x161   :  { %276 = vst [vmem:[#allocation2 + $0x3dc] sm:$0xf] %v9844_v1 }
 0x162   :  { %277 = vst [vmem:[#allocation2 + $0x3e0] sm:$0xf] %v9844_v1 }
 0x163   :  { %278 = vst [vmem:[#allocation2 + $0x3e4] sm:$0xf] %v9844_v1 }
 0x164   :  { %279 = vst [vmem:[#allocation2 + $0x3e8] sm:$0xf] %v9844_v1 }
 0x165   :  { %280 = vst [vmem:[#allocation2 + $0x3ec] sm:$0xf] %v9844_v1 }
 0x166   :  { %281 = vst [vmem:[#allocation2 + $0x3f0] sm:$0xf] %v9844_v1 }
 0x167   :  { %282 = vst [vmem:[#allocation2 + $0x3f4] sm:$0xf] %v9844_v1 }
 0x168   :  { %283 = vst [vmem:[#allocation2 + $0x3f8] sm:$0xf] %v9844_v1 }
 0x169   :  { %284 = vst [vmem:[#allocation2 + $0x3fc] sm:$0xf] %v9844_v1 }
 0x16a   :  { %291 = vst [vmem:[#allocation2 + $0x418] sm:$0xf] %v9844_v1 }
 0x16b   :  { %292 = vst [vmem:[#allocation2 + $0x41c] sm:$0xf] %v9844_v1 }
 0x16c   :  { %293 = vst [vmem:[#allocation2 + $0x420] sm:$0xf] %v9844_v1 }
 0x16d   :  { %294 = vst [vmem:[#allocation2 + $0x424] sm:$0xf] %v9844_v1 }
 0x16e   :  { %295 = vst [vmem:[#allocation2 + $0x428] sm:$0xf] %v9844_v1 }
 0x16f   :  { %296 = vst [vmem:[#allocation2 + $0x42c] sm:$0xf] %v9844_v1 }
 0x170   :  { %297 = vst [vmem:[#allocation2 + $0x430] sm:$0xf] %v9844_v1 }
 0x171   :  { %298 = vst [vmem:[#allocation2 + $0x434] sm:$0xf] %v9844_v1 }
 0x172   :  { %299 = vst [vmem:[#allocation2 + $0x438] sm:$0xf] %v9844_v1 }
 0x173   :  { %300 = vst [vmem:[#allocation2 + $0x43c] sm:$0xf] %v9844_v1 }
 0x174   :  { %301 = vst [vmem:[#allocation2 + $0x440] sm:$0xf] %v9844_v1 }
 0x175   :  { %302 = vst [vmem:[#allocation2 + $0x444] sm:$0xf] %v9844_v1 }
 0x176   :  { %303 = vst [vmem:[#allocation2 + $0x448] sm:$0xf] %v9844_v1 }
 0x177   :  { %304 = vst [vmem:[#allocation2 + $0x44c] sm:$0xf] %v9844_v1 }
 0x178   :  { %311 = vst [vmem:[#allocation2 + $0x468] sm:$0xf] %v9844_v1 }
 0x179   :  { %312 = vst [vmem:[#allocation2 + $0x46c] sm:$0xf] %v9844_v1 }
 0x17a   :  { %313 = vst [vmem:[#allocation2 + $0x470] sm:$0xf] %v9844_v1 }
 0x17b   :  { %314 = vst [vmem:[#allocation2 + $0x474] sm:$0xf] %v9844_v1 }
 0x17c   :  { %315 = vst [vmem:[#allocation2 + $0x478] sm:$0xf] %v9844_v1 }
 0x17d   :  { %316 = vst [vmem:[#allocation2 + $0x47c] sm:$0xf] %v9844_v1 }
 0x17e   :  { %317 = vst [vmem:[#allocation2 + $0x480] sm:$0xf] %v9844_v1 }
 0x17f   :  { %318 = vst [vmem:[#allocation2 + $0x484] sm:$0xf] %v9844_v1 }
 0x180   :  { %319 = vst [vmem:[#allocation2 + $0x488] sm:$0xf] %v9844_v1 }
 0x181   :  { %320 = vst [vmem:[#allocation2 + $0x48c] sm:$0xf] %v9844_v1 }
 0x182   :  { %321 = vst [vmem:[#allocation2 + $0x490] sm:$0xf] %v9844_v1 }
 0x183   :  { %322 = vst [vmem:[#allocation2 + $0x494] sm:$0xf] %v9844_v1 }
 0x184   :  { %323 = vst [vmem:[#allocation2 + $0x498] sm:$0xf] %v9844_v1 }
 0x185   :  { %324 = vst [vmem:[#allocation2 + $0x49c] sm:$0xf] %v9844_v1 }
 0x186   :  { %331 = vst [vmem:[#allocation2 + $0x4b8] sm:$0xf] %v9844_v1 }
 0x187   :  { %332 = vst [vmem:[#allocation2 + $0x4bc] sm:$0xf] %v9844_v1 }
 0x188   :  { %333 = vst [vmem:[#allocation2 + $0x4c0] sm:$0xf] %v9844_v1 }
 0x189   :  { %334 = vst [vmem:[#allocation2 + $0x4c4] sm:$0xf] %v9844_v1 }
 0x18a   :  { %335 = vst [vmem:[#allocation2 + $0x4c8] sm:$0xf] %v9844_v1 }
 0x18b   :  { %336 = vst [vmem:[#allocation2 + $0x4cc] sm:$0xf] %v9844_v1 }
 0x18c   :  { %337 = vst [vmem:[#allocation2 + $0x4d0] sm:$0xf] %v9844_v1 }
 0x18d   :  { %338 = vst [vmem:[#allocation2 + $0x4d4] sm:$0xf] %v9844_v1 }
 0x18e   :  { %339 = vst [vmem:[#allocation2 + $0x4d8] sm:$0xf] %v9844_v1 }
 0x18f   :  { %340 = vst [vmem:[#allocation2 + $0x4dc] sm:$0xf] %v9844_v1 }
 0x190   :  { %341 = vst [vmem:[#allocation2 + $0x4e0] sm:$0xf] %v9844_v1 }
 0x191   :  { %342 = vst [vmem:[#allocation2 + $0x4e4] sm:$0xf] %v9844_v1 }
 0x192   :  { %343 = vst [vmem:[#allocation2 + $0x4e8] sm:$0xf] %v9844_v1 }
 0x193   :  { %344 = vst [vmem:[#allocation2 + $0x4ec] sm:$0xf] %v9844_v1  ;;  %v801_v1 = vmul.f32 0.3, %v786_v56 }
 0x194   :  { %9244 = vst [vmem:[#allocation2 + $0xf8] sm:$0xff] %v9243_v21   ;;  %v10750_v21 = vld [vmem:[%s11961_s2] ss:$0 sm:$0xff] }
 0x195   :  { %9698 = vst [vmem:[#allocation2 + $0xc8] sm:$0xff] %v9228_v34   ;;  %v815_v13 = vmax.f32 %v786_v56, %v801_v1  ;;  %v1170_v33 = vadd.f32 %v10750_v21, %v1169_v24  ;;  %v563_v34 = vadd.f32 %v10331_v12, %v562_v28  ;;  %v964_v12 = vadd.f32 %v10745_v20, %v963_v45  ;;  %v966_v1 = vpop.f32.mrf.mxu2  ;;  %v8900_v45 = vld [vmem:[%s11962_s0 + $0x1d0] sm:$0xff] }
 0x196   :  { %9704 = vst [vmem:[#allocation2 + $0x118] sm:$0xff] %v9263_v53   ;;  %v1172_v40 = vadd.f32 %v10750_v21, %v1171_v46  ;;  %v8878_v53 = vld [vmem:[%s11962_s0 + $0x160] sm:$0xff]  ;;  %v967_v9 = vadd.f32 %v10745_v20, %v966_v1  ;;  %v1427_v24 = vmax.f32 %v1380_v11, %v1413_v16  ;;  %v8911_v46 = vld [vmem:[%s11962_s0 + $0x208] sm:$0xff]  ;;  %7058 = vmatmul.msk.bf16.gmra.mxu0 %vm514_vm0, %v8900_v45 }
 0x197   :  { %9695 = vst [vmem:[#allocation2 + $0xb0] sm:$0xff] %v9213_v57   ;;  %v9273_v25 = vpack.c.bf16 %v815_v13, %v814_v10  ;;  %v587_v36 = vmul.f32 0.3, %v563_v34  ;;  %v1204_v42 = vmul.f32 0.3, %v1170_v33  ;;  %6928 = vmatmul.msk.bf16.gmra.mxu2 %vm514_vm0, %v8878_v53  ;;  %v1588_v13 = vadd.f32 %v10774_v51, %v1587_v8  ;;  %7123 = vmatmul.msk.bf16.gmra.mxu1 %vm514_vm0, %v8911_v46  ;;  %v8949_v45 = vld [vmem:[%s11956_s1] sm:$0xff] }
 0x198   :  { %9701 = vst [vmem:[#allocation2 + $0x100] sm:$0xff] %v9248_v58   ;;  %v997_v57 = vmul.f32 0.3, %v964_v12  ;;  %v1205_v58 = vmul.f32 0.3, %v1172_v40  ;;  %v9348_v28 = vpack.c.bf16 %v1427_v24, %v1426_v18  ;;  %v8960_v46 = vld [vmem:[%s11956_s1] sm:$0xff]  ;;  %3039 = vmatpush.bf16.msrb.mxu0 %v8949_v45 }
 0x199   :  { %9699 = vst [vmem:[#allocation2 + $0xd0] sm:$0xff] %v9233_v0   ;;  %v601_v43 = vmax.f32 %v563_v34, %v587_v36  ;;  %v1218_v56 = vmax.f32 %v1170_v33, %v1204_v42  ;;  %v1586_v0 = vadd.f32 %v10774_v51, %v1585_v52  ;;  %v1590_v33 = vpop.f32.mrf.mxu1  ;;  %v8879_v34 = vld [vmem:[%s11962_s0 + $0x168] sm:$0xff] }
 0x19a   :  { %9705 = vst [vmem:[#allocation2 + $0x120] sm:$0xff] %v9268_v4   ;;  %v1011_v59 = vmax.f32 %v964_v12, %v997_v57  ;;  %v1219_v60 = vmax.f32 %v1172_v40, %v1205_v58  ;;  %v1174_v4 = vpop.f32.mrf.mxu3  ;;  %v8961_v42 = vld [vmem:[%s11956_s1 + $0x8] sm:$0xff] }
 0x19b   :  { %9696 = vst [vmem:[#allocation2 + $0xb8] sm:$0xff] %v9218_v17   ;;  %v9223_v47 = vpack.c.bf16 %v601_v43, %v600_v38  ;;  %v1620_v6 = vmul.f32 0.3, %v1586_v0  ;;  %v1175_v10 = vadd.f32 %v10750_v21, %v1174_v4  ;;  %v1621_v17 = vmul.f32 0.3, %v1588_v13  ;;  %3246 = vmatpush.bf16.msrb.mxu1 %v8961_v42 }
 0x19c   :  { %9702 = vst [vmem:[#allocation2 + $0x108] sm:$0xff] %v9253_v19   ;;  %v9278_v2 = vpack.c.bf16 %v1011_v59, %v1010_v55  ;;  %v9313_v3 = vpack.c.bf16 %v1219_v60, %v1218_v56  ;;  %v1384_v55 = vpop.f32.mrf.mxu0 }
 0x19d   :  { %9700 = vst [vmem:[#allocation2 + $0xd8] sm:$0xff] %v9238_v22   ;;  %v1634_v19 = vmax.f32 %v1586_v0, %v1620_v6  ;;  %v998_v22 = vmul.f32 0.3, %v967_v9  ;;  %v1206_v23 = vmul.f32 0.3, %v1175_v10  ;;  %v968_v26 = vpop.f32.mrf.mxu2  ;;  %v1385_v59 = vadd.f32 %v10769_v49, %v1384_v55 }
 0x19e   :  { %9706 = vst [vmem:[#allocation2 + $0x128] sm:$0xff] %v9273_v25   ;;  %v1635_v25 = vmax.f32 %v1588_v13, %v1621_v17  ;;  %v969_v30 = vadd.f32 %v10745_v20, %v968_v26  ;;  %v8912_v26 = vld [vmem:[%s11962_s0 + $0x210] sm:$0xff] }
 0x19f   :  { %9697 = vst [vmem:[#allocation2 + $0xc0] sm:$0xff] %v9223_v47   ;;  %v1012_v36 = vmax.f32 %v967_v9, %v998_v22  ;;  %v1220_v37 = vmax.f32 %v1175_v10, %v1206_v23  ;;  %v1383_v47 = vadd.f32 %v10769_v49, %v1382_v32  ;;  %v1415_v61 = vmul.f32 0.3, %v1385_v59  ;;  %3247 = vmatpush.bf16.msrb.mxu1 %v8960_v46 }
 0x1a0   :  { %9703 = vst [vmem:[#allocation2 + $0x110] sm:$0xff] %v9258_v48   ;;  %v9383_v29 = vpack.c.bf16 %v1635_v25, %v1634_v19  ;;  %v999_v38 = vmul.f32 0.3, %v969_v30  ;;  %v1591_v48 = vadd.f32 %v10774_v51, %v1590_v33  ;;  %v8901_v25 = vld [vmem:[%s11962_s0 + $0x1d8] sm:$0xff] }
 0x1a1   :  { %9279 = vst [vmem:[#allocation2 + $0x148] sm:$0xff] %v9278_v2   ;;  %v1414_v53 = vmul.f32 0.3, %v1383_v47  ;;  %v1592_v56 = vpop.f32.mrf.mxu1  ;;  %v1429_v1 = vmax.f32 %v1385_v59, %v1415_v61  ;;  %v8881_v61 = vld [vmem:[%s11962_s0 + $0x178] sm:$0xff] }
 0x1a2   :  { %9314 = vst [vmem:[#allocation2 + $0x198] sm:$0xff] %v9313_v3   ;;  %v1176_v27 = vpop.f32.mrf.mxu3  ;;  %v1013_v43 = vmax.f32 %v969_v30, %v999_v38  ;;  %v1622_v54 = vmul.f32 0.3, %v1591_v48  ;;  %v1593_v60 = vadd.f32 %v10774_v51, %v1592_v56 }
 0x1a3   :  { %v1177_v31 = vadd.f32 %v10750_v21, %v1176_v27  ;;  %9349 = vst [vmem:[#allocation2 + $0x1e8] sm:$0xff] %v9348_v28   ;;  %v1428_v63 = vmax.f32 %v1383_v47, %v1414_v53 }
 0x1a4   :  { %9384 = vst [vmem:[#allocation2 + $0x238] sm:$0xff] %v9383_v29   ;;  %v9283_v12 = vpack.c.bf16 %v1013_v43, %v1012_v36  ;;  %v1623_v62 = vmul.f32 0.3, %v1593_v60  ;;  %v1636_v0 = vmax.f32 %v1591_v48, %v1622_v54  ;;  %v1387_v11 = vpop.f32.mrf.mxu0  ;;  %v8927_v36 = vld [vmem:[%s11956_s1] sm:$0xff] }
 0x1a5   :  { %v1207_v39 = vmul.f32 0.3, %v1177_v31  ;;  %v971_v50 = vpop.f32.mrf.mxu2  ;;  %v9353_v7 = vpack.c.bf16 %v1429_v1, %v1428_v63  ;;  %v1388_v24 = vadd.f32 %v10769_v49, %v1387_v11  ;;  %2623 = vmatpush.bf16.msrb.mxu2 %v8927_v36 }
 0x1a6   :  { %9707 = vst [vmem:[#allocation2 + $0x150] sm:$0xff] %v9283_v12   ;;  %v972_v57 = vadd.f32 %v10745_v20, %v971_v50  ;;  %v1637_v4 = vmax.f32 %v1593_v60, %v1623_v62  ;;  %7059 = vmatmul.msk.bf16.gmra.mxu0 %vm514_vm0, %v8901_v25  ;;  %v8892_v62 = vld [vmem:[%s11962_s0 + $0x1b0] sm:$0xff] }
 0x1a7   :  { %v1221_v44 = vmax.f32 %v1177_v31, %v1207_v39  ;;  %6929 = vmatmul.msk.bf16.gmra.mxu2 %vm514_vm0, %v8879_v34  ;;  %9719 = vst [vmem:[#allocation2 + $0x1f0] sm:$0xff] %v9353_v7   ;;  %v1416_v32 = vmul.f32 0.3, %v1388_v24  ;;  %7124 = vmatmul.msk.bf16.gmra.mxu1 %vm514_vm0, %v8912_v26 }
 0x1a8   :  { %v1000_v2 = vmul.f32 0.3, %v972_v57  ;;  %v9388_v8 = vpack.c.bf16 %v1637_v4, %v1636_v0  ;;  %6996 = vmatmul.msk.bf16.gmra.mxu3 %vm514_vm0, %v8892_v62 }
 0x1a9   :  { %v9318_v40 = vpack.c.bf16 %v1221_v44, %v1220_v37  ;;  %v1595_v13 = vpop.f32.mrf.mxu1  ;;  %v8938_v37 = vld [vmem:[%s11956_s1] sm:$0xff]  ;;  %v1430_v47 = vmax.f32 %v1388_v24, %v1416_v32 }
 0x1aa   :  { %v1179_v52 = vpop.f32.mrf.mxu3  ;;  %v1014_v16 = vmax.f32 %v972_v57, %v1000_v2  ;;  %9725 = vst [vmem:[#allocation2 + $0x240] sm:$0xff] %v9388_v8   ;;  %v1596_v27 = vadd.f32 %v10774_v51, %v1595_v13  ;;  %2831 = vmatpush.bf16.msrb.mxu3 %v8938_v37 }
 0x1ab   :  { %9713 = vst [vmem:[#allocation2 + $0x1a0] sm:$0xff] %v9318_v40   ;;  %v1180_v58 = vadd.f32 %v10750_v21, %v1179_v52 }
 0x1ac   :  { %v1624_v33 = vmul.f32 0.3, %v1596_v27  ;;  %v1389_v34 = vpop.f32.mrf.mxu0 }
 0x1ad   :  { %v1208_v3 = vmul.f32 0.3, %v1180_v58  ;;  %v973_v5 = vpop.f32.mrf.mxu2  ;;  %v1390_v41 = vadd.f32 %v10769_v49, %v1389_v34 }
 0x1ae   :  { %v974_v9 = vadd.f32 %v10745_v20, %v973_v5  ;;  %v1638_v48 = vmax.f32 %v1596_v27, %v1624_v33  ;;  %v8902_v5 = vld [vmem:[%s11962_s0 + $0x1e0] sm:$0xff] }
 0x1af   :  { %v1222_v17 = vmax.f32 %v1180_v58, %v1208_v3  ;;  %v1417_v43 = vmul.f32 0.3, %v1390_v41 }
 0x1b0   :  { %v1001_v18 = vmul.f32 0.3, %v974_v9 }
 0x1b1   :  { %v1597_v35 = vpop.f32.mrf.mxu1  ;;  %v1431_v50 = vmax.f32 %v1390_v41, %v1417_v43  ;;  %v8882_v41 = vld [vmem:[%s11962_s0 + $0x180] sm:$0xff] }
 0x1b2   :  { %v1181_v6 = vpop.f32.mrf.mxu3  ;;  %v1015_v22 = vmax.f32 %v974_v9, %v1001_v18  ;;  %v1598_v42 = vadd.f32 %v10774_v51, %v1597_v35 }
 0x1b3   :  { %v1182_v10 = vadd.f32 %v10750_v21, %v1181_v6  ;;  %v9358_v55 = vpack.c.bf16 %v1431_v50, %v1430_v47  ;;  %v8913_v6 = vld [vmem:[%s11962_s0 + $0x218] sm:$0xff] }
 0x1b4   :  { %v9288_v28 = vpack.c.bf16 %v1015_v22, %v1014_v16  ;;  %v1625_v44 = vmul.f32 0.3, %v1598_v42  ;;  %v1392_v59 = vpop.f32.mrf.mxu0 }
 0x1b5   :  { %v1209_v19 = vmul.f32 0.3, %v1182_v10  ;;  %v976_v30 = vpop.f32.mrf.mxu2  ;;  %9720 = vst [vmem:[#allocation2 + $0x1f8] sm:$0xff] %v9358_v55   ;;  %v1393_v7 = vadd.f32 %v10769_v49, %v1392_v59 }
 0x1b6   :  { %9708 = vst [vmem:[#allocation2 + $0x158] sm:$0xff] %v9288_v28   ;;  %v977_v38 = vadd.f32 %v10745_v20, %v976_v30  ;;  %v1639_v52 = vmax.f32 %v1598_v42, %v1625_v44  ;;  %7060 = vmatmul.msk.bf16.gmra.mxu0 %vm514_vm0, %v8902_v5  ;;  %v8893_v42 = vld [vmem:[%s11962_s0 + $0x1b8] sm:$0xff] }
 0x1b7   :  { %v1223_v23 = vmax.f32 %v1182_v10, %v1209_v19  ;;  %6930 = vmatmul.msk.bf16.gmra.mxu2 %vm514_vm0, %v8880_v14  ;;  %7125 = vmatmul.msk.bf16.gmra.mxu1 %vm514_vm0, %v8913_v6  ;;  %v1418_v14 = vmul.f32 0.3, %v1393_v7 }
 0x1b8   :  { %v1002_v12 = vmul.f32 0.3, %v977_v38  ;;  %v9393_v56 = vpack.c.bf16 %v1639_v52, %v1638_v48  ;;  %6997 = vmatmul.msk.bf16.gmra.mxu3 %vm514_vm0, %v8893_v42 }
 0x1b9   :  { %v9323_v29 = vpack.c.bf16 %v1223_v23, %v1222_v17  ;;  %v1600_v60 = vpop.f32.mrf.mxu1  ;;  %v1432_v26 = vmax.f32 %v1393_v7, %v1418_v14 }
 0x1ba   :  { %v1184_v31 = vpop.f32.mrf.mxu3  ;;  %v1016_v63 = vmax.f32 %v977_v38, %v1002_v12  ;;  %9726 = vst [vmem:[#allocation2 + $0x248] sm:$0xff] %v9393_v56   ;;  %v1601_v8 = vadd.f32 %v10774_v51, %v1600_v60  ;;  %v8903_v12 = vld [vmem:[%s11962_s0 + $0x1e8] sm:$0xff] }
 0x1bb   :  { %9714 = vst [vmem:[#allocation2 + $0x1a8] sm:$0xff] %v9323_v29   ;;  %v1185_v39 = vadd.f32 %v10750_v21, %v1184_v31 }
 0x1bc   :  { %v1626_v15 = vmul.f32 0.3, %v1601_v8  ;;  %v1394_v16 = vpop.f32.mrf.mxu0 }
 0x1bd   :  { %v1210_v40 = vmul.f32 0.3, %v1185_v39  ;;  %v978_v53 = vpop.f32.mrf.mxu2  ;;  %v1395_v22 = vadd.f32 %v10769_v49, %v1394_v16  ;;  %v8920_v16 = vld [vmem:[%s11962_s0 + $0x230] sm:$0xff] }
 0x1be   :  { %v979_v57 = vadd.f32 %v10745_v20, %v978_v53  ;;  %v1640_v27 = vmax.f32 %v1601_v8, %v1626_v15 }
 0x1bf   :  { %v1224_v0 = vmax.f32 %v1185_v39, %v1210_v40  ;;  %v1419_v24 = vmul.f32 0.3, %v1395_v22  ;;  %v8914_v40 = vld [vmem:[%s11962_s0 + $0x220] sm:$0xff] }
 0x1c0   :  { %v1003_v2 = vmul.f32 0.3, %v979_v57 }
 0x1c1   :  { %v1602_v17 = vpop.f32.mrf.mxu1  ;;  %v1433_v30 = vmax.f32 %v1395_v22, %v1419_v24 }
 0x1c2   :  { %v1186_v54 = vpop.f32.mrf.mxu3  ;;  %v1017_v1 = vmax.f32 %v979_v57, %v1003_v2  ;;  %v1603_v23 = vadd.f32 %v10774_v51, %v1602_v17  ;;  %v8931_v17 = vld [vmem:[%s11962_s0 + $0x268] sm:$0xff] }
 0x1c3   :  { %v1187_v58 = vadd.f32 %v10750_v21, %v1186_v54  ;;  %v9363_v34 = vpack.c.bf16 %v1433_v30, %v1432_v26  ;;  %v8904_v26 = vld [vmem:[%s11962_s0 + $0x1f0] sm:$0xff] }
 0x1c4   :  { %v9293_v9 = vpack.c.bf16 %v1017_v1, %v1016_v63  ;;  %v1627_v25 = vmul.f32 0.3, %v1603_v23  ;;  %v1397_v38 = vpop.f32.mrf.mxu0 }
 0x1c5   :  { %v1211_v3 = vmul.f32 0.3, %v1187_v58  ;;  %v981_v11 = vpop.f32.mrf.mxu2  ;;  %9721 = vst [vmem:[#allocation2 + $0x200] sm:$0xff] %v9363_v34   ;;  %v1398_v50 = vadd.f32 %v10769_v49, %v1397_v38 }
 0x1c6   :  { %9709 = vst [vmem:[#allocation2 + $0x160] sm:$0xff] %v9293_v9   ;;  %v982_v18 = vadd.f32 %v10745_v20, %v981_v11  ;;  %v1641_v31 = vmax.f32 %v1603_v23, %v1627_v25  ;;  %7061 = vmatmul.msk.bf16.gmra.mxu0 %vm514_vm0, %v8903_v12 }
 0x1c7   :  { %v1225_v4 = vmax.f32 %v1187_v58, %v1211_v3  ;;  %6931 = vmatmul.msk.bf16.gmra.mxu2 %vm514_vm0, %v8881_v61  ;;  %7126 = vmatmul.msk.bf16.gmra.mxu1 %vm514_vm0, %v8914_v40  ;;  %v1420_v57 = vmul.f32 0.3, %v1398_v50 }
 0x1c8   :  { %v1004_v28 = vmul.f32 0.3, %v982_v18  ;;  %v9398_v35 = vpack.c.bf16 %v1641_v31, %v1640_v27  ;;  %v8915_v27 = vld [vmem:[%s11962_s0 + $0x228] sm:$0xff]  ;;  %7251 = vmatmul.msk.bf16.vlgmr.msrb.gmra.mxu3 %vm514_vm0, %v8931_v17 }
 0x1c9   :  { %v9328_v10 = vpack.c.bf16 %v1225_v4, %v1224_v0  ;;  %v1605_v39 = vpop.f32.mrf.mxu1  ;;  %v1434_v1 = vmax.f32 %v1398_v50, %v1420_v57 }
 0x1ca   :  { %v1189_v13 = vpop.f32.mrf.mxu3  ;;  %v1018_v43 = vmax.f32 %v982_v18, %v1004_v28  ;;  %9727 = vst [vmem:[#allocation2 + $0x250] sm:$0xff] %v9398_v35   ;;  %v1606_v52 = vadd.f32 %v10774_v51, %v1605_v39 }
 0x1cb   :  { %9715 = vst [vmem:[#allocation2 + $0x1b0] sm:$0xff] %v9328_v10   ;;  %v1190_v19 = vadd.f32 %v10750_v21, %v1189_v13 }
 0x1cc   :  { %v1628_v58 = vmul.f32 0.3, %v1606_v52  ;;  %v1399_v59 = vpop.f32.mrf.mxu0 }
 0x1cd   :  { %v1212_v29 = vmul.f32 0.3, %v1190_v19  ;;  %v983_v32 = vpop.f32.mrf.mxu2  ;;  %v1400_v63 = vadd.f32 %v10769_v49, %v1399_v59 }
 0x1ce   :  { %v984_v36 = vadd.f32 %v10745_v20, %v983_v32  ;;  %v1642_v4 = vmax.f32 %v1606_v52, %v1628_v58 }
 0x1cf   :  { %v1226_v44 = vmax.f32 %v1190_v19, %v1212_v29  ;;  %v1421_v2 = vmul.f32 0.3, %v1400_v63 }
 0x1d0   :  { %v1005_v45 = vmul.f32 0.3, %v984_v36 }
 0x1d1   :  { %v1607_v60 = vpop.f32.mrf.mxu1  ;;  %v1435_v7 = vmax.f32 %v1400_v63, %v1421_v2 }
 0x1d2   :  { %v1191_v33 = vpop.f32.mrf.mxu3  ;;  %v1019_v47 = vmax.f32 %v984_v36, %v1005_v45  ;;  %v1608_v0 = vadd.f32 %v10774_v51, %v1607_v60 }
 0x1d3   :  { %v1192_v37 = vadd.f32 %v10750_v21, %v1191_v33  ;;  %v9368_v11 = vpack.c.bf16 %v1435_v7, %v1434_v1  ;;  %v10961_v7 = vld [vmem:[%s11961_s2] ss:$0 sm:$0xff] }
 0x1d4   :  { %v9298_v53 = vpack.c.bf16 %v1019_v47, %v1018_v43  ;;  %v1629_v3 = vmul.f32 0.3, %v1608_v0  ;;  %v1402_v28 = vpop.f32.mrf.mxu0 }
 0x1d5   :  { %v1213_v46 = vmul.f32 0.3, %v1192_v37  ;;  %v986_v55 = vpop.f32.mrf.mxu2  ;;  %9722 = vst [vmem:[#allocation2 + $0x208] sm:$0xff] %v9368_v11   ;;  %v1403_v34 = vadd.f32 %v10769_v49, %v1402_v28 }
 0x1d6   :  { %9710 = vst [vmem:[#allocation2 + $0x168] sm:$0xff] %v9298_v53   ;;  %v987_v61 = vadd.f32 %v10745_v20, %v986_v55  ;;  %v1643_v8 = vmax.f32 %v1608_v0, %v1629_v3  ;;  %7062 = vmatmul.msk.bf16.gmra.mxu0 %vm514_vm0, %v8904_v26  ;;  %v8921_v53 = vld [vmem:[%s11962_s0 + $0x238] sm:$0xff] }
 0x1d7   :  { %v1227_v48 = vmax.f32 %v1192_v37, %v1213_v46  ;;  %6932 = vmatmul.msk.bf16.gmra.mxu2 %vm514_vm0, %v8882_v41  ;;  %7127 = vmatmul.msk.bf16.gmra.mxu1 %vm514_vm0, %v8915_v27  ;;  %v1422_v41 = vmul.f32 0.3, %v1403_v34  ;;  %v8953_v0 = vld [vmem:[%s11962_s0 + $0x2d8] sm:$0xff] }
 0x1d8   :  { %v1006_v5 = vmul.f32 0.3, %v987_v61  ;;  %v9403_v13 = vpack.c.bf16 %v1643_v8, %v1642_v4  ;;  %v10966_v8 = vld [vmem:[%s11961_s2] ss:$0 sm:$0xff] }
 0x1d9   :  { %v9333_v54 = vpack.c.bf16 %v1227_v48, %v1226_v44  ;;  %v1610_v29 = vpop.f32.mrf.mxu1  ;;  %v1436_v55 = vmax.f32 %v1403_v34, %v1422_v41 }
 0x1da   :  { %v1194_v56 = vpop.f32.mrf.mxu3  ;;  %v1020_v18 = vmax.f32 %v987_v61, %v1006_v5  ;;  %9728 = vst [vmem:[#allocation2 + $0x258] sm:$0xff] %v9403_v13   ;;  %v1611_v35 = vadd.f32 %v10774_v51, %v1610_v29 }
 0x1db   :  { %9716 = vst [vmem:[#allocation2 + $0x1b8] sm:$0xff] %v9333_v54   ;;  %v1195_v62 = vadd.f32 %v10750_v21, %v1194_v56  ;;  %v8932_v54 = vld [vmem:[%s11962_s0 + $0x270] sm:$0xff] }
 0x1dc   :  { %v1404_v38 = vpop.f32.mrf.mxu0  ;;  %v1630_v42 = vmul.f32 0.3, %v1611_v35  ;;  %7252 = vmatmul.msk.bf16.gmra.mxu3 %vm514_vm0, %v8932_v54 }
 0x1dd   :  { %v1214_v6 = vmul.f32 0.3, %v1195_v62  ;;  %v988_v9 = vpop.f32.mrf.mxu2  ;;  %v1405_v43 = vadd.f32 %v10769_v49, %v1404_v38 }
 0x1de   :  { %v989_v14 = vadd.f32 %v10745_v20, %v988_v9  ;;  %v1644_v56 = vmax.f32 %v1611_v35, %v1630_v42 }
 0x1df   :  { %v1228_v19 = vmax.f32 %v1195_v62, %v1214_v6  ;;  %v1423_v47 = vmul.f32 0.3, %v1405_v43 }
 0x1e0   :  { %v1007_v22 = vmul.f32 0.3, %v989_v14 }
 0x1e1   :  { %v1612_v39 = vpop.f32.mrf.mxu1  ;;  %v1437_v57 = vmax.f32 %v1405_v43, %v1423_v47  ;;  %v8943_v43 = vld [vmem:[%s11962_s0 + $0x2a8] sm:$0xff] }
 0x1e2   :  { %v1196_v10 = vpop.f32.mrf.mxu3  ;;  %v1021_v24 = vmax.f32 %v989_v14, %v1007_v22  ;;  %v1613_v44 = vadd.f32 %v10774_v51, %v1612_v39 }
 0x1e3   :  { %v1197_v15 = vadd.f32 %v10750_v21, %v1196_v10  ;;  %v9373_v63 = vpack.c.bf16 %v1437_v57, %v1436_v55 }
 0x1e4   :  { %v9303_v30 = vpack.c.bf16 %v1021_v24, %v1020_v18  ;;  %v1631_v48 = vmul.f32 0.3, %v1613_v44  ;;  %v1407_v1 = vpop.f32.mrf.mxu0 }
 0x1e5   :  { %v1215_v23 = vmul.f32 0.3, %v1197_v15  ;;  %v991_v32 = vpop.f32.mrf.mxu2  ;;  %9723 = vst [vmem:[#allocation2 + $0x210] sm:$0xff] %v9373_v63   ;;  %v1408_v11 = vadd.f32 %v10769_v49, %v1407_v1 }
 0x1e6   :  { %9711 = vst [vmem:[#allocation2 + $0x170] sm:$0xff] %v9303_v30   ;;  %v992_v36 = vadd.f32 %v10745_v20, %v991_v32  ;;  %v1645_v58 = vmax.f32 %v1613_v44, %v1631_v48  ;;  %v8922_v32 = vld [vmem:[%s11962_s0 + $0x240] sm:$0xff] }
 0x1e7   :  { %v1229_v25 = vmax.f32 %v1197_v15, %v1215_v23  ;;  %7186 = vmatmul.msk.bf16.vlgmr.msrb.gmra.mxu2 %vm514_vm0, %v8920_v16  ;;  %7381 = vmatmul.msk.bf16.vlgmr.msrb.gmra.mxu1 %vm514_vm0, %v8953_v0  ;;  %v1424_v18 = vmul.f32 0.3, %v1408_v11  ;;  %v8954_v44 = vld [vmem:[%s11962_s0 + $0x2e0] sm:$0xff] }
 0x1e8   :  { %v1008_v45 = vmul.f32 0.3, %v992_v36 }
 0x1e9   :  { %v9338_v31 = vpack.c.bf16 %v1229_v25, %v1228_v19  ;;  %v1615_v4 = vpop.f32.mrf.mxu1 }
 0x1ea   :  { %v1199_v33 = vpop.f32.mrf.mxu3  ;;  %v1022_v59 = vmax.f32 %v992_v36, %v1008_v45  ;;  %v1616_v13 = vadd.f32 %v10774_v51, %v1615_v4 }
 0x1eb   :  { %9717 = vst [vmem:[#allocation2 + $0x1c0] sm:$0xff] %v9338_v31   ;;  %v1200_v37 = vadd.f32 %v10750_v21, %v1199_v33  ;;  %v1438_v33 = vmax.f32 %v1408_v11, %v1424_v18 }
 0x1ec   :  { %v1409_v16 = vpop.f32.mrf.mxu0  ;;  %v1632_v19 = vmul.f32 0.3, %v1616_v13 }
 0x1ed   :  { %v1216_v46 = vmul.f32 0.3, %v1200_v37  ;;  %v993_v12 = vpop.f32.mrf.mxu2  ;;  %v1410_v22 = vadd.f32 %v10769_v49, %v1409_v16  ;;  %v8933_v49 = vld [vmem:[%s11962_s0 + $0x278] sm:$0xff] }
 0x1ee   :  { %v994_v50 = vadd.f32 %v10745_v20, %v993_v12  ;;  %v9408_v20 = vpack.c.bf16 %v1645_v58, %v1644_v56  ;;  %7253 = vmatmul.msk.bf16.gmra.mxu3 %vm514_vm0, %v8933_v49  ;;  %v10995_v12 = vld [vmem:[%s11961_s2] ss:$0 sm:$0xff] }
 0x1ef   :  { %v1230_v60 = vmax.f32 %v1200_v37, %v1216_v46  ;;  %v1425_v26 = vmul.f32 0.3, %v1410_v22 }
 0x1f0   :  { %v1009_v61 = vmul.f32 0.3, %v994_v50  ;;  %9729 = vst [vmem:[#allocation2 + $0x260] sm:$0xff] %v9408_v20  }
 0x1f1   :  { %v1617_v17 = vpop.f32.mrf.mxu1  ;;  %v1439_v34 = vmax.f32 %v1410_v22, %v1425_v26 }
 0x1f2   :  { %v1201_v40 = vpop.f32.mrf.mxu3  ;;  %v1023_v2 = vmax.f32 %v994_v50, %v1009_v61  ;;  %v1618_v23 = vadd.f32 %v10774_v51, %v1617_v17  ;;  %v1646_v51 = vmax.f32 %v1616_v13, %v1632_v19 }
 0x1f3   :  { %v1202_v52 = vadd.f32 %v10750_v21, %v1201_v40  ;;  %v8942_v21 = vld [vmem:[%s11962_s0 + $0x2a0] sm:$0xff]  ;;  %v9378_v41 = vpack.c.bf16 %v1439_v34, %v1438_v33 }
 0x1f4   :  { %v9308_v5 = vpack.c.bf16 %v1023_v2, %v1022_v59  ;;  %7316 = vmatmul.msk.bf16.vlgmr.msrb.gmra.mxu0 %vm514_vm0, %v8942_v21  ;;  %v1633_v27 = vmul.f32 0.3, %v1618_v23  ;;  %v2209_v47 = vpop.f32.mrf.mxu0  ;;  %v11000_v40 = vld [vmem:[%s11961_s2] ss:$0 sm:$0xff] }
 0x1f5   :  { %v1217_v62 = vmul.f32 0.3, %v1202_v52  ;;  %v1793_v9 = vpop.f32.mrf.mxu2  ;;  %9724 = vst [vmem:[#allocation2 + $0x218] sm:$0xff] %v9378_v41   ;;  %v2210_v55 = vadd.f32 %v10995_v12, %v2209_v47 }
 0x1f6   :  { %9712 = vst [vmem:[#allocation2 + $0x178] sm:$0xff] %v9308_v5   ;;  %v1794_v14 = vadd.f32 %v10961_v7, %v1793_v9  ;;  %v1647_v35 = vmax.f32 %v1618_v23, %v1633_v27  ;;  %v8923_v9 = vld [vmem:[%s11962_s0 + $0x248] sm:$0xff] }
 0x1f7   :  { %v1231_v3 = vmax.f32 %v1202_v52, %v1217_v62  ;;  %7187 = vmatmul.msk.bf16.gmra.mxu2 %vm514_vm0, %v8921_v53  ;;  %7382 = vmatmul.msk.bf16.gmra.mxu1 %vm514_vm0, %v8954_v44  ;;  %v2244_v61 = vmul.f32 0.3, %v2210_v55 }
 0x1f8   :  { %v1828_v24 = vmul.f32 0.3, %v1794_v14  ;;  %v9413_v42 = vpack.c.bf16 %v1647_v35, %v1646_v51 }
 0x1f9   :  { %v9343_v6 = vpack.c.bf16 %v1231_v3, %v1230_v60  ;;  %v2417_v48 = vpop.f32.mrf.mxu1  ;;  %v2258_v11 = vmax.f32 %v2210_v55, %v2244_v61 }
 0x1fa   :  { %v2001_v10 = vpop.f32.mrf.mxu3  ;;  %v1842_v36 = vmax.f32 %v1794_v14, %v1828_v24  ;;  %9730 = vst [vmem:[#allocation2 + $0x268] sm:$0xff] %v9413_v42   ;;  %v2418_v56 = vadd.f32 %v11000_v40, %v2417_v48  ;;  %v8944_v24 = vld [vmem:[%s11962_s0 + $0x2b0] sm:$0xff] }
 0x1fb   :  { %9718 = vst [vmem:[#allocation2 + $0x1c8] sm:$0xff] %v9343_v6   ;;  %v2002_v15 = vadd.f32 %v10966_v8, %v2001_v10  ;;  %v8934_v10 = vld [vmem:[%s11962_s0 + $0x280] sm:$0xff] }
 0x1fc   :  { %v2211_v59 = vpop.f32.mrf.mxu0  ;;  %v2452_v62 = vmul.f32 0.3, %v2418_v56 }
 0x1fd   :  { %v2036_v25 = vmul.f32 0.3, %v2002_v15  ;;  %v1795_v28 = vpop.f32.mrf.mxu2  ;;  %v2212_v63 = vadd.f32 %v10995_v12, %v2211_v59 }
 0x1fe   :  { %v1796_v30 = vadd.f32 %v10961_v7, %v1795_v28  ;;  %v2466_v13 = vmax.f32 %v2418_v56, %v2452_v62  ;;  %7254 = vmatmul.msk.bf16.gmra.mxu3 %vm514_vm0, %v8934_v10 }
 0x1ff   :  { %v2050_v37 = vmax.f32 %v2002_v15, %v2036_v25  ;;  %v2245_v2 = vmul.f32 0.3, %v2212_v63  ;;  %v8955_v25 = vld [vmem:[%s11962_s0 + $0x2e8] sm:$0xff] }
 0x200   :  { %v1829_v38 = vmul.f32 0.3, %v1796_v30 }
 0x201   :  { %v2419_v60 = vpop.f32.mrf.mxu1  ;;  %v2259_v14 = vmax.f32 %v2212_v63, %v2245_v2 }
 0x202   :  { %v2003_v29 = vpop.f32.mrf.mxu3  ;;  %v1843_v45 = vmax.f32 %v1796_v30, %v1829_v38  ;;  %v2420_v20 = vadd.f32 %v11000_v40, %v2419_v60 }
 0x203   :  { %v2004_v31 = vadd.f32 %v10966_v8, %v2003_v29  ;;  %v9488_v22 = vpack.c.bf16 %v2259_v14, %v2258_v11 }
 0x204   :  { %v9418_v50 = vpack.c.bf16 %v1843_v45, %v1842_v36  ;;  %7317 = vmatmul.msk.bf16.gmra.mxu0 %vm514_vm0, %v8943_v43  ;;  %v2453_v3 = vmul.f32 0.3, %v2420_v20  ;;  %v2214_v28 = vpop.f32.mrf.mxu0 }
 0x205   :  { %v2037_v39 = vmul.f32 0.3, %v2004_v31  ;;  %v1798_v53 = vpop.f32.mrf.mxu2  ;;  %9489 = vst [vmem:[#allocation2 + $0x328] sm:$0xff] %v9488_v22   ;;  %v2215_v33 = vadd.f32 %v10995_v12, %v2214_v28 }
 0x206   :  { %9419 = vst [vmem:[#allocation2 + $0x288] sm:$0xff] %v9418_v50   ;;  %v1799_v57 = vadd.f32 %v10961_v7, %v1798_v53  ;;  %v2467_v15 = vmax.f32 %v2420_v20, %v2453_v3  ;;  %v8924_v53 = vld [vmem:[%s11962_s0 + $0x250] sm:$0xff] }
 0x207   :  { %v2051_v46 = vmax.f32 %v2004_v31, %v2037_v39  ;;  %7188 = vmatmul.msk.bf16.gmra.mxu2 %vm514_vm0, %v8922_v32  ;;  %7383 = vmatmul.msk.bf16.gmra.mxu1 %vm514_vm0, %v8955_v25  ;;  %v2246_v38 = vmul.f32 0.3, %v2215_v33 }
 0x208   :  { %v1830_v21 = vmul.f32 0.3, %v1799_v57  ;;  %v9523_v23 = vpack.c.bf16 %v2467_v15, %v2466_v13 }
 0x209   :  { %v9453_v52 = vpack.c.bf16 %v2051_v46, %v2050_v37  ;;  %v2422_v29 = vpop.f32.mrf.mxu1  ;;  %v2260_v55 = vmax.f32 %v2215_v33, %v2246_v38 }
 0x20a   :  { %v2006_v54 = vpop.f32.mrf.mxu3  ;;  %v1844_v16 = vmax.f32 %v1799_v57, %v1830_v21  ;;  %9524 = vst [vmem:[#allocation2 + $0x378] sm:$0xff] %v9523_v23   ;;  %v2423_v51 = vadd.f32 %v11000_v40, %v2422_v29  ;;  %v8945_v21 = vld [vmem:[%s11962_s0 + $0x2b8] sm:$0xff] }
 0x20b   :  { %9454 = vst [vmem:[#allocation2 + $0x2d8] sm:$0xff] %v9453_v52   ;;  %v2007_v58 = vadd.f32 %v10966_v8, %v2006_v54  ;;  %v8935_v54 = vld [vmem:[%s11962_s0 + $0x288] sm:$0xff] }
 0x20c   :  { %v2216_v36 = vpop.f32.mrf.mxu0  ;;  %v2454_v39 = vmul.f32 0.3, %v2423_v51 }
 0x20d   :  { %v2038_v0 = vmul.f32 0.3, %v2007_v58  ;;  %v1800_v1 = vpop.f32.mrf.mxu2  ;;  %v2217_v41 = vadd.f32 %v10995_v12, %v2216_v36 }
 0x20e   :  { %v1801_v5 = vadd.f32 %v10961_v7, %v1800_v1  ;;  %v2468_v56 = vmax.f32 %v2423_v51, %v2454_v39  ;;  %7255 = vmatmul.msk.bf16.gmra.mxu3 %vm514_vm0, %v8935_v54 }
 0x20f   :  { %v2052_v17 = vmax.f32 %v2007_v58, %v2038_v0  ;;  %v2247_v45 = vmul.f32 0.3, %v2217_v41  ;;  %v8956_v0 = vld [vmem:[%s11962_s0 + $0x2f0] sm:$0xff] }
 0x210   :  { %v1831_v18 = vmul.f32 0.3, %v1801_v5 }
 0x211   :  { %v2424_v37 = vpop.f32.mrf.mxu1  ;;  %v2261_v57 = vmax.f32 %v2217_v41, %v2247_v45 }
 0x212   :  { %v2008_v4 = vpop.f32.mrf.mxu3  ;;  %v1845_v26 = vmax.f32 %v1801_v5, %v1831_v18  ;;  %v2425_v42 = vadd.f32 %v11000_v40, %v2424_v37 }
 0x213   :  { %v2009_v6 = vadd.f32 %v10966_v8, %v2008_v4  ;;  %v9493_v63 = vpack.c.bf16 %v2261_v57, %v2260_v55 }
 0x214   :  { %v9423_v30 = vpack.c.bf16 %v1845_v26, %v1844_v16  ;;  %7318 = vmatmul.msk.bf16.gmra.mxu0 %vm514_vm0, %v8944_v24  ;;  %v2455_v46 = vmul.f32 0.3, %v2425_v42  ;;  %v2219_v1 = vpop.f32.mrf.mxu0 }
 0x215   :  { %v2039_v19 = vmul.f32 0.3, %v2009_v6  ;;  %9743 = vst [vmem:[#allocation2 + $0x330] sm:$0xff] %v9493_v63   ;;  %v2220_v11 = vadd.f32 %v10995_v12, %v2219_v1 }
 0x216   :  { %9731 = vst [vmem:[#allocation2 + $0x290] sm:$0xff] %v9423_v30   ;;  %v2469_v58 = vmax.f32 %v2425_v42, %v2455_v46 }
 0x217   :  { %v2053_v27 = vmax.f32 %v2009_v6, %v2039_v19  ;;  %7189 = vmatmul.msk.bf16.gmra.mxu2 %vm514_vm0, %v8923_v9  ;;  %7384 = vmatmul.msk.bf16.gmra.mxu1 %vm514_vm0, %v8956_v0  ;;  %v2248_v18 = vmul.f32 0.3, %v2220_v11 }
 0x218   :  { %v9528_v20 = vpack.c.bf16 %v2469_v58, %v2468_v56 }
 0x219   :  { %v9458_v31 = vpack.c.bf16 %v2053_v27, %v2052_v17  ;;  %v2427_v4 = vpop.f32.mrf.mxu1  ;;  %v2262_v33 = vmax.f32 %v2220_v11, %v2248_v18 }
 0x21a   :  { %v1803_v32 = vpop.f32.mrf.mxu2  ;;  %v2011_v49 = vpop.f32.mrf.mxu3  ;;  %9749 = vst [vmem:[#allocation2 + $0x380] sm:$0xff] %v9528_v20   ;;  %v2428_v13 = vadd.f32 %v11000_v40, %v2427_v4 }
 0x21b   :  { %9737 = vst [vmem:[#allocation2 + $0x2e0] sm:$0xff] %v9458_v31   ;;  %v1804_v34 = vadd.f32 %v10961_v7, %v1803_v32  ;;  %v2012_v35 = vadd.f32 %v10966_v8, %v2011_v49  ;;  %v8925_v32 = vld [vmem:[%s11962_s0 + $0x258] sm:$0xff]  ;;  %v8936_v49 = vld [vmem:[%s11962_s0 + $0x290] sm:$0xff] }
 0x21c   :  { %v2221_v16 = vpop.f32.mrf.mxu0  ;;  %v2456_v19 = vmul.f32 0.3, %v2428_v13 }
 0x21d   :  { %v1832_v43 = vmul.f32 0.3, %v1804_v34  ;;  %v2040_v44 = vmul.f32 0.3, %v2012_v35  ;;  %v2222_v22 = vadd.f32 %v10995_v12, %v2221_v16 }
 0x21e   :  { %v2470_v51 = vmax.f32 %v2428_v13, %v2456_v19  ;;  %7256 = vmatmul.msk.bf16.gmra.mxu3 %vm514_vm0, %v8936_v49 }
 0x21f   :  { %v1846_v59 = vmax.f32 %v1804_v34, %v1832_v43  ;;  %v2054_v60 = vmax.f32 %v2012_v35, %v2040_v44  ;;  %v2249_v26 = vmul.f32 0.3, %v2222_v22  ;;  %v8946_v43 = vld [vmem:[%s11962_s0 + $0x2c0] sm:$0xff]  ;;  %v8957_v44 = vld [vmem:[%s11962_s0 + $0x2f8] sm:$0xff] }
 0x221   :  { %v2429_v17 = vpop.f32.mrf.mxu1  ;;  %v2263_v34 = vmax.f32 %v2222_v22, %v2249_v26 }
 0x222   :  { %v1805_v47 = vpop.f32.mrf.mxu2  ;;  %v2013_v48 = vpop.f32.mrf.mxu3  ;;  %v2430_v23 = vadd.f32 %v11000_v40, %v2429_v17 }
 0x223   :  { %v1806_v50 = vadd.f32 %v10961_v7, %v1805_v47  ;;  %v2014_v52 = vadd.f32 %v10966_v8, %v2013_v48  ;;  %v9498_v41 = vpack.c.bf16 %v2263_v34, %v2262_v33 }
 0x224   :  { %7319 = vmatmul.msk.bf16.gmra.mxu0 %vm514_vm0, %v8945_v21  ;;  %v2457_v27 = vmul.f32 0.3, %v2430_v23  ;;  %v2224_v47 = vpop.f32.mrf.mxu0 }
 0x225   :  { %v1833_v61 = vmul.f32 0.3, %v1806_v50  ;;  %v2041_v62 = vmul.f32 0.3, %v2014_v52  ;;  %9744 = vst [vmem:[#allocation2 + $0x338] sm:$0xff] %v9498_v41   ;;  %v2225_v55 = vadd.f32 %v10995_v12, %v2224_v47 }
 0x226   :  { %v2471_v35 = vmax.f32 %v2430_v23, %v2457_v27 }
 0x227   :  { %v1847_v2 = vmax.f32 %v1806_v50, %v1833_v61  ;;  %v2055_v3 = vmax.f32 %v2014_v52, %v2041_v62  ;;  %7190 = vmatmul.msk.bf16.gmra.mxu2 %vm514_vm0, %v8924_v53  ;;  %7385 = vmatmul.msk.bf16.gmra.mxu1 %vm514_vm0, %v8957_v44  ;;  %v2250_v61 = vmul.f32 0.3, %v2225_v55 }
 0x228   :  { %v9533_v42 = vpack.c.bf16 %v2471_v35, %v2470_v51 }
 0x229   :  { %v9428_v5 = vpack.c.bf16 %v1847_v2, %v1846_v59  ;;  %v9463_v6 = vpack.c.bf16 %v2055_v3, %v2054_v60  ;;  %v2432_v48 = vpop.f32.mrf.mxu1  ;;  %v2264_v11 = vmax.f32 %v2225_v55, %v2250_v61 }
 0x22a   :  { %v1808_v9 = vpop.f32.mrf.mxu2  ;;  %v2016_v10 = vpop.f32.mrf.mxu3  ;;  %9750 = vst [vmem:[#allocation2 + $0x388] sm:$0xff] %v9533_v42   ;;  %v2433_v56 = vadd.f32 %v11000_v40, %v2432_v48 }
 0x22b   :  { %9732 = vst [vmem:[#allocation2 + $0x298] sm:$0xff] %v9428_v5   ;;  %v1809_v14 = vadd.f32 %v10961_v7, %v1808_v9  ;;  %v2017_v15 = vadd.f32 %v10966_v8, %v2016_v10  ;;  %v8926_v9 = vld [vmem:[%s11962_s0 + $0x260] sm:$0xff]  ;;  %v8937_v10 = vld [vmem:[%s11962_s0 + $0x298] sm:$0xff] }
 0x22c   :  { %9738 = vst [vmem:[#allocation2 + $0x2e8] sm:$0xff] %v9463_v6   ;;  %v2226_v59 = vpop.f32.mrf.mxu0  ;;  %v2458_v62 = vmul.f32 0.3, %v2433_v56 }
 0x22d   :  { %v1834_v24 = vmul.f32 0.3, %v1809_v14  ;;  %v2042_v25 = vmul.f32 0.3, %v2017_v15  ;;  %v2227_v63 = vadd.f32 %v10995_v12, %v2226_v59 }
 0x22e   :  { %v2472_v13 = vmax.f32 %v2433_v56, %v2458_v62  ;;  %7257 = vmatmul.msk.bf16.gmra.mxu3 %vm514_vm0, %v8937_v10 }
 0x22f   :  { %v1848_v36 = vmax.f32 %v1809_v14, %v1834_v24  ;;  %v2056_v37 = vmax.f32 %v2017_v15, %v2042_v25  ;;  %v2251_v2 = vmul.f32 0.3, %v2227_v63  ;;  %v8947_v24 = vld [vmem:[%s11962_s0 + $0x2c8] sm:$0xff]  ;;  %v8958_v25 = vld [vmem:[%s11962_s0 + $0x300] sm:$0xff] }
 0x231   :  { %v2434_v60 = vpop.f32.mrf.mxu1  ;;  %v2265_v14 = vmax.f32 %v2227_v63, %v2251_v2  ;;  %v8948_v63 = vld [vmem:[%s11962_s0 + $0x2d0] sm:$0xff] }
 0x232   :  { %v1810_v28 = vpop.f32.mrf.mxu2  ;;  %v2018_v29 = vpop.f32.mrf.mxu3  ;;  %v2435_v20 = vadd.f32 %v11000_v40, %v2434_v60 }
 0x233   :  { %v1811_v30 = vadd.f32 %v10961_v7, %v1810_v28  ;;  %v2019_v31 = vadd.f32 %v10966_v8, %v2018_v29  ;;  %v9503_v22 = vpack.c.bf16 %v2265_v14, %v2264_v11 }
 0x234   :  { %7320 = vmatmul.msk.bf16.gmra.mxu0 %vm514_vm0, %v8946_v43  ;;  %v2459_v3 = vmul.f32 0.3, %v2435_v20  ;;  %v2229_v28 = vpop.f32.mrf.mxu0 }
 0x235   :  { %v1835_v38 = vmul.f32 0.3, %v1811_v30  ;;  %v2043_v39 = vmul.f32 0.3, %v2019_v31  ;;  %9745 = vst [vmem:[#allocation2 + $0x340] sm:$0xff] %v9503_v22   ;;  %v2230_v33 = vadd.f32 %v10995_v12, %v2229_v28 }
 0x236   :  { %v2473_v15 = vmax.f32 %v2435_v20, %v2459_v3  ;;  %v8959_v20 = vld [vmem:[%s11962_s0 + $0x308] sm:$0xff] }
 0x237   :  { %v1849_v45 = vmax.f32 %v1811_v30, %v1835_v38  ;;  %v2057_v46 = vmax.f32 %v2019_v31, %v2043_v39  ;;  %7191 = vmatmul.msk.bf16.gmra.mxu2 %vm514_vm0, %v8925_v32  ;;  %7386 = vmatmul.msk.bf16.gmra.mxu1 %vm514_vm0, %v8958_v25  ;;  %v2252_v38 = vmul.f32 0.3, %v2230_v33 }
 0x238   :  { %v9538_v23 = vpack.c.bf16 %v2473_v15, %v2472_v13 }
 0x239   :  { %v9433_v50 = vpack.c.bf16 %v1849_v45, %v1848_v36  ;;  %v9468_v52 = vpack.c.bf16 %v2057_v46, %v2056_v37  ;;  %v2437_v29 = vpop.f32.mrf.mxu1 }
 0x23a   :  { %v1813_v53 = vpop.f32.mrf.mxu2  ;;  %v2021_v54 = vpop.f32.mrf.mxu3  ;;  %9751 = vst [vmem:[#allocation2 + $0x390] sm:$0xff] %v9538_v23   ;;  %v2438_v51 = vadd.f32 %v11000_v40, %v2437_v29 }
 0x23b   :  { %9733 = vst [vmem:[#allocation2 + $0x2a0] sm:$0xff] %v9433_v50   ;;  %v1814_v57 = vadd.f32 %v10961_v7, %v1813_v53  ;;  %v2022_v58 = vadd.f32 %v10966_v8, %v2021_v54  ;;  %v2266_v53 = vmax.f32 %v2230_v33, %v2252_v38 }
 0x23c   :  { %9739 = vst [vmem:[#allocation2 + $0x2f0] sm:$0xff] %v9468_v52   ;;  %v2231_v36 = vpop.f32.mrf.mxu0  ;;  %v2460_v39 = vmul.f32 0.3, %v2438_v51 }
 0x23d   :  { %v1836_v21 = vmul.f32 0.3, %v1814_v57  ;;  %v2044_v0 = vmul.f32 0.3, %v2022_v58  ;;  %v2232_v41 = vadd.f32 %v10995_v12, %v2231_v36 }
 0x23e   :  { %v2474_v54 = vmax.f32 %v2438_v51, %v2460_v39 }
 0x23f   :  { %v1850_v16 = vmax.f32 %v1814_v57, %v1836_v21  ;;  %v2058_v17 = vmax.f32 %v2022_v58, %v2044_v0  ;;  %v2253_v45 = vmul.f32 0.3, %v2232_v41 }
 0x241   :  { %v2439_v37 = vpop.f32.mrf.mxu1  ;;  %v2267_v55 = vmax.f32 %v2232_v41, %v2253_v45 }
 0x242   :  { %v1815_v1 = vpop.f32.mrf.mxu2  ;;  %v2023_v4 = vpop.f32.mrf.mxu3  ;;  %v2440_v42 = vadd.f32 %v11000_v40, %v2439_v37 }
 0x243   :  { %v1816_v5 = vadd.f32 %v10961_v7, %v1815_v1  ;;  %v2024_v6 = vadd.f32 %v10966_v8, %v2023_v4  ;;  %v9508_v61 = vpack.c.bf16 %v2267_v55, %v2266_v53 }
 0x244   :  { %7321 = vmatmul.msk.bf16.gmra.mxu0 %vm514_vm0, %v8947_v24  ;;  %v2461_v46 = vmul.f32 0.3, %v2440_v42  ;;  %v2234_v2 = vpop.f32.mrf.mxu0 }
 0x245   :  { %v1837_v18 = vmul.f32 0.3, %v1816_v5  ;;  %v2045_v19 = vmul.f32 0.3, %v2024_v6  ;;  %9746 = vst [vmem:[#allocation2 + $0x348] sm:$0xff] %v9508_v61  }
 0x246   :  { %v2475_v56 = vmax.f32 %v2440_v42, %v2461_v46 }
 0x247   :  { %v1851_v26 = vmax.f32 %v1816_v5, %v1837_v18  ;;  %v2059_v27 = vmax.f32 %v2024_v6, %v2045_v19  ;;  %7192 = vmatmul.msk.bf16.gmra.mxu2 %vm514_vm0, %v8926_v9  ;;  %7387 = vmatmul.msk.bf16.gmra.mxu1 %vm514_vm0, %v8959_v20  ;;  %v2235_v9 = vadd.f32 %v10995_v12, %v2234_v2 }
 0x248   :  { %v9543_v62 = vpack.c.bf16 %v2475_v56, %v2474_v54 }
 0x249   :  { %v9438_v30 = vpack.c.bf16 %v1851_v26, %v1850_v16  ;;  %v9473_v31 = vpack.c.bf16 %v2059_v27, %v2058_v17  ;;  %v2442_v3 = vpop.f32.mrf.mxu1  ;;  %v2254_v16 = vmul.f32 0.3, %v2235_v9 }
 0x24a   :  { %v1818_v32 = vpop.f32.mrf.mxu2  ;;  %v2026_v49 = vpop.f32.mrf.mxu3  ;;  %9752 = vst [vmem:[#allocation2 + $0x398] sm:$0xff] %v9543_v62   ;;  %v2443_v10 = vadd.f32 %v11000_v40, %v2442_v3 }
 0x24b   :  { %9734 = vst [vmem:[#allocation2 + $0x2a8] sm:$0xff] %v9438_v30   ;;  %v1819_v34 = vadd.f32 %v10961_v7, %v1818_v32  ;;  %v2027_v35 = vadd.f32 %v10966_v8, %v2026_v49  ;;  %v2268_v30 = vmax.f32 %v2235_v9, %v2254_v16  ;;  %v11145_v16 = vld [vmem:[%s11961_s2] ss:$0 sm:$0xff] }
 0x24c   :  { %9740 = vst [vmem:[#allocation2 + $0x2f8] sm:$0xff] %v9473_v31   ;;  %v2236_v14 = vpop.f32.mrf.mxu0  ;;  %v2462_v17 = vmul.f32 0.3, %v2443_v10 }
 0x24d   :  { %v1838_v43 = vmul.f32 0.3, %v1819_v34  ;;  %v2046_v44 = vmul.f32 0.3, %v2027_v35  ;;  %v2237_v18 = vadd.f32 %v10995_v12, %v2236_v14 }
 0x24e   :  { %v2476_v31 = vmax.f32 %v2443_v10, %v2462_v17  ;;  %v11150_v17 = vld [vmem:[%s11961_s2] ss:$0 sm:$0xff] }
 0x24f   :  { %v1852_v57 = vmax.f32 %v1819_v34, %v1838_v43  ;;  %v2060_v58 = vmax.f32 %v2027_v35, %v2046_v44  ;;  %v2255_v24 = vmul.f32 0.3, %v2237_v18  ;;  %v11132_v44 = vld [vmem:[%s11961_s2] ss:$0 sm:$0xff] }
 0x251   :  { %v2444_v15 = vpop.f32.mrf.mxu1  ;;  %v2269_v32 = vmax.f32 %v2237_v18, %v2255_v24 }
 0x252   :  { %v1820_v47 = vpop.f32.mrf.mxu2  ;;  %v2028_v48 = vpop.f32.mrf.mxu3  ;;  %v2445_v19 = vadd.f32 %v11000_v40, %v2444_v15 }
 0x253   :  { %v1821_v50 = vadd.f32 %v10961_v7, %v1820_v47  ;;  %v2029_v52 = vadd.f32 %v10966_v8, %v2028_v48  ;;  %v9513_v36 = vpack.c.bf16 %v2269_v32, %v2268_v30 }
 0x254   :  { %7322 = vmatmul.msk.bf16.gmra.mxu0 %vm514_vm0, %v8948_v63  ;;  %v2463_v25 = vmul.f32 0.3, %v2445_v19  ;;  %v2239_v41 = vpop.f32.mrf.mxu0 }
 0x255   :  { %v1839_v59 = vmul.f32 0.3, %v1821_v50  ;;  %v2047_v60 = vmul.f32 0.3, %v2029_v52  ;;  %9747 = vst [vmem:[#allocation2 + $0x350] sm:$0xff] %v9513_v36   ;;  %v2240_v47 = vadd.f32 %v10995_v12, %v2239_v41 }
 0x256   :  { %v2477_v49 = vmax.f32 %v2445_v19, %v2463_v25 }
 0x257   :  { %v1853_v21 = vmax.f32 %v1821_v50, %v1839_v59  ;;  %v2061_v0 = vmax.f32 %v2029_v52, %v2047_v60  ;;  %v2256_v55 = vmul.f32 0.3, %v2240_v47 }
 0x258   :  { %v9548_v37 = vpack.c.bf16 %v2477_v49, %v2476_v31 }
 0x259   :  { %v9443_v1 = vpack.c.bf16 %v1853_v21, %v1852_v57  ;;  %v9478_v4 = vpack.c.bf16 %v2061_v0, %v2060_v58  ;;  %v2447_v42 = vpop.f32.mrf.mxu1  ;;  %v2270_v2 = vmax.f32 %v2240_v47, %v2256_v55 }
 0x25a   :  { %v1823_v5 = vpop.f32.mrf.mxu2  ;;  %v2031_v6 = vpop.f32.mrf.mxu3  ;;  %9753 = vst [vmem:[#allocation2 + $0x3a0] sm:$0xff] %v9548_v37   ;;  %v2448_v48 = vadd.f32 %v11000_v40, %v2447_v42 }
 0x25b   :  { %9735 = vst [vmem:[#allocation2 + $0x2b0] sm:$0xff] %v9443_v1   ;;  %v1824_v11 = vadd.f32 %v10961_v7, %v1823_v5  ;;  %v2032_v13 = vadd.f32 %v10966_v8, %v2031_v6 }
 0x25c   :  { %9741 = vst [vmem:[#allocation2 + $0x300] sm:$0xff] %v9478_v4   ;;  %v2241_v53 = vpop.f32.mrf.mxu0  ;;  %v2464_v56 = vmul.f32 0.3, %v2448_v48 }
 0x25d   :  { %v1840_v22 = vmul.f32 0.3, %v1824_v11  ;;  %v2048_v23 = vmul.f32 0.3, %v2032_v13  ;;  %v2242_v57 = vadd.f32 %v10995_v12, %v2241_v53 }
 0x25e   :  { %v2478_v3 = vmax.f32 %v2448_v48, %v2464_v56 }
 0x25f   :  { %v1854_v33 = vmax.f32 %v1824_v11, %v1840_v22  ;;  %v2062_v51 = vmax.f32 %v2032_v13, %v2048_v23  ;;  %v2257_v61 = vmul.f32 0.3, %v2242_v57 }
 0x261   :  { %v2449_v54 = vpop.f32.mrf.mxu1  ;;  %v2271_v1 = vmax.f32 %v2242_v57, %v2257_v61 }
 0x262   :  { %v1825_v26 = vpop.f32.mrf.mxu2  ;;  %v2033_v27 = vpop.f32.mrf.mxu3  ;;  %v2450_v58 = vadd.f32 %v11000_v40, %v2449_v54 }
 0x263   :  { %v1826_v28 = vadd.f32 %v10961_v7, %v1825_v26  ;;  %v2034_v29 = vadd.f32 %v10966_v8, %v2033_v27  ;;  %v11127_v8 = vld [vmem:[%s11961_s2] ss:$0 sm:$0xff]  ;;  %v9518_v10 = vpack.c.bf16 %v2271_v1, %v2270_v2 }
 0x264   :  { %v2465_v62 = vmul.f32 0.3, %v2450_v58 }
 0x265   :  { %v1841_v34 = vmul.f32 0.3, %v1826_v28  ;;  %v2049_v35 = vmul.f32 0.3, %v2034_v29  ;;  %9748 = vst [vmem:[#allocation2 + $0x358] sm:$0xff] %v9518_v10  }
 0x266   :  { %v2479_v4 = vmax.f32 %v2450_v58, %v2465_v62 }
 0x267   :  { %v1855_v38 = vmax.f32 %v1826_v28, %v1841_v34  ;;  %v2063_v39 = vmax.f32 %v2034_v29, %v2049_v35 }
 0x268   :  { %v9553_v40 = vpack.c.bf16 %v2479_v4, %v2478_v3 }
 0x269   :  { %v9448_v43 = vpack.c.bf16 %v1855_v38, %v1854_v33  ;;  %v9483_v7 = vpack.c.bf16 %v2063_v39, %v2062_v51  ;;  %v3249_v15 = vpop.f32.mrf.mxu1 }
 0x26a   :  { %v2625_v45 = vpop.f32.mrf.mxu2  ;;  %v2833_v46 = vpop.f32.mrf.mxu3  ;;  %9754 = vst [vmem:[#allocation2 + $0x3a8] sm:$0xff] %v9553_v40   ;;  %v3250_v25 = vadd.f32 %v11150_v17, %v3249_v15 }
 0x26b   :  { %9736 = vst [vmem:[#allocation2 + $0x2b8] sm:$0xff] %v9448_v43   ;;  %v2626_v50 = vadd.f32 %v11127_v8, %v2625_v45  ;;  %v2834_v52 = vadd.f32 %v11132_v44, %v2833_v46 }
 0x26c   :  { %9742 = vst [vmem:[#allocation2 + $0x308] sm:$0xff] %v9483_v7   ;;  %v3284_v31 = vmul.f32 0.3, %v3250_v25 }
 0x26d   :  { %v2660_v59 = vmul.f32 0.3, %v2626_v50  ;;  %v2868_v60 = vmul.f32 0.3, %v2834_v52 }
 0x26e   :  { %v3298_v42 = vmax.f32 %v3250_v25, %v3284_v31 }
 0x26f   :  { %v2674_v5 = vmax.f32 %v2626_v50, %v2660_v59  ;;  %v2882_v6 = vmax.f32 %v2834_v52, %v2868_v60 }
 0x271   :  { %v3041_v14 = vpop.f32.mrf.mxu0  ;;  %v3251_v29 = vpop.f32.mrf.mxu1 }
 0x272   :  { %v2627_v63 = vpop.f32.mrf.mxu2  ;;  %v2835_v20 = vpop.f32.mrf.mxu3  ;;  %v3042_v24 = vadd.f32 %v11145_v16, %v3041_v14  ;;  %v3252_v49 = vadd.f32 %v11150_v17, %v3251_v29 }
 0x273   :  { %v2628_v21 = vadd.f32 %v11127_v8, %v2627_v63  ;;  %v2836_v0 = vadd.f32 %v11132_v44, %v2835_v20 }
 0x274   :  { %v3076_v30 = vmul.f32 0.3, %v3042_v24  ;;  %v3285_v35 = vmul.f32 0.3, %v3252_v49 }
 0x275   :  { %v2661_v9 = vmul.f32 0.3, %v2628_v21  ;;  %v2869_v12 = vmul.f32 0.3, %v2836_v0 }
 0x276   :  { %v3090_v41 = vmax.f32 %v3042_v24, %v3076_v30  ;;  %v3299_v7 = vmax.f32 %v3252_v49, %v3285_v35 }
 0x277   :  { %v2675_v11 = vmax.f32 %v2628_v21, %v2661_v9  ;;  %v2883_v13 = vmax.f32 %v2836_v0, %v2869_v12 }
 0x278   :  { %v9663_v52 = vpack.c.bf16 %v3299_v7, %v3298_v42 }
 0x279   :  { %v9558_v18 = vpack.c.bf16 %v2675_v11, %v2674_v5  ;;  %v9593_v19 = vpack.c.bf16 %v2883_v13, %v2882_v6  ;;  %v3043_v28 = vpop.f32.mrf.mxu0  ;;  %v3254_v56 = vpop.f32.mrf.mxu1 }
 0x27a   :  { %v2630_v22 = vpop.f32.mrf.mxu2  ;;  %v2838_v23 = vpop.f32.mrf.mxu3  ;;  %v3044_v32 = vadd.f32 %v11145_v16, %v3043_v28  ;;  %9664 = vst [vmem:[#allocation2 + $0x4b8] sm:$0xff] %v9663_v52   ;;  %v3255_v62 = vadd.f32 %v11150_v17, %v3254_v56 }
 0x27b   :  { %9559 = vst [vmem:[#allocation2 + $0x3c8] sm:$0xff] %v9558_v18   ;;  %v2631_v26 = vadd.f32 %v11127_v8, %v2630_v22  ;;  %v2839_v27 = vadd.f32 %v11132_v44, %v2838_v23 }
 0x27c   :  { %9594 = vst [vmem:[#allocation2 + $0x418] sm:$0xff] %v9593_v19   ;;  %v3077_v34 = vmul.f32 0.3, %v3044_v32  ;;  %v3286_v3 = vmul.f32 0.3, %v3255_v62 }
 0x27d   :  { %v2662_v33 = vmul.f32 0.3, %v2631_v26  ;;  %v2870_v51 = vmul.f32 0.3, %v2839_v27 }
 0x27e   :  { %v3091_v43 = vmax.f32 %v3044_v32, %v3077_v34  ;;  %v3300_v15 = vmax.f32 %v3255_v62, %v3286_v3 }
 0x27f   :  { %v2676_v45 = vmax.f32 %v2631_v26, %v2662_v33  ;;  %v2884_v46 = vmax.f32 %v2839_v27, %v2870_v51 }
 0x280   :  { %v9628_v50 = vpack.c.bf16 %v3091_v43, %v3090_v41 }
 0x281   :  { %v3046_v55 = vpop.f32.mrf.mxu0  ;;  %v3256_v0 = vpop.f32.mrf.mxu1 }
 0x282   :  { %v2632_v36 = vpop.f32.mrf.mxu2  ;;  %v2840_v37 = vpop.f32.mrf.mxu3  ;;  %9629 = vst [vmem:[#allocation2 + $0x468] sm:$0xff] %v9628_v50   ;;  %v3047_v61 = vadd.f32 %v11145_v16, %v3046_v55  ;;  %v3257_v4 = vadd.f32 %v11150_v17, %v3256_v0 }
 0x283   :  { %v2633_v38 = vadd.f32 %v11127_v8, %v2632_v36  ;;  %v2841_v39 = vadd.f32 %v11132_v44, %v2840_v37 }
 0x284   :  { %v3078_v2 = vmul.f32 0.3, %v3047_v61  ;;  %v3287_v12 = vmul.f32 0.3, %v3257_v4 }
 0x285   :  { %v2663_v47 = vmul.f32 0.3, %v2633_v38  ;;  %v2871_v48 = vmul.f32 0.3, %v2841_v39 }
 0x286   :  { %v3092_v14 = vmax.f32 %v3047_v61, %v3078_v2  ;;  %v3301_v19 = vmax.f32 %v3257_v4, %v3287_v12 }
 0x287   :  { %v2677_v53 = vmax.f32 %v2633_v38, %v2663_v47  ;;  %v2885_v54 = vmax.f32 %v2841_v39, %v2871_v48 }
 0x288   :  { %v9668_v27 = vpack.c.bf16 %v3301_v19, %v3300_v15 }
 0x289   :  { %v9563_v57 = vpack.c.bf16 %v2677_v53, %v2676_v45  ;;  %v9598_v58 = vpack.c.bf16 %v2885_v54, %v2884_v46  ;;  %v3048_v21 = vpop.f32.mrf.mxu0  ;;  %v3259_v31 = vpop.f32.mrf.mxu1 }
 0x28a   :  { %v2635_v59 = vpop.f32.mrf.mxu2  ;;  %v2843_v60 = vpop.f32.mrf.mxu3  ;;  %v3049_v1 = vadd.f32 %v11145_v16, %v3048_v21  ;;  %9773 = vst [vmem:[#allocation2 + $0x4c0] sm:$0xff] %v9668_v27   ;;  %v3260_v35 = vadd.f32 %v11150_v17, %v3259_v31 }
 0x28b   :  { %9755 = vst [vmem:[#allocation2 + $0x3d0] sm:$0xff] %v9563_v57   ;;  %v2636_v63 = vadd.f32 %v11127_v8, %v2635_v59  ;;  %v2844_v20 = vadd.f32 %v11132_v44, %v2843_v60 }
 0x28c   :  { %9761 = vst [vmem:[#allocation2 + $0x420] sm:$0xff] %v9598_v58   ;;  %v3079_v9 = vmul.f32 0.3, %v3049_v1  ;;  %v3288_v42 = vmul.f32 0.3, %v3260_v35 }
 0x28d   :  { %v2664_v5 = vmul.f32 0.3, %v2636_v63  ;;  %v2872_v6 = vmul.f32 0.3, %v2844_v20 }
 0x28e   :  { %v3093_v18 = vmax.f32 %v3049_v1, %v3079_v9  ;;  %v3302_v56 = vmax.f32 %v3260_v35, %v3288_v42 }
 0x28f   :  { %v2678_v22 = vmax.f32 %v2636_v63, %v2664_v5  ;;  %v2886_v23 = vmax.f32 %v2844_v20, %v2872_v6 }
 0x290   :  { %v9633_v26 = vpack.c.bf16 %v3093_v18, %v3092_v14 }
 0x291   :  { %v3051_v30 = vpop.f32.mrf.mxu0  ;;  %v3261_v39 = vpop.f32.mrf.mxu1 }
 0x292   :  { %v2637_v10 = vpop.f32.mrf.mxu2  ;;  %v2845_v40 = vpop.f32.mrf.mxu3  ;;  %9767 = vst [vmem:[#allocation2 + $0x470] sm:$0xff] %v9633_v26   ;;  %v3052_v34 = vadd.f32 %v11145_v16, %v3051_v30  ;;  %v3262_v7 = vadd.f32 %v11150_v17, %v3261_v39 }
 0x293   :  { %v2638_v11 = vadd.f32 %v11127_v8, %v2637_v10  ;;  %v2846_v13 = vadd.f32 %v11132_v44, %v2845_v40 }
 0x294   :  { %v3080_v41 = vmul.f32 0.3, %v3052_v34  ;;  %v3289_v48 = vmul.f32 0.3, %v3262_v7 }
 0x295   :  { %v2665_v24 = vmul.f32 0.3, %v2638_v11  ;;  %v2873_v25 = vmul.f32 0.3, %v2846_v13 }
 0x296   :  { %v3094_v55 = vmax.f32 %v3052_v34, %v3080_v41  ;;  %v3303_v58 = vmax.f32 %v3262_v7, %v3289_v48 }
 0x297   :  { %v2679_v28 = vmax.f32 %v2638_v11, %v2665_v24  ;;  %v2887_v29 = vmax.f32 %v2846_v13, %v2873_v25 }
 0x298   :  { %v9673_v20 = vpack.c.bf16 %v3303_v58, %v3302_v56 }
 0x299   :  { %v9568_v32 = vpack.c.bf16 %v2679_v28, %v2678_v22  ;;  %v9603_v49 = vpack.c.bf16 %v2887_v29, %v2886_v23  ;;  %v3053_v38 = vpop.f32.mrf.mxu0  ;;  %v3264_v3 = vpop.f32.mrf.mxu1 }
 0x29a   :  { %v2640_v33 = vpop.f32.mrf.mxu2  ;;  %v2848_v51 = vpop.f32.mrf.mxu3  ;;  %v3054_v43 = vadd.f32 %v11145_v16, %v3053_v38  ;;  %9774 = vst [vmem:[#allocation2 + $0x4c8] sm:$0xff] %v9673_v20   ;;  %v3265_v12 = vadd.f32 %v11150_v17, %v3264_v3 }
 0x29b   :  { %9756 = vst [vmem:[#allocation2 + $0x3d8] sm:$0xff] %v9568_v32   ;;  %v2641_v36 = vadd.f32 %v11127_v8, %v2640_v33  ;;  %v2849_v37 = vadd.f32 %v11132_v44, %v2848_v51 }
 0x29c   :  { %9762 = vst [vmem:[#allocation2 + $0x428] sm:$0xff] %v9603_v49   ;;  %v3081_v47 = vmul.f32 0.3, %v3054_v43  ;;  %v3290_v15 = vmul.f32 0.3, %v3265_v12 }
 0x29d   :  { %v2666_v45 = vmul.f32 0.3, %v2641_v36  ;;  %v2874_v46 = vmul.f32 0.3, %v2849_v37 }
 0x29e   :  { %v3095_v57 = vmax.f32 %v3054_v43, %v3081_v47  ;;  %v3304_v31 = vmax.f32 %v3265_v12, %v3290_v15 }
 0x29f   :  { %v2680_v59 = vmax.f32 %v2641_v36, %v2666_v45  ;;  %v2888_v60 = vmax.f32 %v2849_v37, %v2874_v46 }
 0x2a0   :  { %v9638_v63 = vpack.c.bf16 %v3095_v57, %v3094_v55 }
 0x2a1   :  { %v3056_v2 = vpop.f32.mrf.mxu0  ;;  %v3266_v13 = vpop.f32.mrf.mxu1 }
 0x2a2   :  { %v2642_v50 = vpop.f32.mrf.mxu2  ;;  %v2850_v52 = vpop.f32.mrf.mxu3  ;;  %9768 = vst [vmem:[#allocation2 + $0x478] sm:$0xff] %v9638_v63   ;;  %v3057_v9 = vadd.f32 %v11145_v16, %v3056_v2  ;;  %v3267_v19 = vadd.f32 %v11150_v17, %v3266_v13 }
 0x2a3   :  { %v2643_v53 = vadd.f32 %v11127_v8, %v2642_v50  ;;  %v2851_v54 = vadd.f32 %v11132_v44, %v2850_v52 }
 0x2a4   :  { %v3082_v14 = vmul.f32 0.3, %v3057_v9  ;;  %v3291_v25 = vmul.f32 0.3, %v3267_v19 }
 0x2a5   :  { %v2667_v61 = vmul.f32 0.3, %v2643_v53  ;;  %v2875_v62 = vmul.f32 0.3, %v2851_v54 }
 0x2a6   :  { %v3096_v30 = vmax.f32 %v3057_v9, %v3082_v14  ;;  %v3305_v49 = vmax.f32 %v3267_v19, %v3291_v25 }
 0x2a7   :  { %v2681_v21 = vmax.f32 %v2643_v53, %v2667_v61  ;;  %v2889_v0 = vmax.f32 %v2851_v54, %v2875_v62 }
 0x2a8   :  { %v9678_v37 = vpack.c.bf16 %v3305_v49, %v3304_v31 }
 0x2a9   :  { %v9573_v1 = vpack.c.bf16 %v2681_v21, %v2680_v59  ;;  %v9608_v4 = vpack.c.bf16 %v2889_v0, %v2888_v60  ;;  %v3058_v11 = vpop.f32.mrf.mxu0  ;;  %v3269_v42 = vpop.f32.mrf.mxu1 }
 0x2aa   :  { %v2645_v5 = vpop.f32.mrf.mxu2  ;;  %v2853_v6 = vpop.f32.mrf.mxu3  ;;  %v3059_v18 = vadd.f32 %v11145_v16, %v3058_v11  ;;  %9775 = vst [vmem:[#allocation2 + $0x4d0] sm:$0xff] %v9678_v37   ;;  %v3270_v48 = vadd.f32 %v11150_v17, %v3269_v42 }
 0x2ab   :  { %9757 = vst [vmem:[#allocation2 + $0x3e0] sm:$0xff] %v9573_v1   ;;  %v2646_v10 = vadd.f32 %v11127_v8, %v2645_v5  ;;  %v2854_v40 = vadd.f32 %v11132_v44, %v2853_v6 }
 0x2ac   :  { %9763 = vst [vmem:[#allocation2 + $0x430] sm:$0xff] %v9608_v4   ;;  %v3083_v24 = vmul.f32 0.3, %v3059_v18  ;;  %v3292_v56 = vmul.f32 0.3, %v3270_v48 }
 0x2ad   :  { %v2668_v22 = vmul.f32 0.3, %v2646_v10  ;;  %v2876_v23 = vmul.f32 0.3, %v2854_v40 }
 0x2ae   :  { %v3097_v32 = vmax.f32 %v3059_v18, %v3083_v24  ;;  %v3306_v3 = vmax.f32 %v3270_v48, %v3292_v56 }
 0x2af   :  { %v2682_v33 = vmax.f32 %v2646_v10, %v2668_v22  ;;  %v2890_v51 = vmax.f32 %v2854_v40, %v2876_v23  ;;  %v9834_v22 = vld [vmem:[#allocation3] ss:$0 sm:$0xff] }
 0x2b0   :  { %v9643_v36 = vpack.c.bf16 %v3097_v32, %v3096_v30  ;;  %3346 = vst.msk [vmem:[%s11963_s7] sm:$0xff] %vm3345_vm1, %v9834_v22 }
 0x2b1   :  { %v3061_v41 = vpop.f32.mrf.mxu0  ;;  %v3271_v54 = vpop.f32.mrf.mxu1  ;;  %3347 = vst.msk [vmem:[%s11963_s7 + $0x8] sm:$0xff] %vm3345_vm1, %v9834_v22 }
 0x2b2   :  { %v2647_v26 = vpop.f32.mrf.mxu2  ;;  %v2855_v27 = vpop.f32.mrf.mxu3  ;;  %9769 = vst [vmem:[#allocation2 + $0x480] sm:$0xff] %v9643_v36   ;;  %v3062_v47 = vadd.f32 %v11145_v16, %v3061_v41  ;;  %v3272_v58 = vadd.f32 %v11150_v17, %v3271_v54 }
 0x2b3   :  { %v2648_v28 = vadd.f32 %v11127_v8, %v2647_v26  ;;  %v2856_v29 = vadd.f32 %v11132_v44, %v2855_v27 }
 0x2b4   :  { %v3084_v55 = vmul.f32 0.3, %v3062_v47  ;;  %v3293_v62 = vmul.f32 0.3, %v3272_v58 }
 0x2b5   :  { %v2669_v34 = vmul.f32 0.3, %v2648_v28  ;;  %v2877_v35 = vmul.f32 0.3, %v2856_v29 }
 0x2b6   :  { %v3098_v2 = vmax.f32 %v3062_v47, %v3084_v55  ;;  %v3307_v4 = vmax.f32 %v3272_v58, %v3293_v62 }
 0x2b7   :  { %v2683_v38 = vmax.f32 %v2648_v28, %v2669_v34  ;;  %v2891_v39 = vmax.f32 %v2856_v29, %v2877_v35 }
 0x2b8   :  { %v9683_v40 = vpack.c.bf16 %v3307_v4, %v3306_v3 }
 0x2b9   :  { %v9578_v43 = vpack.c.bf16 %v2683_v38, %v2682_v33  ;;  %v9613_v7 = vpack.c.bf16 %v2891_v39, %v2890_v51  ;;  %v3063_v53 = vpop.f32.mrf.mxu0  ;;  %v3274_v15 = vpop.f32.mrf.mxu1 }
 0x2ba   :  { %v2650_v45 = vpop.f32.mrf.mxu2  ;;  %v2858_v46 = vpop.f32.mrf.mxu3  ;;  %v3064_v57 = vadd.f32 %v11145_v16, %v3063_v53  ;;  %9776 = vst [vmem:[#allocation2 + $0x4d8] sm:$0xff] %v9683_v40   ;;  %v3275_v26 = vadd.f32 %v11150_v17, %v3274_v15 }
 0x2bb   :  { %9758 = vst [vmem:[#allocation2 + $0x3e8] sm:$0xff] %v9578_v43   ;;  %v2651_v50 = vadd.f32 %v11127_v8, %v2650_v45  ;;  %v2859_v52 = vadd.f32 %v11132_v44, %v2858_v46 }
 0x2bc   :  { %9764 = vst [vmem:[#allocation2 + $0x438] sm:$0xff] %v9613_v7   ;;  %v3085_v61 = vmul.f32 0.3, %v3064_v57  ;;  %v3294_v32 = vmul.f32 0.3, %v3275_v26 }
 0x2bd   :  { %v2670_v59 = vmul.f32 0.3, %v2651_v50  ;;  %v2878_v60 = vmul.f32 0.3, %v2859_v52 }
 0x2be   :  { %v3099_v1 = vmax.f32 %v3064_v57, %v3085_v61  ;;  %v3308_v43 = vmax.f32 %v3275_v26, %v3294_v32 }
 0x2bf   :  { %v2684_v5 = vmax.f32 %v2651_v50, %v2670_v59  ;;  %v2892_v6 = vmax.f32 %v2859_v52, %v2878_v60 }
 0x2c0   :  { %v9648_v10 = vpack.c.bf16 %v3099_v1, %v3098_v2 }
 0x2c1   :  { %v3066_v14 = vpop.f32.mrf.mxu0  ;;  %v3276_v30 = vpop.f32.mrf.mxu1 }
 0x2c2   :  { %v2652_v63 = vpop.f32.mrf.mxu2  ;;  %v2860_v20 = vpop.f32.mrf.mxu3  ;;  %9770 = vst [vmem:[#allocation2 + $0x488] sm:$0xff] %v9648_v10   ;;  %v3067_v25 = vadd.f32 %v11145_v16, %v3066_v14  ;;  %v3277_v33 = vadd.f32 %v11150_v17, %v3276_v30 }
 0x2c3   :  { %v2653_v21 = vadd.f32 %v11127_v8, %v2652_v63  ;;  %v2861_v0 = vadd.f32 %v11132_v44, %v2860_v20 }
 0x2c4   :  { %v3086_v31 = vmul.f32 0.3, %v3067_v25  ;;  %v3295_v36 = vmul.f32 0.3, %v3277_v33 }
 0x2c5   :  { %v2671_v9 = vmul.f32 0.3, %v2653_v21  ;;  %v2879_v12 = vmul.f32 0.3, %v2861_v0 }
 0x2c6   :  { %v3100_v42 = vmax.f32 %v3067_v25, %v3086_v31  ;;  %v3309_v45 = vmax.f32 %v3277_v33, %v3295_v36 }
 0x2c7   :  { %v2685_v11 = vmax.f32 %v2653_v21, %v2671_v9  ;;  %v2893_v13 = vmax.f32 %v2861_v0, %v2879_v12 }
 0x2c8   :  { %v9688_v53 = vpack.c.bf16 %v3309_v45, %v3308_v43 }
 0x2c9   :  { %v9583_v18 = vpack.c.bf16 %v2685_v11, %v2684_v5  ;;  %v9618_v19 = vpack.c.bf16 %v2893_v13, %v2892_v6  ;;  %v3068_v29 = vpop.f32.mrf.mxu0  ;;  %v3279_v57 = vpop.f32.mrf.mxu1 }
 0x2ca   :  { %v2655_v23 = vpop.f32.mrf.mxu2  ;;  %v2863_v24 = vpop.f32.mrf.mxu3  ;;  %v3069_v49 = vadd.f32 %v11145_v16, %v3068_v29  ;;  %9777 = vst [vmem:[#allocation2 + $0x4e0] sm:$0xff] %v9688_v53   ;;  %v3280_v59 = vadd.f32 %v11150_v17, %v3279_v57 }
 0x2cb   :  { %9759 = vst [vmem:[#allocation2 + $0x3f0] sm:$0xff] %v9583_v18   ;;  %v2656_v27 = vadd.f32 %v11127_v8, %v2655_v23  ;;  %v2864_v28 = vadd.f32 %v11132_v44, %v2863_v24 }
 0x2cc   :  { %9765 = vst [vmem:[#allocation2 + $0x440] sm:$0xff] %v9618_v19   ;;  %v3087_v35 = vmul.f32 0.3, %v3069_v49  ;;  %v3296_v63 = vmul.f32 0.3, %v3280_v59 }
 0x2cd   :  { %v2672_v51 = vmul.f32 0.3, %v2656_v27  ;;  %v2880_v34 = vmul.f32 0.3, %v2864_v28 }
 0x2ce   :  { %v3101_v7 = vmax.f32 %v3069_v49, %v3087_v35  ;;  %v3310_v1 = vmax.f32 %v3280_v59, %v3296_v63 }
 0x2cf   :  { %v2686_v46 = vmax.f32 %v2656_v27, %v2672_v51  ;;  %v2894_v47 = vmax.f32 %v2864_v28, %v2880_v34 }
 0x2d0   :  { %v9653_v52 = vpack.c.bf16 %v3101_v7, %v3100_v42 }
 0x2d1   :  { %v3071_v56 = vpop.f32.mrf.mxu0  ;;  %v3281_v61 = vpop.f32.mrf.mxu1 }
 0x2d2   :  { %v2657_v37 = vpop.f32.mrf.mxu2  ;;  %v2865_v38 = vpop.f32.mrf.mxu3  ;;  %9771 = vst [vmem:[#allocation2 + $0x490] sm:$0xff] %v9653_v52   ;;  %v3282_v21 = vadd.f32 %v11150_v17, %v3281_v61 }
 0x2d3   :  { %v2658_v39 = vadd.f32 %v11127_v8, %v2657_v37  ;;  %v2866_v41 = vadd.f32 %v11132_v44, %v2865_v38  ;;  %v3072_v44 = vadd.f32 %v11145_v16, %v3071_v56 }
 0x2d4   :  { %v3297_v2 = vmul.f32 0.3, %v3282_v21 }
 0x2d5   :  { %v2673_v48 = vmul.f32 0.3, %v2658_v39  ;;  %v2881_v50 = vmul.f32 0.3, %v2866_v41  ;;  %v3088_v62 = vmul.f32 0.3, %v3072_v44 }
 0x2d6   :  { %v3311_v5 = vmax.f32 %v3282_v21, %v3297_v2 }
 0x2d7   :  { %v2687_v54 = vmax.f32 %v2658_v39, %v2673_v48  ;;  %v2895_v55 = vmax.f32 %v2866_v41, %v2881_v50  ;;  %v3102_v3 = vmax.f32 %v3072_v44, %v3088_v62 }
 0x2d8   :  { %v9693_v9 = vpack.c.bf16 %v3311_v5, %v3310_v1 }
 0x2d9   :  { %v9588_v58 = vpack.c.bf16 %v2687_v54, %v2686_v46  ;;  %v9623_v8 = vpack.c.bf16 %v2895_v55, %v2894_v47  ;;  %v3073_v60 = vpop.f32.mrf.mxu0 }
 0x2da   :  { %v3074_v20 = vadd.f32 %v11145_v16, %v3073_v60  ;;  %9778 = vst [vmem:[#allocation2 + $0x4e8] sm:$0xff] %v9693_v9  }
 0x2db   :  { %9760 = vst [vmem:[#allocation2 + $0x3f8] sm:$0xff] %v9588_v58  }
 0x2dc   :  { %9766 = vst [vmem:[#allocation2 + $0x448] sm:$0xff] %v9623_v8   ;;  %v3089_v0 = vmul.f32 0.3, %v3074_v20 }
 0x2de   :  { %v3103_v4 = vmax.f32 %v3074_v20, %v3089_v0 }
 0x2e0   :  { %v9658_v6 = vpack.c.bf16 %v3103_v4, %v3102_v3 }
 0x2e2   :  { %9772 = vst [vmem:[#allocation2 + $0x498] sm:$0xff] %v9658_v6  }
 0x2e3 LB: > { %v8996_v16 = vld [vmem:[%s11957_s3 + $0x78] sm:$0xff]  ;;  %v8995_v10 = vld [vmem:[%s11957_s3 + $0x70] sm:$0xff]  ;;  %v8994_v13 = vld [vmem:[%s11957_s3 + $0x68] sm:$0xff]  ;;  %s8964_s12 = smul.u32 160, %s9842_s24  ;;  %s9842_s24 = sphi %s11212_s24, %s3353_s24  }
 0x2e4   : > { %v11223_v17 = vld [vmem:[%s11957_s3 + $0xb8] sm:$0xff]  ;;  %3521 = vmatpush.bf16.msra.mxu0 %v8996_v16  ;;  %9787 = vmatpush.bf16.msra.mxu3 %v8996_v16  ;;  %v11238_v40 = vld [vmem:[%s11957_s3 + $0xb0] sm:$0xff]  ;;  %v11253_v14 = vld [vmem:[%s11957_s3 + $0xa8] sm:$0xff] }
 0x2e5   : > { %v11228_v12 = vld [vmem:[%s11957_s3 + $0x38] sm:$0xff]  ;;  %9803 = vmatpush.bf16.msra.mxu2 %v11223_v17  ;;  %v11243_v11 = vld [vmem:[%s11957_s3 + $0x30] sm:$0xff]  ;;  %v11258_v15 = vld [vmem:[%s11957_s3 + $0x28] sm:$0xff]  ;;  %s11337_s23 = scalar_lea.vmem [#allocation2], %s8964_s12 }
 0x2e6   : > { %9795 = vmatpush.bf16.msra.mxu1 %v11228_v12  ;;  %v8993_v18 = vld [vmem:[%s11957_s3 + $0x60] sm:$0xff]  ;;  %v8992_v23 = vld [vmem:[%s11957_s3 + $0x58] sm:$0xff]  ;;  %v8991_v26 = vld [vmem:[%s11957_s3 + $0x50] sm:$0xff] }
 0x2e7   : > { %v11268_v19 = vld [vmem:[%s11957_s3 + $0xa0] sm:$0xff]  ;;  %v11283_v24 = vld [vmem:[%s11957_s3 + $0x98] sm:$0xff]  ;;  %v11298_v27 = vld [vmem:[%s11957_s3 + $0x90] sm:$0xff] }
 0x2e8   : > { %3522 = vmatpush.bf16.msra.mxu0 %v8995_v10  ;;  %9788 = vmatpush.bf16.msra.mxu3 %v8995_v10  ;;  %v11273_v22 = vld [vmem:[%s11957_s3 + $0x20] sm:$0xff]  ;;  %v11288_v25 = vld [vmem:[%s11957_s3 + $0x18] sm:$0xff]  ;;  %v11303_v28 = vld [vmem:[%s11957_s3 + $0x10] sm:$0xff] }
 0x2e9   : > { %9804 = vmatpush.bf16.msra.mxu2 %v11238_v40  ;;  %v8990_v29 = vld [vmem:[%s11957_s3 + $0x48] sm:$0xff]  ;;  %v8989_v32 = vld [vmem:[%s11957_s3 + $0x40] sm:$0xff]  ;;  %v9028_v51 = vld [vmem:[%s11957_s3 + $0xf8] sm:$0xff] }
 0x2ea   : > { %9796 = vmatpush.bf16.msra.mxu1 %v11243_v11  ;;  %v11314_v30 = vld [vmem:[%s11957_s3 + $0x88] sm:$0xff]  ;;  %v11329_v49 = vld [vmem:[%s11957_s3 + $0x80] sm:$0xff]  ;;  %v8983_v35 = vld [vmem:[%s11337_s23 + $0x18] sm:$0xff] }
 0x2eb   : > { %v11319_v31 = vld [vmem:[%s11957_s3 + $0x8] sm:$0xff]  ;;  %v8973_v33 = vld [vmem:[%s11957_s3] sm:$0xff]  ;;  %v8967_v37 = vld [vmem:[%s11337_s23 + $0x10] sm:$0xff] }
 0x2ec   : > { %3523 = vmatpush.bf16.msra.mxu0 %v8994_v13  ;;  %9789 = vmatpush.bf16.msra.mxu3 %v8994_v13  ;;  %v8981_v34 = vld [vmem:[%s11337_s23 + $0x8] sm:$0xff]  ;;  %v8999_v36 = vld [vmem:[%s11337_s23 + $0x20] sm:$0xff]  ;;  %v9076_v38 = vld [vmem:[%s11957_s3 + $0x1b8] sm:$0xff] }
 0x2ed   : > { %9805 = vmatpush.bf16.msra.mxu2 %v11253_v14  ;;  %v9060_v39 = vld [vmem:[%s11957_s3 + $0x178] sm:$0xff]  ;;  %v9027_v41 = vld [vmem:[%s11957_s3 + $0xf0] sm:$0xff]  ;;  %v9026_v7 = vld [vmem:[%s11957_s3 + $0xe8] sm:$0xff] }
 0x2ee   : > { %9797 = vmatpush.bf16.msra.mxu1 %v11258_v15  ;;  %v9075_v42 = vld [vmem:[%s11957_s3 + $0x1b0] sm:$0xff]  ;;  %v9074_v45 = vld [vmem:[%s11957_s3 + $0x1a8] sm:$0xff]  ;;  %v9025_v47 = vld [vmem:[%s11957_s3 + $0xe0] sm:$0xff] }
 0x2ef   : > { %v9059_v43 = vld [vmem:[%s11957_s3 + $0x170] sm:$0xff]  ;;  %v9058_v46 = vld [vmem:[%s11957_s3 + $0x168] sm:$0xff]  ;;  %v9073_v48 = vld [vmem:[%s11957_s3 + $0x1a0] sm:$0xff] }
 0x2f0   : > { %3524 = vmatpush.bf16.msra.mxu0 %v8993_v18  ;;  %9790 = vmatpush.bf16.msra.mxu3 %v8993_v18  ;;  %v9057_v50 = vld [vmem:[%s11957_s3 + $0x160] sm:$0xff]  ;;  %v8982_v52 = vld [vmem:[%s11337_s23 + $0x10] sm:$0xff]  ;;  %v9000_v54 = vld [vmem:[%s11337_s23 + $0x28] sm:$0xff] }
 0x2f1   : > { %9806 = vmatpush.bf16.msra.mxu2 %v11268_v19  ;;  %v8984_v53 = vld [vmem:[%s11337_s23 + $0x20] sm:$0xff]  ;;  %v8968_v55 = vld [vmem:[%s11337_s23 + $0x18] sm:$0xff]  ;;  %v9023_v8 = vld [vmem:[%s11957_s3 + $0xd0] sm:$0xff] }
 0x2f2   : > { %9798 = vmatpush.bf16.msra.mxu1 %v11273_v22  ;;  %v9024_v56 = vld [vmem:[%s11957_s3 + $0xd8] sm:$0xff]  ;;  %v8985_v44 = vld [vmem:[%s11337_s23 + $0x28] sm:$0xff]  ;;  %v8965_v59 = vld [vmem:[%s11337_s23] sm:$0xff] }
 0x2f3   : > { %v9072_v57 = vld [vmem:[%s11957_s3 + $0x198] sm:$0xff]  ;;  %v9001_v60 = vld [vmem:[%s11337_s23 + $0x30] sm:$0xff]  ;;  %v8969_v61 = vld [vmem:[%s11337_s23 + $0x20] sm:$0xff] }
 0x2f4   : > { %3525 = vmatpush.bf16.msra.mxu0 %v8992_v23  ;;  %9791 = vmatpush.bf16.msra.mxu3 %v8992_v23  ;;  %v9056_v58 = vld [vmem:[%s11957_s3 + $0x158] sm:$0xff]  ;;  %v9071_v62 = vld [vmem:[%s11957_s3 + $0x190] sm:$0xff]  ;;  %v9022_v20 = vld [vmem:[%s11957_s3 + $0xc8] sm:$0xff] }
 0x2f5   : > { %9807 = vmatpush.bf16.msra.mxu2 %v11283_v24  ;;  %v9055_v63 = vld [vmem:[%s11957_s3 + $0x150] sm:$0xff]  ;;  %v9070_v21 = vld [vmem:[%s11957_s3 + $0x188] sm:$0xff]  ;;  %v9002_v3 = vld [vmem:[%s11337_s23 + $0x38] sm:$0xff] }
 0x2f6   : > { %9799 = vmatpush.bf16.msra.mxu1 %v11288_v25  ;;  %v8986_v0 = vld [vmem:[%s11337_s23 + $0x30] sm:$0xff]  ;;  %v8966_v2 = vld [vmem:[%s11337_s23 + $0x8] sm:$0xff]  ;;  %v9021_v5 = vld [vmem:[%s11957_s3 + $0xc0] sm:$0xff] }
 0x2f7   : > { %v8970_v1 = vld [vmem:[%s11337_s23 + $0x28] sm:$0xff]  ;;  %v9069_v6 = vld [vmem:[%s11957_s3 + $0x180] sm:$0xff]  ;;  %v9044_v9 = vld [vmem:[%s11957_s3 + $0x138] sm:$0xff] }
 0x2f8   : > { %3526 = vmatpush.bf16.msra.mxu0 %v8991_v26  ;;  %9792 = vmatpush.bf16.msra.mxu3 %v8991_v26  ;;  %v9054_v4 = vld [vmem:[%s11957_s3 + $0x148] sm:$0xff]  ;;  %v9053_v16 = vld [vmem:[%s11957_s3 + $0x140] sm:$0xff]  ;;  %v8997_v10 = vld [vmem:[%s11337_s23 + $0x10] sm:$0xff] }
 0x2f9   : > { %9808 = vmatpush.bf16.msra.mxu2 %v11298_v27  ;;  %v9042_v13 = vld [vmem:[%s11957_s3 + $0x128] sm:$0xff]  ;;  %v9124_v18 = vld [vmem:[%s11957_s3 + $0x278] sm:$0xff]  ;;  %v9039_v23 = vld [vmem:[%s11957_s3 + $0x110] sm:$0xff] }
 0x2fa   : > { %9800 = vmatpush.bf16.msra.mxu1 %v11303_v28  ;;  %v9004_v26 = vld [vmem:[%s11337_s23 + $0x48] sm:$0xff] }
 0x2fc   : > { %3527 = vmatpush.bf16.msra.mxu0 %v8990_v29  ;;  %9793 = vmatpush.bf16.msra.mxu3 %v8990_v29  ;;  %v9091_v29 = vld [vmem:[%s11957_s3 + $0x1f0] sm:$0xff] }
 0x2fd   : > { %9809 = vmatpush.bf16.msra.mxu2 %v11314_v30 }
 0x2fe   : > { %9801 = vmatpush.bf16.msra.mxu1 %v11319_v31 }
 0x300   : > { %3528 = vmatpush.bf16.msra.mxu0 %v8989_v32  ;;  %9794 = vmatpush.bf16.msra.mxu3 %v8989_v32  ;;  %v9037_v32 = vld [vmem:[%s11957_s3 + $0x100] sm:$0xff] }
 0x301   : > { %9810 = vmatpush.bf16.msra.mxu2 %v11329_v49 }
 0x302   : > { %9802 = vmatpush.bf16.msra.mxu1 %v8973_v33 }
 0x303   : > { %3529 = vmatmul.bf16.vlgmr.msra.gmra.mxu0 %v8981_v34  ;;  %3539 = vmatmul.bf16.vlgmr.msra.gmra.mxu3 %v8983_v35  ;;  %v9029_v34 = vld [vmem:[%s11337_s23 + $0x58] sm:$0xff]  ;;  %v9061_v35 = vld [vmem:[%s11337_s23 + $0xa0] sm:$0xff] }
 0x304   : > { %4044 = vmatpush.bf16.msrb.mxu3 %v9028_v51  ;;  %3666 = vmatpush.bf16.msrb.mxu0 %v11228_v12  ;;  %v8987_v12 = vld [vmem:[%s11337_s23 + $0x38] sm:$0xff]  ;;  %v9013_v51 = vld [vmem:[%s11337_s23 + $0x50] sm:$0xff] }
 0x305   : > { %3865 = vmatmul.bf16.vlgmr.msra.gmra.mxu2 %v8999_v36  ;;  %3684 = vmatmul.bf16.vlgmr.msra.gmra.mxu1 %v8967_v37  ;;  %v9045_v36 = vld [vmem:[%s11337_s23 + $0x60] sm:$0xff]  ;;  %v9090_v37 = vld [vmem:[%s11957_s3 + $0x1e8] sm:$0xff] }
 0x306   : > { %4636 = vmatpush.bf16.msrb.mxu2 %v9076_v38  ;;  %4438 = vmatpush.bf16.msrb.mxu1 %v9060_v39  ;;  %v9138_v38 = vld [vmem:[%s11957_s3 + $0x2a8] sm:$0xff] }
 0x307   : > { %v9106_v39 = vld [vmem:[%s11957_s3 + $0x228] sm:$0xff] }
 0x308   : > { %3667 = vmatpush.bf16.msrb.mxu0 %v11243_v11  ;;  %4045 = vmatpush.bf16.msrb.mxu3 %v9027_v41  ;;  %v8971_v11 = vld [vmem:[%s11337_s23 + $0x30] sm:$0xff]  ;;  %v9122_v41 = vld [vmem:[%s11957_s3 + $0x268] sm:$0xff] }
 0x30a   : > { %4637 = vmatpush.bf16.msrb.mxu2 %v9075_v42  ;;  %4439 = vmatpush.bf16.msrb.mxu1 %v9059_v43  ;;  %v9014_v42 = vld [vmem:[%s11337_s23 + $0x58] sm:$0xff]  ;;  %v9030_v43 = vld [vmem:[%s11337_s23 + $0x60] sm:$0xff] }
 0x30c   : > { %3668 = vmatpush.bf16.msrb.mxu0 %v11258_v15  ;;  %4046 = vmatpush.bf16.msrb.mxu3 %v9026_v7  ;;  %v9140_v15 = vld [vmem:[%s11957_s3 + $0x2b8] sm:$0xff]  ;;  %v9062_v7 = vld [vmem:[%s11337_s23 + $0xa8] sm:$0xff] }
 0x30e   : > { %4638 = vmatpush.bf16.msrb.mxu2 %v9074_v45  ;;  %4440 = vmatpush.bf16.msrb.mxu1 %v9058_v46  ;;  %v9046_v45 = vld [vmem:[%s11337_s23 + $0x68] sm:$0xff]  ;;  %v9089_v46 = vld [vmem:[%s11957_s3 + $0x1e0] sm:$0xff] }
 0x310   : > { %3669 = vmatpush.bf16.msrb.mxu0 %v11273_v22  ;;  %4047 = vmatpush.bf16.msrb.mxu3 %v9025_v47  ;;  %v9040_v22 = vld [vmem:[%s11957_s3 + $0x118] sm:$0xff]  ;;  %v9137_v47 = vld [vmem:[%s11957_s3 + $0x2a0] sm:$0xff] }
 0x312   : > { %4639 = vmatpush.bf16.msrb.mxu2 %v9073_v48  ;;  %4441 = vmatpush.bf16.msrb.mxu1 %v9057_v50  ;;  %v9105_v48 = vld [vmem:[%s11957_s3 + $0x220] sm:$0xff] }
 0x313   : > { %3534 = vmatmul.bf16.gmra.mxu0 %v8982_v52  ;;  %3544 = vmatmul.bf16.gmra.mxu3 %v8984_v53  ;;  %v9121_v50 = vld [vmem:[%s11957_s3 + $0x260] sm:$0xff]  ;;  %v9031_v53 = vld [vmem:[%s11337_s23 + $0x68] sm:$0xff] }
 0x314   : > { %3670 = vmatpush.bf16.msrb.mxu0 %v11288_v25  ;;  %4048 = vmatpush.bf16.msrb.mxu3 %v9024_v56  ;;  %v8998_v25 = vld [vmem:[%s11337_s23 + $0x18] sm:$0xff]  ;;  %v9015_v52 = vld [vmem:[%s11337_s23 + $0x60] sm:$0xff]  ;;  %v9047_v56 = vld [vmem:[%s11337_s23 + $0x70] sm:$0xff] }
 0x315   : > { %3870 = vmatmul.bf16.gmra.mxu2 %v9000_v54  ;;  %3689 = vmatmul.bf16.gmra.mxu1 %v8968_v55  ;;  %v9063_v55 = vld [vmem:[%s11337_s23 + $0xb0] sm:$0xff] }
 0x316   : > { %4640 = vmatpush.bf16.msrb.mxu2 %v9072_v57  ;;  %4442 = vmatpush.bf16.msrb.mxu1 %v9056_v58  ;;  %v9088_v58 = vld [vmem:[%s11957_s3 + $0x1d8] sm:$0xff] }
 0x318   : > { %3671 = vmatpush.bf16.msrb.mxu0 %v11303_v28  ;;  %4049 = vmatpush.bf16.msrb.mxu3 %v9023_v8  ;;  %v9038_v28 = vld [vmem:[%s11957_s3 + $0x108] sm:$0xff] }
 0x31a   : > { %4641 = vmatpush.bf16.msrb.mxu2 %v9071_v62  ;;  %4443 = vmatpush.bf16.msrb.mxu1 %v9055_v63  ;;  %v9136_v63 = vld [vmem:[%s11957_s3 + $0x298] sm:$0xff] }
 0x31c   : > { %3672 = vmatpush.bf16.msrb.mxu0 %v11319_v31  ;;  %4050 = vmatpush.bf16.msrb.mxu3 %v9022_v20  ;;  %v9123_v31 = vld [vmem:[%s11957_s3 + $0x270] sm:$0xff]  ;;  %v9104_v20 = vld [vmem:[%s11957_s3 + $0x218] sm:$0xff] }
 0x31e   : > { %4642 = vmatpush.bf16.msrb.mxu2 %v9070_v21  ;;  %4444 = vmatpush.bf16.msrb.mxu1 %v9054_v4  ;;  %v9120_v21 = vld [vmem:[%s11957_s3 + $0x258] sm:$0xff]  ;;  %v9032_v4 = vld [vmem:[%s11337_s23 + $0x70] sm:$0xff] }
 0x320   : > { %3673 = vmatpush.bf16.msrb.mxu0 %v8973_v33  ;;  %4051 = vmatpush.bf16.msrb.mxu3 %v9021_v5  ;;  %v9107_v33 = vld [vmem:[%s11957_s3 + $0x230] sm:$0xff] }
 0x322   : > { %4643 = vmatpush.bf16.msrb.mxu2 %v9069_v6  ;;  %4445 = vmatpush.bf16.msrb.mxu1 %v9053_v16  ;;  %v9064_v6 = vld [vmem:[%s11337_s23 + $0xb8] sm:$0xff] }
 0x323   : > { %3549 = vmatmul.bf16.gmra.mxu3 %v8985_v44  ;;  %3674 = vmatmul.bf16.vlgmr.msrb.gmra.mxu0 %v8965_v59 }
 0x324   : > { %3847 = vmatpush.bf16.msra.mxu0 %v11223_v17  ;;  %v9043_v17 = vld [vmem:[%s11957_s3 + $0x130] sm:$0xff] }
 0x325   : > { %3875 = vmatmul.bf16.gmra.mxu2 %v9001_v60  ;;  %3694 = vmatmul.bf16.gmra.mxu1 %v8969_v61 }
 0x326   : > { %5424 = vmatpush.bf16.msra.mxu2 %v9140_v15  ;;  %5227 = vmatpush.bf16.msra.mxu1 %v9124_v18  ;;  %v9135_v18 = vld [vmem:[%s11957_s3 + $0x290] sm:$0xff] }
 0x328   : > { %3848 = vmatpush.bf16.msra.mxu0 %v11238_v40  ;;  %v9003_v40 = vld [vmem:[%s11337_s23 + $0x40] sm:$0xff] }
 0x32a   : > { %5228 = vmatpush.bf16.msra.mxu1 %v9123_v31 }
 0x32c   : > { %3849 = vmatpush.bf16.msra.mxu0 %v11253_v14  ;;  %v9092_v14 = vld [vmem:[%s11957_s3 + $0x1f8] sm:$0xff] }
 0x32d   : > { %4833 = vmatpush.bf16.msra.mxu3 %v9092_v14 }
 0x32e   : > { %5229 = vmatpush.bf16.msra.mxu1 %v9122_v41  ;;  %v9134_v41 = vld [vmem:[%s11957_s3 + $0x288] sm:$0xff] }
 0x330   : > { %3850 = vmatpush.bf16.msra.mxu0 %v11268_v19  ;;  %v9041_v19 = vld [vmem:[%s11957_s3 + $0x120] sm:$0xff] }
 0x331   : > { %4834 = vmatpush.bf16.msra.mxu3 %v9091_v29  ;;  %v9065_v29 = vld [vmem:[%s11337_s23 + $0xc0] sm:$0xff] }
 0x332   : > { %5230 = vmatpush.bf16.msra.mxu1 %v9121_v50 }
 0x333   : > { %3554 = vmatmul.bf16.gmra.mxu3 %v8986_v0  ;;  %3679 = vmatmul.bf16.gmra.mxu0 %v8966_v2 }
 0x334   : > { %3851 = vmatpush.bf16.msra.mxu0 %v11283_v24  ;;  %v8988_v24 = vld [vmem:[%s11337_s23 + $0x40] sm:$0xff] }
 0x335   : > { %3880 = vmatmul.bf16.gmra.mxu2 %v9002_v3  ;;  %3699 = vmatmul.bf16.gmra.mxu1 %v8970_v1  ;;  %v9016_v1 = vld [vmem:[%s11337_s23 + $0x68] sm:$0xff] }
 0x336   : > { %4835 = vmatpush.bf16.msra.mxu3 %v9090_v37  ;;  %5231 = vmatpush.bf16.msra.mxu1 %v9120_v21  ;;  %v9101_v21 = vld [vmem:[%s11957_s3 + $0x200] sm:$0xff] }
 0x338   : > { %3852 = vmatpush.bf16.msra.mxu0 %v11298_v27  ;;  %v8972_v27 = vld [vmem:[%s11337_s23 + $0x38] sm:$0xff] }
 0x33a   : > { %4836 = vmatpush.bf16.msra.mxu3 %v9089_v46 }
 0x33c   : > { %3853 = vmatpush.bf16.msra.mxu0 %v11314_v30  ;;  %v9139_v30 = vld [vmem:[%s11957_s3 + $0x2b0] sm:$0xff] }
 0x33d   : > { %5425 = vmatpush.bf16.msra.mxu2 %v9139_v30  ;;  %v9049_v30 = vld [vmem:[%s11337_s23 + $0x80] sm:$0xff] }
 0x33e   : > { %4837 = vmatpush.bf16.msra.mxu3 %v9088_v58 }
 0x340   : > { %3854 = vmatpush.bf16.msra.mxu0 %v11329_v49  ;;  %v9108_v49 = vld [vmem:[%s11957_s3 + $0x238] sm:$0xff] }
 0x341   : > { %5426 = vmatpush.bf16.msra.mxu2 %v9138_v38 }
 0x343   : > { %3559 = vmatmul.bf16.gmra.mxu3 %v8987_v12  ;;  %3855 = vmatmul.bf16.vlgmr.msra.gmra.mxu0 %v8997_v10  ;;  %v9087_v12 = vld [vmem:[%s11957_s3 + $0x1d0] sm:$0xff] }
 0x344   : > { %4241 = vmatpush.bf16.msrb.mxu0 %v9044_v9  ;;  %v9048_v9 = vld [vmem:[%s11337_s23 + $0x78] sm:$0xff]  ;;  %4838 = vmatpush.bf16.msra.mxu3 %v9087_v12 }
 0x345   : > { %3885 = vmatmul.bf16.gmra.mxu2 %v9003_v40  ;;  %3704 = vmatmul.bf16.gmra.mxu1 %v8971_v11 }
 0x346   : > { %5427 = vmatpush.bf16.msra.mxu2 %v9137_v47  ;;  %v9018_v47 = vld [vmem:[%s11337_s23 + $0x78] sm:$0xff] }
 0x348   : > { %4242 = vmatpush.bf16.msrb.mxu0 %v9043_v17 }
 0x34a   : > { %5428 = vmatpush.bf16.msra.mxu2 %v9136_v63 }
 0x34c   : > { %4243 = vmatpush.bf16.msrb.mxu0 %v9042_v13 }
 0x34e   : > { %5429 = vmatpush.bf16.msra.mxu2 %v9135_v18 }
 0x350   : > { %4244 = vmatpush.bf16.msrb.mxu0 %v9041_v19  ;;  %v9103_v19 = vld [vmem:[%s11957_s3 + $0x210] sm:$0xff] }
 0x352   : > { %5430 = vmatpush.bf16.msra.mxu2 %v9134_v41 }
 0x353   : > { %3564 = vmatmul.bf16.gmra.mxu3 %v8988_v24  ;;  %3860 = vmatmul.bf16.gmra.mxu0 %v8998_v25 }
 0x354   : > { %4245 = vmatpush.bf16.msrb.mxu0 %v9040_v22  ;;  %v9119_v22 = vld [vmem:[%s11957_s3 + $0x250] sm:$0xff] }
 0x355   : > { %3890 = vmatmul.bf16.gmra.mxu2 %v9004_v26  ;;  %3709 = vmatmul.bf16.gmra.mxu1 %v8972_v27  ;;  %v9017_v26 = vld [vmem:[%s11337_s23 + $0x70] sm:$0xff]  ;;  %v9033_v27 = vld [vmem:[%s11337_s23 + $0x78] sm:$0xff] }
 0x356   : > { %5232 = vmatpush.bf16.msra.mxu1 %v9119_v22 }
 0x358   : > { %4246 = vmatpush.bf16.msrb.mxu0 %v9039_v23 }
 0x35c   : > { %4247 = vmatpush.bf16.msrb.mxu0 %v9038_v28 }
 0x360   : > { %4248 = vmatpush.bf16.msrb.mxu0 %v9037_v32 }
 0x363   : > { %4052 = vmatmul.bf16.vlgmr.msrb.gmra.mxu3 %v9013_v51  ;;  %4249 = vmatmul.bf16.vlgmr.msrb.gmra.mxu0 %v9029_v34 }
 0x364   : > { %5030 = vmatpush.bf16.msra.mxu0 %v9108_v49 }
 0x365   : > { %4644 = vmatmul.bf16.vlgmr.msrb.gmra.mxu2 %v9061_v35  ;;  %4446 = vmatmul.bf16.vlgmr.msrb.gmra.mxu1 %v9045_v36 }
 0x368   : > { %5031 = vmatpush.bf16.msra.mxu0 %v9107_v33  ;;  %v9086_v33 = vld [vmem:[%s11957_s3 + $0x1c8] sm:$0xff] }
 0x369   : > { %4839 = vmatpush.bf16.msra.mxu3 %v9086_v33 }
 0x36c   : > { %5032 = vmatpush.bf16.msra.mxu0 %v9106_v39 }
 0x370   : > { %5033 = vmatpush.bf16.msra.mxu0 %v9105_v48  ;;  %v9034_v48 = vld [vmem:[%s11337_s23 + $0x80] sm:$0xff] }
 0x373   : > { %4057 = vmatmul.bf16.gmra.mxu3 %v9014_v42  ;;  %4254 = vmatmul.bf16.gmra.mxu0 %v9030_v43  ;;  %v9102_v42 = vld [vmem:[%s11957_s3 + $0x208] sm:$0xff] }
 0x374   : > { %5034 = vmatpush.bf16.msra.mxu0 %v9104_v20  ;;  %v9118_v43 = vld [vmem:[%s11957_s3 + $0x248] sm:$0xff]  ;;  %v9133_v20 = vld [vmem:[%s11957_s3 + $0x280] sm:$0xff] }
 0x375   : > { %4649 = vmatmul.bf16.gmra.mxu2 %v9062_v7  ;;  %4451 = vmatmul.bf16.gmra.mxu1 %v9046_v45 }
 0x376   : > { %5233 = vmatpush.bf16.msra.mxu1 %v9118_v43  ;;  %5431 = vmatpush.bf16.msra.mxu2 %v9133_v20  ;;  %v9154_v20 = vld [vmem:[%s11957_s3 + $0x2e8] sm:$0xff] }
 0x378   : > { %5035 = vmatpush.bf16.msra.mxu0 %v9103_v19 }
 0x37c   : > { %5036 = vmatpush.bf16.msra.mxu0 %v9102_v42 }
 0x380   : > { %v3530_v54 = vpop.f32.mrf.mxu0  ;;  %5037 = vmatpush.bf16.msra.mxu0 %v9101_v21 }
 0x382   : > { %v3685_v57 = vpop.f32.mrf.mxu1 }
 0x383   : > { %4062 = vmatmul.bf16.gmra.mxu3 %v9015_v52  ;;  %4259 = vmatmul.bf16.gmra.mxu0 %v9031_v53  ;;  %v9066_v52 = vld [vmem:[%s11337_s23 + $0xc8] sm:$0xff] }
 0x384   : > { %v9050_v53 = vld [vmem:[%s11337_s23 + $0x88] sm:$0xff] }
 0x385   : > { %4654 = vmatmul.bf16.gmra.mxu2 %v9063_v55  ;;  %4456 = vmatmul.bf16.gmra.mxu1 %v9047_v56 }
 0x386   : > { %v3540_v8 = vpop.f32.mrf.mxu3 }
 0x387   : > { %v3686_v44 = vadd.f32 %v3685_v57, %v3540_v8  ;;  %v9085_v57 = vld [vmem:[%s11957_s3 + $0x1c0] sm:$0xff] }
 0x388   : > { %v3866_v59 = vpop.f32.mrf.mxu2  ;;  %v3532_v60 = vpop.f32.mrf.mxu0  ;;  %4840 = vmatpush.bf16.msra.mxu3 %v9085_v57  ;;  %v9077_v57 = vld [vmem:[%s11337_s23 + $0xa8] sm:$0xff] }
 0x389   : > { %v11535_v61 = vadd.f32 %v3866_v59, %v3686_v44 }
 0x38a   : > { %v3687_v62 = vpop.f32.mrf.mxu1 }
 0x38e   : > { %v3542_v0 = vpop.f32.mrf.mxu3 }
 0x38f   : > { %v3688_v2 = vadd.f32 %v3687_v62, %v3542_v0  ;;  %v9117_v0 = vld [vmem:[%s11957_s3 + $0x240] sm:$0xff] }
 0x390   : > { %v3868_v3 = vpop.f32.mrf.mxu2  ;;  %v3535_v5 = vpop.f32.mrf.mxu0  ;;  %5234 = vmatpush.bf16.msra.mxu1 %v9117_v0 }
 0x391   : > { %v11550_v16 = vadd.f32 %v3868_v3, %v3688_v2 }
 0x392   : > { %v3690_v17 = vpop.f32.mrf.mxu1 }
 0x393   : > { %4067 = vmatmul.bf16.gmra.mxu3 %v9016_v1  ;;  %4264 = vmatmul.bf16.gmra.mxu0 %v9032_v4  ;;  %v9019_v4 = vld [vmem:[%s11337_s23 + $0x80] sm:$0xff] }
 0x395   : > { %4659 = vmatmul.bf16.gmra.mxu2 %v9064_v6  ;;  %4461 = vmatmul.bf16.gmra.mxu1 %v9048_v9  ;;  %v9067_v9 = vld [vmem:[%s11337_s23 + $0xd0] sm:$0xff] }
 0x396   : > { %v3545_v10 = vpop.f32.mrf.mxu3 }
 0x397   : > { %v3691_v40 = vadd.f32 %v3690_v17, %v3545_v10  ;;  %v9051_v17 = vld [vmem:[%s11337_s23 + $0x90] sm:$0xff] }
 0x398   : > { %v3871_v11 = vpop.f32.mrf.mxu2  ;;  %v3537_v13 = vpop.f32.mrf.mxu0 }
 0x399   : > { %v11555_v14 = vadd.f32 %v3871_v11, %v3691_v40  ;;  %v9156_v11 = vld [vmem:[%s11957_s3 + $0x2f8] sm:$0xff] }
 0x39a   : > { %v3692_v15 = vpop.f32.mrf.mxu1  ;;  %5621 = vmatpush.bf16.msrb.mxu3 %v9156_v11 }
 0x39e   : > { %v3547_v23 = vpop.f32.mrf.mxu3 }
 0x39f   : > { %v3693_v24 = vadd.f32 %v3692_v15, %v3547_v23 }
 0x3a0   : > { %v3873_v25 = vpop.f32.mrf.mxu2  ;;  %v3675_v28 = vpop.f32.mrf.mxu0 }
 0x3a1   : > { %v11570_v31 = vadd.f32 %v3873_v25, %v3693_v24  ;;  %v3676_v32 = vadd.f32 %v3675_v28, %v3530_v54  ;;  %v9204_v25 = vld [vmem:[%s11957_s3 + $0x3b8] sm:$0xff] }
 0x3a2   : > { %v3695_v49 = vpop.f32.mrf.mxu1  ;;  %6213 = vmatpush.bf16.msrb.mxu2 %v9204_v25  ;;  %v9110_v25 = vld [vmem:[%s11337_s23 + $0xf8] sm:$0xff] }
 0x3a3   : > { %4072 = vmatmul.bf16.gmra.mxu3 %v9017_v26  ;;  %4269 = vmatmul.bf16.gmra.mxu0 %v9033_v27  ;;  %v9172_v26 = vld [vmem:[%s11957_s3 + $0x338] sm:$0xff] }
 0x3a4   : > { %v9188_v27 = vld [vmem:[%s11957_s3 + $0x378] sm:$0xff]  ;;  %5819 = vmatpush.bf16.msrb.mxu0 %v9172_v26 }
 0x3a5   : > { %4664 = vmatmul.bf16.gmra.mxu2 %v9065_v29  ;;  %4466 = vmatmul.bf16.gmra.mxu1 %v9049_v30 }
 0x3a6   : > { %v3550_v51 = vpop.f32.mrf.mxu3  ;;  %6016 = vmatpush.bf16.msrb.mxu1 %v9188_v27 }
 0x3a7   : > { %v3696_v34 = vadd.f32 %v3695_v49, %v3550_v51  ;;  %v9036_v49 = vld [vmem:[%s11337_s23 + $0x90] sm:$0xff]  ;;  %v9068_v51 = vld [vmem:[%s11337_s23 + $0xd8] sm:$0xff] }
 0x3a8   : > { %v3876_v35 = vpop.f32.mrf.mxu2  ;;  %v3677_v36 = vpop.f32.mrf.mxu0 }
 0x3a9   : > { %v11575_v37 = vadd.f32 %v3876_v35, %v3696_v34  ;;  %v3678_v38 = vadd.f32 %v3677_v36, %v3532_v60  ;;  %v9052_v34 = vld [vmem:[%s11337_s23 + $0x98] sm:$0xff] }
 0x3aa   : > { %v3697_v39 = vpop.f32.mrf.mxu1 }
 0x3ae   : > { %v3552_v7 = vpop.f32.mrf.mxu3 }
 0x3af   : > { %v3698_v45 = vadd.f32 %v3697_v39, %v3552_v7  ;;  %v9155_v39 = vld [vmem:[%s11957_s3 + $0x2f0] sm:$0xff] }
 0x3b0   : > { %v3878_v46 = vpop.f32.mrf.mxu2  ;;  %v3680_v50 = vpop.f32.mrf.mxu0  ;;  %5622 = vmatpush.bf16.msrb.mxu3 %v9155_v39 }
 0x3b1   : > { %v11590_v54 = vadd.f32 %v3878_v46, %v3698_v45  ;;  %v3681_v55 = vadd.f32 %v3680_v50, %v3535_v5  ;;  %v9035_v5 = vld [vmem:[%s11337_s23 + $0x88] sm:$0xff]  ;;  %v9171_v50 = vld [vmem:[%s11957_s3 + $0x330] sm:$0xff] }
 0x3b2   : > { %v3700_v56 = vpop.f32.mrf.mxu1  ;;  %5820 = vmatpush.bf16.msrb.mxu0 %v9171_v50  ;;  %v9095_v50 = vld [vmem:[%s11337_s23 + $0xc0] sm:$0xff] }
 0x3b3   : > { %4077 = vmatmul.bf16.gmra.mxu3 %v9018_v47  ;;  %4274 = vmatmul.bf16.gmra.mxu0 %v9034_v48  ;;  %v9203_v48 = vld [vmem:[%s11957_s3 + $0x3b0] sm:$0xff] }
 0x3b4   : > { %6214 = vmatpush.bf16.msrb.mxu2 %v9203_v48  ;;  %5623 = vmatpush.bf16.msrb.mxu3 %v9154_v20  ;;  %v9079_v48 = vld [vmem:[%s11337_s23 + $0xb8] sm:$0xff] }
 0x3b5   : > { %4669 = vmatmul.bf16.gmra.mxu2 %v9066_v52  ;;  %4471 = vmatmul.bf16.gmra.mxu1 %v9050_v53  ;;  %v9187_v52 = vld [vmem:[%s11957_s3 + $0x370] sm:$0xff] }
 0x3b6   : > { %v3555_v58 = vpop.f32.mrf.mxu3  ;;  %6017 = vmatpush.bf16.msrb.mxu1 %v9187_v52 }
 0x3b7   : > { %v3701_v8 = vadd.f32 %v3700_v56, %v3555_v58  ;;  %v9093_v58 = vld [vmem:[%s11337_s23 + $0xb0] sm:$0xff] }
 0x3b8   : > { %v3881_v44 = vpop.f32.mrf.mxu2  ;;  %v3682_v59 = vpop.f32.mrf.mxu0 }
 0x3b9   : > { %v11595_v60 = vadd.f32 %v3881_v44, %v3701_v8  ;;  %v3683_v62 = vadd.f32 %v3682_v59, %v3537_v13  ;;  %v9125_v44 = vld [vmem:[%s11337_s23 + $0xf8] sm:$0xff]  ;;  %v9109_v59 = vld [vmem:[%s11337_s23 + $0xf0] sm:$0xff] }
 0x3ba   : > { %v3702_v63 = vpop.f32.mrf.mxu1 }
 0x3be   : > { %v3557_v2 = vpop.f32.mrf.mxu3 }
 0x3bf   : > { %v3703_v3 = vadd.f32 %v3702_v63, %v3557_v2 }
 0x3c0   : > { %v3883_v1 = vpop.f32.mrf.mxu2  ;;  %v3856_v6 = vpop.f32.mrf.mxu0 }
 0x3c1   : > { %v11610_v12 = vadd.f32 %v3883_v1, %v3703_v3  ;;  %v11612_v10 = vadd.f32 %v3856_v6, %v3676_v32  ;;  %v9020_v32 = vld [vmem:[%s11337_s23 + $0x88] sm:$0xff] }
 0x3c2   : > { %v3705_v40 = vpop.f32.mrf.mxu1 }
 0x3c3   : > { %4082 = vmatmul.bf16.gmra.mxu3 %v9019_v4  ;;  %4279 = vmatmul.bf16.gmra.mxu0 %v9035_v5 }
 0x3c5   : > { %4674 = vmatmul.bf16.gmra.mxu2 %v9067_v9  ;;  %4476 = vmatmul.bf16.gmra.mxu1 %v9051_v17  ;;  %v9202_v9 = vld [vmem:[%s11957_s3 + $0x3a8] sm:$0xff] }
 0x3c6   : > { %v3560_v13 = vpop.f32.mrf.mxu3  ;;  %v9170_v17 = vld [vmem:[%s11957_s3 + $0x328] sm:$0xff]  ;;  %6215 = vmatpush.bf16.msrb.mxu2 %v9202_v9 }
 0x3c7   : > { %v3706_v15 = vadd.f32 %v3705_v40, %v3560_v13  ;;  %5821 = vmatpush.bf16.msrb.mxu0 %v9170_v17 }
 0x3c8   : > { %v3886_v18 = vpop.f32.mrf.mxu2  ;;  %v3858_v19 = vpop.f32.mrf.mxu0 }
 0x3c9   : > { %v11617_v22 = vadd.f32 %v3886_v18, %v3706_v15  ;;  %v11619_v23 = vadd.f32 %v3858_v19, %v3678_v38  ;;  %v9078_v15 = vld [vmem:[%s11337_s23 + $0xb0] sm:$0xff]  ;;  %v9094_v18 = vld [vmem:[%s11337_s23 + $0xb8] sm:$0xff] }
 0x3ca   : > { %v3707_v24 = vpop.f32.mrf.mxu1 }
 0x3ce   : > { %v3562_v28 = vpop.f32.mrf.mxu3 }
 0x3cf   : > { %v3708_v29 = vadd.f32 %v3707_v24, %v3562_v28  ;;  %v9126_v24 = vld [vmem:[%s11337_s23 + $0x100] sm:$0xff] }
 0x3d0   : > { %v3888_v30 = vpop.f32.mrf.mxu2  ;;  %v3861_v33 = vpop.f32.mrf.mxu0 }
 0x3d1   : > { %v11634_v35 = vadd.f32 %v3888_v30, %v3708_v29  ;;  %v11636_v36 = vadd.f32 %v3861_v33, %v3681_v55 }
 0x3d2   : > { %v3710_v38 = vpop.f32.mrf.mxu1 }
 0x3d3   : > { %4087 = vmatmul.bf16.gmra.mxu3 %v9020_v32  ;;  %4284 = vmatmul.bf16.gmra.mxu0 %v9036_v49 }
 0x3d5   : > { %4679 = vmatmul.bf16.gmra.mxu2 %v9068_v51  ;;  %4481 = vmatmul.bf16.gmra.mxu1 %v9052_v34 }
 0x3d6   : > { %v3565_v41 = vpop.f32.mrf.mxu3 }
 0x3d7   : > { %v3711_v42 = vadd.f32 %v3710_v38, %v3565_v41  ;;  %v9201_v41 = vld [vmem:[%s11957_s3 + $0x3a0] sm:$0xff] }
 0x3d8   : > { %v3891_v43 = vpop.f32.mrf.mxu2  ;;  %v3863_v7 = vpop.f32.mrf.mxu0  ;;  %6216 = vmatpush.bf16.msrb.mxu2 %v9201_v41 }
 0x3d9   : > { %v11641_v45 = vadd.f32 %v3891_v43, %v3711_v42  ;;  %v11643_v46 = vadd.f32 %v3863_v7, %v3683_v62  ;;  %v9169_v42 = vld [vmem:[%s11957_s3 + $0x320] sm:$0xff] }
 0x3da   : > { %v3712_v47 = vpop.f32.mrf.mxu1  ;;  %5822 = vmatpush.bf16.msrb.mxu0 %v9169_v42 }
 0x3de   : > { %v3567_v53 = vpop.f32.mrf.mxu3 }
 0x3df   : > { %v3713_v55 = vadd.f32 %v3712_v47, %v3567_v53  ;;  %v9127_v53 = vld [vmem:[%s11337_s23 + $0x108] sm:$0xff] }
 0x3e0   : > { %v3893_v56 = vpop.f32.mrf.mxu2  ;;  %v4250_v8 = vpop.f32.mrf.mxu0 }
 0x3e1   : > { %v11658_v62 = vadd.f32 %v3893_v56, %v3713_v55  ;;  %v9111_v55 = vld [vmem:[%s11337_s23 + $0x100] sm:$0xff] }
 0x3e2   : > { %v4447_v63 = vpop.f32.mrf.mxu1 }
 0x3e3   : > { %4841 = vmatmul.bf16.vlgmr.msra.gmra.mxu3 %v9077_v57  ;;  %5038 = vmatmul.bf16.vlgmr.msra.gmra.mxu0 %v9093_v58 }
 0x3e5   : > { %5432 = vmatmul.bf16.vlgmr.msra.gmra.mxu2 %v9125_v44  ;;  %5235 = vmatmul.bf16.vlgmr.msra.gmra.mxu1 %v9109_v59 }
 0x3e6   : > { %v4053_v21 = vpop.f32.mrf.mxu3 }
 0x3e7   : > { %v4093_v0 = vadd.f32 %v4053_v21, %v11612_v10  ;;  %v9186_v10 = vld [vmem:[%s11957_s3 + $0x368] sm:$0xff] }
 0x3e8   : > { %v4645_v2 = vpop.f32.mrf.mxu2  ;;  %v4252_v3 = vpop.f32.mrf.mxu0  ;;  %6018 = vmatpush.bf16.msrb.mxu1 %v9186_v10  ;;  %v9080_v10 = vld [vmem:[%s11337_s23 + $0xc0] sm:$0xff] }
 0x3e9   : > { %v4290_v1 = vadd.f32 %v4250_v8, %v4093_v0 }
 0x3ea   : > { %v4449_v4 = vpop.f32.mrf.mxu1 }
 0x3eb   : > { %v4487_v5 = vadd.f32 %v4447_v63, %v4290_v1  ;;  %v9200_v1 = vld [vmem:[%s11957_s3 + $0x398] sm:$0xff] }
 0x3ec   : > { %6217 = vmatpush.bf16.msrb.mxu2 %v9200_v1 }
 0x3ed   : > { %v11664_v6 = vadd.f32 %v4645_v2, %v4487_v5 }
 0x3ee   : > { %v4055_v40 = vpop.f32.mrf.mxu3 }
 0x3ef   : > { %v4094_v11 = vadd.f32 %v4055_v40, %v11619_v23  ;;  %v9153_v23 = vld [vmem:[%s11957_s3 + $0x2e0] sm:$0xff]  ;;  %v9096_v40 = vld [vmem:[%s11337_s23 + $0xc8] sm:$0xff] }
 0x3f0   : > { %v4647_v13 = vpop.f32.mrf.mxu2  ;;  %v4255_v19 = vpop.f32.mrf.mxu0  ;;  %5624 = vmatpush.bf16.msrb.mxu3 %v9153_v23 }
 0x3f1   : > { %v4291_v26 = vadd.f32 %v4252_v3, %v4094_v11 }
 0x3f2   : > { %v4452_v27 = vpop.f32.mrf.mxu1 }
 0x3f3   : > { %v4488_v28 = vadd.f32 %v4449_v4, %v4291_v26  ;;  %4846 = vmatmul.bf16.gmra.mxu3 %v9078_v15  ;;  %5043 = vmatmul.bf16.gmra.mxu0 %v9094_v18  ;;  %v9168_v4 = vld [vmem:[%s11957_s3 + $0x318] sm:$0xff]  ;;  %v9112_v15 = vld [vmem:[%s11337_s23 + $0x108] sm:$0xff] }
 0x3f4   : > { %5823 = vmatpush.bf16.msrb.mxu0 %v9168_v4 }
 0x3f5   : > { %5437 = vmatmul.bf16.gmra.mxu2 %v9126_v24  ;;  %5240 = vmatmul.bf16.gmra.mxu1 %v9110_v25  ;;  %v11680_v29 = vadd.f32 %v4647_v13, %v4488_v28  ;;  %v9128_v13 = vld [vmem:[%s11337_s23 + $0x110] sm:$0xff] }
 0x3f6   : > { %v4058_v30 = vpop.f32.mrf.mxu3 }
 0x3f7   : > { %v4095_v32 = vadd.f32 %v4058_v30, %v11636_v36  ;;  %v9185_v36 = vld [vmem:[%s11957_s3 + $0x360] sm:$0xff] }
 0x3f8   : > { %v4650_v49 = vpop.f32.mrf.mxu2  ;;  %v4257_v33 = vpop.f32.mrf.mxu0  ;;  %6019 = vmatpush.bf16.msrb.mxu1 %v9185_v36  ;;  %v9081_v36 = vld [vmem:[%s11337_s23 + $0xc8] sm:$0xff] }
 0x3f9   : > { %v4292_v51 = vadd.f32 %v4255_v19, %v4095_v32 }
 0x3fa   : > { %v4454_v34 = vpop.f32.mrf.mxu1 }
 0x3fb   : > { %v4489_v38 = vadd.f32 %v4452_v27, %v4292_v51  ;;  %v9199_v51 = vld [vmem:[%s11957_s3 + $0x390] sm:$0xff] }
 0x3fc   : > { %6218 = vmatpush.bf16.msrb.mxu2 %v9199_v51 }
 0x3fd   : > { %v11686_v39 = vadd.f32 %v4650_v49, %v4489_v38 }
 0x3fe   : > { %v4060_v43 = vpop.f32.mrf.mxu3 }
 0x3ff   : > { %v4096_v7 = vadd.f32 %v4060_v43, %v11643_v46  ;;  %v9152_v46 = vld [vmem:[%s11957_s3 + $0x2d8] sm:$0xff]  ;;  %v9097_v43 = vld [vmem:[%s11337_s23 + $0xd0] sm:$0xff] }
 0x400   : > { %v4652_v47 = vpop.f32.mrf.mxu2  ;;  %v4260_v52 = vpop.f32.mrf.mxu0  ;;  %5625 = vmatpush.bf16.msrb.mxu3 %v9152_v46 }
 0x401   : > { %v4293_v56 = vadd.f32 %v4257_v33, %v4096_v7 }
 0x402   : > { %v4457_v57 = vpop.f32.mrf.mxu1 }
 0x403   : > { %v4490_v58 = vadd.f32 %v4454_v34, %v4293_v56  ;;  %4851 = vmatmul.bf16.gmra.mxu3 %v9079_v48  ;;  %5048 = vmatmul.bf16.gmra.mxu0 %v9095_v50  ;;  %v9167_v34 = vld [vmem:[%s11957_s3 + $0x310] sm:$0xff] }
 0x404   : > { %5824 = vmatpush.bf16.msrb.mxu0 %v9167_v34  ;;  %v9113_v48 = vld [vmem:[%s11337_s23 + $0x110] sm:$0xff] }
 0x405   : > { %5442 = vmatmul.bf16.gmra.mxu2 %v9127_v53  ;;  %5245 = vmatmul.bf16.gmra.mxu1 %v9111_v55  ;;  %v11702_v8 = vadd.f32 %v4652_v47, %v4490_v58  ;;  %v9129_v47 = vld [vmem:[%s11337_s23 + $0x118] sm:$0xff] }
 0x406   : > { %v4063_v44 = vpop.f32.mrf.mxu3 }
 0x407   : > { %v4097_v59 = vadd.f32 %v4063_v44, %v11535_v61  ;;  %v9184_v61 = vld [vmem:[%s11957_s3 + $0x358] sm:$0xff] }
 0x408   : > { %v4655_v63 = vpop.f32.mrf.mxu2  ;;  %v4262_v20 = vpop.f32.mrf.mxu0  ;;  %6020 = vmatpush.bf16.msrb.mxu1 %v9184_v61  ;;  %v9082_v61 = vld [vmem:[%s11337_s23 + $0xd0] sm:$0xff] }
 0x409   : > { %v4294_v21 = vadd.f32 %v4260_v52, %v4097_v59 }
 0x40a   : > { %v4459_v0 = vpop.f32.mrf.mxu1 }
 0x40b   : > { %v4491_v2 = vadd.f32 %v4457_v57, %v4294_v21  ;;  %v9198_v21 = vld [vmem:[%s11957_s3 + $0x388] sm:$0xff] }
 0x40c   : > { %6219 = vmatpush.bf16.msrb.mxu2 %v9198_v21  ;;  %v9100_v21 = vld [vmem:[%s11337_s23 + $0xe8] sm:$0xff] }
 0x40d   : > { %v11708_v3 = vadd.f32 %v4655_v63, %v4491_v2 }
 0x40e   : > { %v4065_v5 = vpop.f32.mrf.mxu3 }
 0x40f   : > { %v4098_v9 = vadd.f32 %v4065_v5, %v11550_v16  ;;  %v9151_v16 = vld [vmem:[%s11957_s3 + $0x2d0] sm:$0xff]  ;;  %v9098_v5 = vld [vmem:[%s11337_s23 + $0xd8] sm:$0xff] }
 0x410   : > { %v4657_v17 = vpop.f32.mrf.mxu2  ;;  %v4265_v11 = vpop.f32.mrf.mxu0  ;;  %5626 = vmatpush.bf16.msrb.mxu3 %v9151_v16 }
 0x411   : > { %v4295_v18 = vadd.f32 %v4262_v20, %v4098_v9 }
 0x412   : > { %v4462_v19 = vpop.f32.mrf.mxu1 }
 0x413   : > { %v4492_v24 = vadd.f32 %v4459_v0, %v4295_v18  ;;  %4856 = vmatmul.bf16.gmra.mxu3 %v9080_v10  ;;  %5053 = vmatmul.bf16.gmra.mxu0 %v9096_v40  ;;  %v9166_v0 = vld [vmem:[%s11957_s3 + $0x308] sm:$0xff]  ;;  %v9114_v10 = vld [vmem:[%s11337_s23 + $0x118] sm:$0xff] }
 0x414   : > { %5825 = vmatpush.bf16.msrb.mxu0 %v9166_v0 }
 0x415   : > { %5447 = vmatmul.bf16.gmra.mxu2 %v9128_v13  ;;  %5250 = vmatmul.bf16.gmra.mxu1 %v9112_v15  ;;  %v11724_v25 = vadd.f32 %v4657_v17, %v4492_v24  ;;  %v9130_v17 = vld [vmem:[%s11337_s23 + $0x120] sm:$0xff] }
 0x416   : > { %v4068_v26 = vpop.f32.mrf.mxu3 }
 0x417   : > { %v4099_v27 = vadd.f32 %v4068_v26, %v11555_v14  ;;  %v9183_v14 = vld [vmem:[%s11957_s3 + $0x350] sm:$0xff] }
 0x418   : > { %v4660_v28 = vpop.f32.mrf.mxu2  ;;  %v4267_v23 = vpop.f32.mrf.mxu0  ;;  %6021 = vmatpush.bf16.msrb.mxu1 %v9183_v14  ;;  %v9083_v14 = vld [vmem:[%s11337_s23 + $0xd8] sm:$0xff] }
 0x419   : > { %v4296_v30 = vadd.f32 %v4265_v11, %v4099_v27 }
 0x41a   : > { %v4464_v32 = vpop.f32.mrf.mxu1 }
 0x41b   : > { %v4493_v49 = vadd.f32 %v4462_v19, %v4296_v30  ;;  %v9197_v30 = vld [vmem:[%s11957_s3 + $0x380] sm:$0xff] }
 0x41c   : > { %6220 = vmatpush.bf16.msrb.mxu2 %v9197_v30 }
 0x41d   : > { %v11730_v33 = vadd.f32 %v4660_v28, %v4493_v49 }
 0x41e   : > { %v4070_v38 = vpop.f32.mrf.mxu3 }
 0x41f   : > { %v4100_v41 = vadd.f32 %v4070_v38, %v11570_v31  ;;  %v9150_v31 = vld [vmem:[%s11957_s3 + $0x2c8] sm:$0xff]  ;;  %v9099_v38 = vld [vmem:[%s11337_s23 + $0xe0] sm:$0xff] }
 0x420   : > { %v4662_v42 = vpop.f32.mrf.mxu2  ;;  %v4270_v7 = vpop.f32.mrf.mxu0  ;;  %5627 = vmatpush.bf16.msrb.mxu3 %v9150_v31 }
 0x421   : > { %v4297_v50 = vadd.f32 %v4267_v23, %v4100_v41 }
 0x422   : > { %v4467_v52 = vpop.f32.mrf.mxu1 }
 0x423   : > { %v4494_v53 = vadd.f32 %v4464_v32, %v4297_v50  ;;  %4861 = vmatmul.bf16.gmra.mxu3 %v9081_v36  ;;  %5058 = vmatmul.bf16.gmra.mxu0 %v9097_v43  ;;  %v9165_v32 = vld [vmem:[%s11957_s3 + $0x300] sm:$0xff] }
 0x424   : > { %5826 = vmatpush.bf16.msrb.mxu0 %v9165_v32  ;;  %v9115_v36 = vld [vmem:[%s11337_s23 + $0x120] sm:$0xff] }
 0x425   : > { %5452 = vmatmul.bf16.gmra.mxu2 %v9129_v47  ;;  %5255 = vmatmul.bf16.gmra.mxu1 %v9113_v48  ;;  %v11746_v55 = vadd.f32 %v4662_v42, %v4494_v53  ;;  %v9131_v42 = vld [vmem:[%s11337_s23 + $0x128] sm:$0xff] }
 0x426   : > { %v4073_v56 = vpop.f32.mrf.mxu3 }
 0x427   : > { %v4101_v57 = vadd.f32 %v4073_v56, %v11575_v37  ;;  %v9182_v37 = vld [vmem:[%s11957_s3 + $0x348] sm:$0xff] }
 0x428   : > { %v4665_v58 = vpop.f32.mrf.mxu2  ;;  %v4272_v46 = vpop.f32.mrf.mxu0  ;;  %6022 = vmatpush.bf16.msrb.mxu1 %v9182_v37  ;;  %v9132_v37 = vld [vmem:[%s11337_s23 + $0x130] sm:$0xff] }
 0x429   : > { %v4298_v44 = vadd.f32 %v4270_v7, %v4101_v57 }
 0x42a   : > { %v4469_v59 = vpop.f32.mrf.mxu1 }
 0x42b   : > { %v4495_v63 = vadd.f32 %v4467_v52, %v4298_v44 }
 0x42d   : > { %v11752_v20 = vadd.f32 %v4665_v58, %v4495_v63  ;;  %v9084_v63 = vld [vmem:[%s11337_s23 + $0xe0] sm:$0xff] }
 0x42e   : > { %v4075_v2 = vpop.f32.mrf.mxu3 }
 0x42f   : > { %v4102_v1 = vadd.f32 %v4075_v2, %v11590_v54  ;;  %v9149_v54 = vld [vmem:[%s11957_s3 + $0x2c0] sm:$0xff]  ;;  %v9116_v2 = vld [vmem:[%s11337_s23 + $0x128] sm:$0xff] }
 0x430   : > { %v4667_v4 = vpop.f32.mrf.mxu2  ;;  %v4275_v9 = vpop.f32.mrf.mxu0  ;;  %5628 = vmatpush.bf16.msrb.mxu3 %v9149_v54 }
 0x431   : > { %v4299_v40 = vadd.f32 %v4272_v46, %v4102_v1 }
 0x432   : > { %v4472_v11 = vpop.f32.mrf.mxu1 }
 0x433   : > { %v4496_v13 = vadd.f32 %v4469_v59, %v4299_v40  ;;  %4866 = vmatmul.bf16.gmra.mxu3 %v9082_v61  ;;  %5063 = vmatmul.bf16.gmra.mxu0 %v9098_v5 }
 0x435   : > { %5457 = vmatmul.bf16.gmra.mxu2 %v9130_v17  ;;  %5260 = vmatmul.bf16.gmra.mxu1 %v9114_v10  ;;  %v11768_v15 = vadd.f32 %v4667_v4, %v4496_v13 }
 0x436   : > { %v4078_v18 = vpop.f32.mrf.mxu3 }
 0x437   : > { %v4103_v19 = vadd.f32 %v4078_v18, %v11595_v60  ;;  %v9181_v60 = vld [vmem:[%s11957_s3 + $0x340] sm:$0xff] }
 0x438   : > { %v4670_v24 = vpop.f32.mrf.mxu2  ;;  %v4277_v16 = vpop.f32.mrf.mxu0  ;;  %6023 = vmatpush.bf16.msrb.mxu1 %v9181_v60 }
 0x439   : > { %v4300_v26 = vadd.f32 %v4275_v9, %v4103_v19 }
 0x43a   : > { %v4474_v27 = vpop.f32.mrf.mxu1 }
 0x43b   : > { %v4497_v28 = vadd.f32 %v4472_v11, %v4300_v26 }
 0x43d   : > { %v11774_v23 = vadd.f32 %v4670_v24, %v4497_v28  ;;  %v9141_v24 = vld [vmem:[%s11337_s23 + $0x100] sm:$0xff]  ;;  %v9173_v28 = vld [vmem:[%s11337_s23 + $0x148] sm:$0xff] }
 0x43e   : > { %v4080_v49 = vpop.f32.mrf.mxu3 }
 0x43f   : > { %v4104_v51 = vadd.f32 %v4080_v49, %v11610_v12 }
 0x440   : > { %v4672_v34 = vpop.f32.mrf.mxu2  ;;  %v4280_v41 = vpop.f32.mrf.mxu0 }
 0x441   : > { %v4301_v43 = vadd.f32 %v4277_v16, %v4104_v51  ;;  %v9157_v16 = vld [vmem:[%s11337_s23 + $0x140] sm:$0xff] }
 0x442   : > { %v4477_v7 = vpop.f32.mrf.mxu1 }
 0x443   : > { %v4498_v47 = vadd.f32 %v4474_v27, %v4301_v43  ;;  %4871 = vmatmul.bf16.gmra.mxu3 %v9083_v14  ;;  %5068 = vmatmul.bf16.gmra.mxu0 %v9099_v38  ;;  %v9189_v27 = vld [vmem:[%s11337_s23 + $0x150] sm:$0xff] }
 0x445   : > { %5462 = vmatmul.bf16.gmra.mxu2 %v9131_v42  ;;  %5265 = vmatmul.bf16.gmra.mxu1 %v9115_v36  ;;  %v11790_v12 = vadd.f32 %v4672_v34, %v4498_v47  ;;  %v9142_v47 = vld [vmem:[%s11337_s23 + $0x108] sm:$0xff] }
 0x446   : > { %v4083_v48 = vpop.f32.mrf.mxu3 }
 0x447   : > { %v4105_v50 = vadd.f32 %v4083_v48, %v11617_v22  ;;  %v9158_v48 = vld [vmem:[%s11337_s23 + $0x148] sm:$0xff] }
 0x448   : > { %v4675_v52 = vpop.f32.mrf.mxu2  ;;  %v4282_v53 = vpop.f32.mrf.mxu0 }
 0x449   : > { %v4302_v31 = vadd.f32 %v4280_v41, %v4105_v50 }
 0x44a   : > { %v4479_v56 = vpop.f32.mrf.mxu1 }
 0x44b   : > { %v4499_v57 = vadd.f32 %v4477_v7, %v4302_v31 }
 0x44d   : > { %v11793_v58 = vadd.f32 %v4675_v52, %v4499_v57  ;;  %v9190_v52 = vld [vmem:[%s11337_s23 + $0x158] sm:$0xff] }
 0x44e   : > { %v4085_v46 = vpop.f32.mrf.mxu3 }
 0x44f   : > { %v4106_v44 = vadd.f32 %v4085_v46, %v11634_v35 }
 0x450   : > { %v4677_v59 = vpop.f32.mrf.mxu2  ;;  %v4285_v0 = vpop.f32.mrf.mxu0 }
 0x451   : > { %v4303_v1 = vadd.f32 %v4282_v53, %v4106_v44  ;;  %v9174_v53 = vld [vmem:[%s11337_s23 + $0x150] sm:$0xff] }
 0x452   : > { %v4482_v4 = vpop.f32.mrf.mxu1 }
 0x453   : > { %v4500_v61 = vadd.f32 %v4479_v56, %v4303_v1  ;;  %4876 = vmatmul.bf16.gmra.mxu3 %v9084_v63  ;;  %5073 = vmatmul.bf16.gmra.mxu0 %v9100_v21 }
 0x455   : > { %5467 = vmatmul.bf16.gmra.mxu2 %v9132_v37  ;;  %5270 = vmatmul.bf16.gmra.mxu1 %v9116_v2  ;;  %v11800_v22 = vadd.f32 %v4677_v59, %v4500_v61  ;;  %v9143_v61 = vld [vmem:[%s11337_s23 + $0x110] sm:$0xff] }
 0x456   : > { %v4088_v35 = vpop.f32.mrf.mxu3 }
 0x457   : > { %v4107_v5 = vadd.f32 %v4088_v35, %v11641_v45  ;;  %v9159_v35 = vld [vmem:[%s11337_s23 + $0x150] sm:$0xff] }
 0x458   : > { %v4680_v9 = vpop.f32.mrf.mxu2  ;;  %v4287_v17 = vpop.f32.mrf.mxu0 }
 0x459   : > { %v4304_v10 = vadd.f32 %v4285_v0, %v4107_v5 }
 0x45a   : > { %v4484_v40 = vpop.f32.mrf.mxu1 }
 0x45b   : > { %v4501_v11 = vadd.f32 %v4482_v4, %v4304_v10 }
 0x45d   : > { %v11803_v13 = vadd.f32 %v4680_v9, %v4501_v11  ;;  %v9191_v9 = vld [vmem:[%s11337_s23 + $0x160] sm:$0xff] }
 0x45e   : > { %v4090_v54 = vpop.f32.mrf.mxu3 }
 0x45f   : > { %v4108_v18 = vadd.f32 %v4090_v54, %v11658_v62 }
 0x460   : > { %v4682_v19 = vpop.f32.mrf.mxu2  ;;  %v5039_v26 = vpop.f32.mrf.mxu0 }
 0x461   : > { %v4305_v30 = vadd.f32 %v4287_v17, %v4108_v18  ;;  %v9175_v17 = vld [vmem:[%s11337_s23 + $0x158] sm:$0xff] }
 0x462   : > { %v5236_v32 = vpop.f32.mrf.mxu1 }
 0x463   : > { %v4502_v60 = vadd.f32 %v4484_v40, %v4305_v30  ;;  %5629 = vmatmul.bf16.vlgmr.msrb.gmra.mxu3 %v9141_v24  ;;  %5827 = vmatmul.bf16.vlgmr.msrb.gmra.mxu0 %v9157_v16 }
 0x465   : > { %6221 = vmatmul.bf16.vlgmr.msrb.gmra.mxu2 %v9189_v27  ;;  %6024 = vmatmul.bf16.vlgmr.msrb.gmra.mxu1 %v9173_v28  ;;  %v11810_v45 = vadd.f32 %v4682_v19, %v4502_v60  ;;  %v9144_v60 = vld [vmem:[%s11337_s23 + $0x118] sm:$0xff] }
 0x466   : > { %v4842_v62 = vpop.f32.mrf.mxu3 }
 0x467   : > { %v4882_v49 = vadd.f32 %v4842_v62, %v11664_v6  ;;  %v9160_v62 = vld [vmem:[%s11337_s23 + $0x158] sm:$0xff] }
 0x468   : > { %v5433_v51 = vpop.f32.mrf.mxu2  ;;  %v5041_v34 = vpop.f32.mrf.mxu0 }
 0x469   : > { %v5079_v14 = vadd.f32 %v5039_v26, %v4882_v49 }
 0x46a   : > { %v5238_v38 = vpop.f32.mrf.mxu1 }
 0x46b   : > { %v5276_v41 = vadd.f32 %v5236_v32, %v5079_v14 }
 0x46d   : > { %v11813_v42 = vadd.f32 %v5433_v51, %v5276_v41  ;;  %v9192_v51 = vld [vmem:[%s11337_s23 + $0x168] sm:$0xff] }
 0x46e   : > { %v4844_v36 = vpop.f32.mrf.mxu3 }
 0x46f   : > { %v4883_v43 = vadd.f32 %v4844_v36, %v11680_v29 }
 0x470   : > { %v5435_v7 = vpop.f32.mrf.mxu2  ;;  %v5044_v50 = vpop.f32.mrf.mxu0 }
 0x471   : > { %v5080_v31 = vadd.f32 %v5041_v34, %v4883_v43  ;;  %v9176_v34 = vld [vmem:[%s11337_s23 + $0x160] sm:$0xff] }
 0x472   : > { %v5241_v56 = vpop.f32.mrf.mxu1 }
 0x473   : > { %v5277_v57 = vadd.f32 %v5238_v38, %v5080_v31  ;;  %5634 = vmatmul.bf16.gmra.mxu3 %v9142_v47  ;;  %5832 = vmatmul.bf16.gmra.mxu0 %v9158_v48 }
 0x475   : > { %6226 = vmatmul.bf16.gmra.mxu2 %v9190_v52  ;;  %6029 = vmatmul.bf16.gmra.mxu1 %v9174_v53  ;;  %v11820_v6 = vadd.f32 %v5435_v7, %v5277_v57  ;;  %v9145_v57 = vld [vmem:[%s11337_s23 + $0x120] sm:$0xff] }
 0x476   : > { %v4847_v29 = vpop.f32.mrf.mxu3 }
 0x477   : > { %v4884_v46 = vadd.f32 %v4847_v29, %v11686_v39  ;;  %v9161_v29 = vld [vmem:[%s11337_s23 + $0x160] sm:$0xff] }
 0x478   : > { %v5438_v44 = vpop.f32.mrf.mxu2  ;;  %v5046_v59 = vpop.f32.mrf.mxu0 }
 0x479   : > { %v5081_v63 = vadd.f32 %v5044_v50, %v4884_v46 }
 0x47a   : > { %v5243_v21 = vpop.f32.mrf.mxu1 }
 0x47b   : > { %v5278_v0 = vadd.f32 %v5241_v56, %v5081_v63 }
 0x47d   : > { %v11823_v37 = vadd.f32 %v5438_v44, %v5278_v0  ;;  %v9193_v44 = vld [vmem:[%s11337_s23 + $0x170] sm:$0xff] }
 0x47e   : > { %v4849_v2 = vpop.f32.mrf.mxu3 }
 0x47f   : > { %v4885_v1 = vadd.f32 %v4849_v2, %v11702_v8 }
 0x480   : > { %v5440_v4 = vpop.f32.mrf.mxu2  ;;  %v5049_v5 = vpop.f32.mrf.mxu0 }
 0x481   : > { %v5082_v10 = vadd.f32 %v5046_v59, %v4885_v1  ;;  %v9177_v59 = vld [vmem:[%s11337_s23 + $0x168] sm:$0xff] }
 0x482   : > { %v5246_v40 = vpop.f32.mrf.mxu1 }
 0x483   : > { %v5279_v11 = vadd.f32 %v5243_v21, %v5082_v10  ;;  %5639 = vmatmul.bf16.gmra.mxu3 %v9143_v61  ;;  %5837 = vmatmul.bf16.gmra.mxu0 %v9159_v35 }
 0x485   : > { %6231 = vmatmul.bf16.gmra.mxu2 %v9191_v9  ;;  %6034 = vmatmul.bf16.gmra.mxu1 %v9175_v17  ;;  %v11830_v39 = vadd.f32 %v5440_v4, %v5279_v11  ;;  %v9146_v11 = vld [vmem:[%s11337_s23 + $0x128] sm:$0xff] }
 0x486   : > { %v4852_v8 = vpop.f32.mrf.mxu3 }
 0x487   : > { %v4886_v54 = vadd.f32 %v4852_v8, %v11708_v3  ;;  %v9162_v8 = vld [vmem:[%s11337_s23 + $0x168] sm:$0xff] }
 0x488   : > { %v5443_v18 = vpop.f32.mrf.mxu2  ;;  %v5051_v19 = vpop.f32.mrf.mxu0 }
 0x489   : > { %v5083_v24 = vadd.f32 %v5049_v5, %v4886_v54 }
 0x48a   : > { %v5248_v16 = vpop.f32.mrf.mxu1 }
 0x48b   : > { %v5280_v26 = vadd.f32 %v5246_v40, %v5083_v24 }
 0x48d   : > { %v11833_v27 = vadd.f32 %v5443_v18, %v5280_v26  ;;  %v9194_v18 = vld [vmem:[%s11337_s23 + $0x178] sm:$0xff] }
 0x48e   : > { %v4854_v28 = vpop.f32.mrf.mxu3 }
 0x48f   : > { %v4887_v30 = vadd.f32 %v4854_v28, %v11724_v25 }
 0x490   : > { %v5445_v32 = vpop.f32.mrf.mxu2  ;;  %v5054_v49 = vpop.f32.mrf.mxu0 }
 0x491   : > { %v5084_v14 = vadd.f32 %v5051_v19, %v4887_v30  ;;  %v9178_v19 = vld [vmem:[%s11337_s23 + $0x170] sm:$0xff] }
 0x492   : > { %v5251_v38 = vpop.f32.mrf.mxu1 }
 0x493   : > { %v5281_v41 = vadd.f32 %v5248_v16, %v5084_v14  ;;  %5644 = vmatmul.bf16.gmra.mxu3 %v9144_v60  ;;  %5842 = vmatmul.bf16.gmra.mxu0 %v9160_v62 }
 0x495   : > { %6236 = vmatmul.bf16.gmra.mxu2 %v9192_v51  ;;  %6039 = vmatmul.bf16.gmra.mxu1 %v9176_v34  ;;  %v11840_v3 = vadd.f32 %v5445_v32, %v5281_v41  ;;  %v9147_v41 = vld [vmem:[%s11337_s23 + $0x130] sm:$0xff] }
 0x496   : > { %v4857_v25 = vpop.f32.mrf.mxu3 }
 0x497   : > { %v4888_v36 = vadd.f32 %v4857_v25, %v11730_v33  ;;  %v9163_v25 = vld [vmem:[%s11337_s23 + $0x170] sm:$0xff] }
 0x498   : > { %v5448_v43 = vpop.f32.mrf.mxu2  ;;  %v5056_v7 = vpop.f32.mrf.mxu0 }
 0x499   : > { %v5085_v47 = vadd.f32 %v5054_v49, %v4888_v36 }
 0x49a   : > { %v5253_v48 = vpop.f32.mrf.mxu1 }
 0x49b   : > { %v5282_v50 = vadd.f32 %v5251_v38, %v5085_v47 }
 0x49d   : > { %v11843_v52 = vadd.f32 %v5448_v43, %v5282_v50  ;;  %v9195_v43 = vld [vmem:[%s11337_s23 + $0x180] sm:$0xff] }
 0x49e   : > { %v4859_v53 = vpop.f32.mrf.mxu3 }
 0x49f   : > { %v4889_v31 = vadd.f32 %v4859_v53, %v11746_v55 }
 0x4a0   : > { %v5450_v56 = vpop.f32.mrf.mxu2  ;;  %v5059_v46 = vpop.f32.mrf.mxu0 }
 0x4a1   : > { %v5086_v63 = vadd.f32 %v5056_v7, %v4889_v31  ;;  %v9179_v7 = vld [vmem:[%s11337_s23 + $0x178] sm:$0xff] }
 0x4a2   : > { %v5256_v21 = vpop.f32.mrf.mxu1 }
 0x4a3   : > { %v5283_v0 = vadd.f32 %v5253_v48, %v5086_v63  ;;  %5649 = vmatmul.bf16.gmra.mxu3 %v9145_v57  ;;  %5847 = vmatmul.bf16.gmra.mxu0 %v9161_v29 }
 0x4a5   : > { %6241 = vmatmul.bf16.gmra.mxu2 %v9193_v44  ;;  %6044 = vmatmul.bf16.gmra.mxu1 %v9177_v59  ;;  %v11850_v33 = vadd.f32 %v5450_v56, %v5283_v0  ;;  %v9148_v0 = vld [vmem:[%s11337_s23 + $0x138] sm:$0xff] }
 0x4a6   : > { %v4862_v55 = vpop.f32.mrf.mxu3 }
 0x4a7   : > { %v4890_v2 = vadd.f32 %v4862_v55, %v11752_v20  ;;  %v9164_v55 = vld [vmem:[%s11337_s23 + $0x178] sm:$0xff] }
 0x4a8   : > { %v5453_v1 = vpop.f32.mrf.mxu2  ;;  %v5061_v4 = vpop.f32.mrf.mxu0 }
 0x4a9   : > { %v5087_v61 = vadd.f32 %v5059_v46, %v4890_v2 }
 0x4aa   : > { %v5258_v35 = vpop.f32.mrf.mxu1 }
 0x4ab   : > { %v5284_v5 = vadd.f32 %v5256_v21, %v5087_v61 }
 0x4ad   : > { %v11853_v9 = vadd.f32 %v5453_v1, %v5284_v5  ;;  %v9196_v1 = vld [vmem:[%s11337_s23 + $0x188] sm:$0xff] }
 0x4ae   : > { %v4864_v17 = vpop.f32.mrf.mxu3 }
 0x4af   : > { %v4891_v10 = vadd.f32 %v4864_v17, %v11768_v15 }
 0x4b0   : > { %v5455_v40 = vpop.f32.mrf.mxu2  ;;  %v5064_v54 = vpop.f32.mrf.mxu0 }
 0x4b1   : > { %v5088_v24 = vadd.f32 %v5061_v4, %v4891_v10  ;;  %v9180_v4 = vld [vmem:[%s11337_s23 + $0x180] sm:$0xff]  ;;  %s8809_s23 = sshll.u32 %s9842_s24, 3  ;;  %s3353_s24 = sadd.s32 1, %s9842_s24  }
 0x4b2   : > { %v5261_v16 = vpop.f32.mrf.mxu1  ;;  %s6331_s18 = scalar_lea.vmem %s11959_s5, %s8809_s23  ;;  %p3350_p0 = scmp.ge.s32.totalorder %s3353_s24, 7  }
 0x4b3   : > { %v5285_v26 = vadd.f32 %v5258_v35, %v5088_v24  ;;  %5654 = vmatmul.bf16.gmra.mxu3 %v9146_v11  ;;  %5852 = vmatmul.bf16.gmra.mxu0 %v9162_v8 }
 0x4b5   : > { %6246 = vmatmul.bf16.gmra.mxu2 %v9194_v18  ;;  %6049 = vmatmul.bf16.gmra.mxu1 %v9178_v19  ;;  %v11860_v20 = vadd.f32 %v5455_v40, %v5285_v26 }
 0x4b6   : > { %v4867_v15 = vpop.f32.mrf.mxu3 }
 0x4b7   : > { %v4892_v28 = vadd.f32 %v4867_v15, %v11774_v23 }
 0x4b8   : > { %v5458_v30 = vpop.f32.mrf.mxu2  ;;  %v5066_v32 = vpop.f32.mrf.mxu0 }
 0x4b9   : > { %v5089_v60 = vadd.f32 %v5064_v54, %v4892_v28 }
 0x4ba   : > { %v5263_v62 = vpop.f32.mrf.mxu1 }
 0x4bb   : > { %v5286_v49 = vadd.f32 %v5261_v16, %v5089_v60 }
 0x4bd   : > { %v11863_v51 = vadd.f32 %v5458_v30, %v5286_v49 }
 0x4be   : > { %v4869_v34 = vpop.f32.mrf.mxu3 }
 0x4bf   : > { %v4893_v14 = vadd.f32 %v4869_v34, %v11790_v12 }
 0x4c0   : > { %v5460_v38 = vpop.f32.mrf.mxu2  ;;  %v5069_v36 = vpop.f32.mrf.mxu0 }
 0x4c1   : > { %v5090_v47 = vadd.f32 %v5066_v32, %v4893_v14 }
 0x4c2   : > { %v5266_v48 = vpop.f32.mrf.mxu1 }
 0x4c3   : > { %v5287_v50 = vadd.f32 %v5263_v62, %v5090_v47  ;;  %5659 = vmatmul.bf16.gmra.mxu3 %v9147_v41  ;;  %5857 = vmatmul.bf16.gmra.mxu0 %v9163_v25 }
 0x4c5   : > { %6251 = vmatmul.bf16.gmra.mxu2 %v9195_v43  ;;  %6054 = vmatmul.bf16.gmra.mxu1 %v9179_v7  ;;  %v11870_v23 = vadd.f32 %v5460_v38, %v5287_v50 }
 0x4c6   : > { %v4872_v12 = vpop.f32.mrf.mxu3 }
 0x4c7   : > { %v4894_v53 = vadd.f32 %v4872_v12, %v11793_v58 }
 0x4c8   : > { %v5463_v31 = vpop.f32.mrf.mxu2  ;;  %v5071_v56 = vpop.f32.mrf.mxu0 }
 0x4c9   : > { %v5091_v57 = vadd.f32 %v5069_v36, %v4894_v53  ;;  %v11898_v36 = vld [vmem:[%s6331_s18] sm:$0xff] }
 0x4ca   : > { %v5268_v29 = vpop.f32.mrf.mxu1  ;;  %v6341_v53 = vperm.slane %v11898_v36, 0 }
 0x4cb   : > { %v5288_v46 = vadd.f32 %v5266_v48, %v5091_v57 }
 0x4cd   : > { %v11873_v44 = vadd.f32 %v5463_v31, %v5288_v46 }
 0x4ce   : > { %v4874_v59 = vpop.f32.mrf.mxu3 }
 0x4cf   : > { %v4895_v63 = vadd.f32 %v4874_v59, %v11800_v22 }
 0x4d0   : > { %v5465_v21 = vpop.f32.mrf.mxu2  ;;  %v5074_v2 = vpop.f32.mrf.mxu0 }
 0x4d1   : > { %v5092_v61 = vadd.f32 %v5071_v56, %v4895_v63 }
 0x4d2   : > { %v5271_v35 = vpop.f32.mrf.mxu1 }
 0x4d3   : > { %v5289_v5 = vadd.f32 %v5268_v29, %v5092_v61  ;;  %5664 = vmatmul.bf16.gmra.mxu3 %v9148_v0  ;;  %5862 = vmatmul.bf16.gmra.mxu0 %v9164_v55 }
 0x4d5   : > { %6256 = vmatmul.bf16.gmra.mxu2 %v9196_v1  ;;  %6059 = vmatmul.bf16.gmra.mxu1 %v9180_v4  ;;  %v11880_v58 = vadd.f32 %v5465_v21, %v5289_v5  ;;  %v6334_v5 = vrot.slane %v11898_v36, 1 }
 0x4d6   : > { %v4877_v17 = vpop.f32.mrf.mxu3 }
 0x4d7   : > { %v4896_v10 = vadd.f32 %v4877_v17, %v11803_v13 }
 0x4d8   : > { %v5468_v40 = vpop.f32.mrf.mxu2  ;;  %v5076_v22 = vpop.f32.mrf.mxu0 }
 0x4d9   : > { %v5093_v11 = vadd.f32 %v5074_v2, %v4896_v10 }
 0x4da   : > { %v5273_v8 = vpop.f32.mrf.mxu1 }
 0x4db   : > { %v5290_v54 = vadd.f32 %v5271_v35, %v5093_v11 }
 0x4dd   : > { %v11883_v18 = vadd.f32 %v5468_v40, %v5290_v54 }
 0x4de   : > { %v4879_v19 = vpop.f32.mrf.mxu3 }
 0x4df   : > { %v4897_v24 = vadd.f32 %v4879_v19, %v11810_v45  ;;  %v11893_v45 = vld [vmem:[%s11958_s4] ss:$0 sm:$0xff]  ;;  %v6342_v19 = vperm.slane %v6334_v5, 0  ;;  %v6336_v5 = vrot.slane %v11898_v36, 3 }
 0x4e0   : > { %v5470_v16 = vpop.f32.mrf.mxu2  ;;  %v5828_v26 = vpop.f32.mrf.mxu0 }
 0x4e1   : > { %v5094_v15 = vadd.f32 %v5076_v22, %v4897_v24 }
 0x4e2   : > { %v6025_v28 = vpop.f32.mrf.mxu1 }
 0x4e3   : > { %v5291_v30 = vadd.f32 %v5273_v8, %v5094_v15 }
 0x4e5   : > { %v11886_v32 = vadd.f32 %v5470_v16, %v5291_v30 }
 0x4e6   : > { %v5630_v60 = vpop.f32.mrf.mxu3 }
 0x4e7   : > { %v5670_v13 = vadd.f32 %v5630_v60, %v11813_v42 }
 0x4e8   : > { %v6222_v62 = vpop.f32.mrf.mxu2  ;;  %v5830_v49 = vpop.f32.mrf.mxu0 }
 0x4e9   : > { %v5868_v34 = vadd.f32 %v5828_v26, %v5670_v13 }
 0x4ea   : > { %v6027_v14 = vpop.f32.mrf.mxu1 }
 0x4eb   : > { %v6065_v38 = vadd.f32 %v6025_v28, %v5868_v34 }
 0x4ed   : > { %v6262_v41 = vadd.f32 %v6222_v62, %v6065_v38 }
 0x4ee   : > { %v5632_v25 = vpop.f32.mrf.mxu3 }
 0x4ef   : > { %v6282_v42 = vadd.f32 %v11893_v45, %v6262_v41  ;;  %v5671_v43 = vadd.f32 %v5632_v25, %v11820_v6 }
 0x4f0   : > { %v6224_v7 = vpop.f32.mrf.mxu2  ;;  %v5833_v47 = vpop.f32.mrf.mxu0 }
 0x4f1   : > { %v5869_v48 = vadd.f32 %v5830_v49, %v5671_v43  ;;  %v6298_v12 = vmul.f32 0.3, %v6282_v42 }
 0x4f2   : > { %v6030_v50 = vpop.f32.mrf.mxu1 }
 0x4f3   : > { %v6066_v31 = vadd.f32 %v6027_v14, %v5869_v48  ;;  %v6314_v56 = vmax.f32 %v6282_v42, %v6298_v12  ;;  %v6335_v42 = vrot.slane %v11898_v36, 2 }
 0x4f5   : > { %v6263_v57 = vadd.f32 %v6224_v7, %v6066_v31  ;;  %v6357_v29 = vmul.f32 %v6341_v53, %v6314_v56  ;;  %v6343_v31 = vperm.slane %v6335_v42, 0 }
 0x4f6   : > { %v5635_v46 = vpop.f32.mrf.mxu3 }
 0x4f7   : > { %v6283_v59 = vadd.f32 %v11893_v45, %v6263_v57  ;;  %v5672_v63 = vadd.f32 %v5635_v46, %v11823_v37  ;;  %6373 = vadd.xlane.f32.xlu0 %v6357_v29 }
 0x4f8   : > { %v6227_v21 = vpop.f32.mrf.mxu2  ;;  %v5835_v0 = vpop.f32.mrf.mxu0 }
 0x4f9   : > { %v6299_v6 = vmul.f32 0.3, %v6283_v59  ;;  %v5870_v55 = vadd.f32 %v5833_v47, %v5672_v63 }
 0x4fa   : > { %v6032_v2 = vpop.f32.mrf.mxu1 }
 0x4fb   : > { %v6067_v1 = vadd.f32 %v6030_v50, %v5870_v55  ;;  %v6315_v4 = vmax.f32 %v6283_v59, %v6299_v6 }
 0x4fd   : > { %v6264_v61 = vadd.f32 %v6227_v21, %v6067_v1  ;;  %v6358_v35 = vmul.f32 %v6341_v53, %v6315_v4 }
 0x4fe   : > { %v5637_v17 = vpop.f32.mrf.mxu3 }
 0x4ff   : > { %v6284_v10 = vadd.f32 %v11893_v45, %v6264_v61  ;;  %v5673_v40 = vadd.f32 %v5637_v17, %v11830_v39  ;;  %6375 = vadd.xlane.f32.xlu0 %v6358_v35 }
 0x500   : > { %v6229_v22 = vpop.f32.mrf.mxu2  ;;  %v5838_v37 = vpop.f32.mrf.mxu0 }
 0x501   : > { %v5871_v11 = vadd.f32 %v5835_v0, %v5673_v40  ;;  %v6300_v54 = vmul.f32 0.3, %v6284_v10 }
 0x502   : > { %v6035_v8 = vpop.f32.mrf.mxu1 }
 0x503   : > { %v6068_v24 = vadd.f32 %v6032_v2, %v5871_v11  ;;  %v6316_v16 = vmax.f32 %v6284_v10, %v6300_v54  ;;  %v6344_v54 = vperm.slane %v6336_v5, 0 }
 0x505   : > { %v6265_v26 = vadd.f32 %v6229_v22, %v6068_v24  ;;  %v6359_v15 = vmul.f32 %v6342_v19, %v6316_v16 }
 0x506   : > { %v5640_v28 = vpop.f32.mrf.mxu3 }
 0x507   : > { %v6285_v30 = vadd.f32 %v11893_v45, %v6265_v26  ;;  %v5674_v60 = vadd.f32 %v5640_v28, %v11833_v27  ;;  %6377 = vadd.xlane.f32.xlu1 %v6359_v15 }
 0x508   : > { %v6232_v13 = vpop.f32.mrf.mxu2  ;;  %v5840_v62 = vpop.f32.mrf.mxu0 }
 0x509   : > { %v6301_v39 = vmul.f32 0.3, %v6285_v30  ;;  %v5872_v49 = vadd.f32 %v5838_v37, %v5674_v60 }
 0x50a   : > { %v6037_v34 = vpop.f32.mrf.mxu1 }
 0x50b   : > { %v6069_v14 = vadd.f32 %v6035_v8, %v5872_v49  ;;  %v6317_v38 = vmax.f32 %v6285_v30, %v6301_v39 }
 0x50d   : > { %v6266_v41 = vadd.f32 %v6232_v13, %v6069_v14  ;;  %v6360_v25 = vmul.f32 %v6342_v19, %v6317_v38 }
 0x50e   : > { %v5642_v43 = vpop.f32.mrf.mxu3 }
 0x50f   : > { %v6286_v7 = vadd.f32 %v11893_v45, %v6266_v41  ;;  %v5675_v47 = vadd.f32 %v5642_v43, %v11840_v3  ;;  %6379 = vadd.xlane.f32.xlu1 %v6360_v25  ;;  %v6337_v41 = vrot.slane %v11898_v36, 4 }
 0x510   : > { %v6234_v48 = vpop.f32.mrf.mxu2  ;;  %v5843_v27 = vpop.f32.mrf.mxu0 }
 0x511   : > { %v5873_v50 = vadd.f32 %v5840_v62, %v5675_v47  ;;  %v6302_v53 = vmul.f32 0.3, %v6286_v7 }
 0x512   : > { %v6040_v12 = vpop.f32.mrf.mxu1 }
 0x513   : > { %v6070_v56 = vadd.f32 %v6037_v34, %v5873_v50  ;;  %v6318_v57 = vmax.f32 %v6286_v7, %v6302_v53  ;;  %v6345_v50 = vperm.slane %v6337_v41, 0 }
 0x515   : > { %v6267_v29 = vadd.f32 %v6234_v48, %v6070_v56  ;;  %v6361_v46 = vmul.f32 %v6343_v31, %v6318_v57 }
 0x516   : > { %v5645_v59 = vpop.f32.mrf.mxu3 }
 0x517   : > { %v6287_v63 = vadd.f32 %v11893_v45, %v6267_v29  ;;  %v5676_v21 = vadd.f32 %v5645_v59, %v11843_v52  ;;  %6381 = vadd.xlane.f32.xlu2 %v6361_v46 }
 0x518   : > { %v6237_v0 = vpop.f32.mrf.mxu2  ;;  %v5845_v6 = vpop.f32.mrf.mxu0 }
 0x519   : > { %v6303_v3 = vmul.f32 0.3, %v6287_v63  ;;  %v5874_v55 = vadd.f32 %v5843_v27, %v5676_v21 }
 0x51a   : > { %v6042_v2 = vpop.f32.mrf.mxu1 }
 0x51b   : > { %v6071_v1 = vadd.f32 %v6040_v12, %v5874_v55  ;;  %v6319_v4 = vmax.f32 %v6287_v63, %v6303_v3 }
 0x51d   : > { %v6268_v61 = vadd.f32 %v6237_v0, %v6071_v1  ;;  %v6362_v35 = vmul.f32 %v6343_v31, %v6319_v4  ;;  %v6338_v1 = vrot.slane %v11898_v36, 5 }
 0x51e   : > { %v5647_v17 = vpop.f32.mrf.mxu3 }
 0x51f   : > { %v6288_v10 = vadd.f32 %v11893_v45, %v6268_v61  ;;  %v5677_v40 = vadd.f32 %v5647_v17, %v11850_v33  ;;  %6383 = vadd.xlane.f32.xlu2 %v6362_v35 }
 0x520   : > { %v6239_v22 = vpop.f32.mrf.mxu2  ;;  %v5848_v52 = vpop.f32.mrf.mxu0 }
 0x521   : > { %v6304_v37 = vmul.f32 0.3, %v6288_v10  ;;  %v5875_v11 = vadd.f32 %v5845_v6, %v5677_v40 }
 0x522   : > { %v6045_v8 = vpop.f32.mrf.mxu1 }
 0x523   : > { %v6072_v19 = vadd.f32 %v6042_v2, %v5875_v11  ;;  %v6320_v24 = vmax.f32 %v6288_v10, %v6304_v37  ;;  %v6346_v10 = vperm.slane %v6338_v1, 0 }
 0x525   : > { %v6269_v16 = vadd.f32 %v6239_v22, %v6072_v19  ;;  %v6363_v26 = vmul.f32 %v6344_v54, %v6320_v24 }
 0x526   : > { %v5650_v15 = vpop.f32.mrf.mxu3 }
 0x527   : > { %v6289_v28 = vadd.f32 %v11893_v45, %v6269_v16  ;;  %v5678_v30 = vadd.f32 %v5650_v15, %v11853_v9  ;;  %6385 = vadd.xlane.f32.xlu0 %v6363_v26 }
 0x528   : > { %v6242_v60 = vpop.f32.mrf.mxu2  ;;  %v5850_v13 = vpop.f32.mrf.mxu0 }
 0x529   : > { %v6305_v33 = vmul.f32 0.3, %v6289_v28  ;;  %v5876_v62 = vadd.f32 %v5848_v52, %v5678_v30 }
 0x52a   : > { %v6047_v39 = vpop.f32.mrf.mxu1 }
 0x52b   : > { %v6073_v49 = vadd.f32 %v6045_v8, %v5876_v62  ;;  %v6321_v34 = vmax.f32 %v6289_v28, %v6305_v33  ;;  %v6339_v33 = vrot.slane %v11898_v36, 6 }
 0x52d   : > { %v6270_v14 = vadd.f32 %v6242_v60, %v6073_v49  ;;  %v6364_v38 = vmul.f32 %v6344_v54, %v6321_v34  ;;  %v6347_v41 = vperm.slane %v6339_v33, 0  ;;  %v6419_v33 = vld [vmem:[%s11963_s7] sm:$0xff] }
 0x52e   : > { %v5652_v25 = vpop.f32.mrf.mxu3 }
 0x52f   : > { %v6290_v42 = vadd.f32 %v11893_v45, %v6270_v14  ;;  %v5679_v43 = vadd.f32 %v5652_v25, %v11860_v20  ;;  %6387 = vadd.xlane.f32.xlu1 %v6364_v38 }
 0x530   : > { %v6244_v7 = vpop.f32.mrf.mxu2  ;;  %v5853_v9 = vpop.f32.mrf.mxu0 }
 0x531   : > { %v6306_v47 = vmul.f32 0.3, %v6290_v42  ;;  %v5877_v48 = vadd.f32 %v5850_v13, %v5679_v43 }
 0x532   : > { %v6050_v27 = vpop.f32.mrf.mxu1 }
 0x533   : > { %v6074_v12 = vadd.f32 %v6047_v39, %v5877_v48  ;;  %v6322_v53 = vmax.f32 %v6290_v42, %v6306_v47 }
 0x535   : > { %v6271_v31 = vadd.f32 %v6244_v7, %v6074_v12  ;;  %v6365_v56 = vmul.f32 %v6345_v50, %v6322_v53 }
 0x536   : > { %v5655_v57 = vpop.f32.mrf.mxu3 }
 0x537   : > { %v6291_v29 = vadd.f32 %v11893_v45, %v6271_v31  ;;  %v5680_v46 = vadd.f32 %v5655_v57, %v11863_v51  ;;  %6389 = vadd.xlane.f32.xlu2 %v6365_v56 }
 0x538   : > { %v6247_v59 = vpop.f32.mrf.mxu2  ;;  %v5855_v63 = vpop.f32.mrf.mxu0 }
 0x539   : > { %v6307_v20 = vmul.f32 0.3, %v6291_v29  ;;  %v5878_v21 = vadd.f32 %v5853_v9, %v5680_v46  ;;  %v6340_v46 = vrot.slane %v11898_v36, 7 }
 0x53a   : > { %v6052_v0 = vpop.f32.mrf.mxu1 }
 0x53b   : > { %v6075_v6 = vadd.f32 %v6050_v27, %v5878_v21  ;;  %v6323_v3 = vmax.f32 %v6291_v29, %v6307_v20 }
 0x53d   : > { %v6272_v55 = vadd.f32 %v6247_v59, %v6075_v6  ;;  %v6366_v2 = vmul.f32 %v6345_v50, %v6323_v3  ;;  %v6348_v6 = vperm.slane %v6340_v46, 0 }
 0x53e   : > { %v5657_v4 = vpop.f32.mrf.mxu3 }
 0x53f   : > { %v6292_v61 = vadd.f32 %v11893_v45, %v6272_v55  ;;  %v5681_v35 = vadd.f32 %v5657_v4, %v11870_v23  ;;  %6391 = vadd.xlane.f32.xlu0 %v6366_v2 }
 0x540   : > { %v6249_v5 = vpop.f32.mrf.mxu2  ;;  %v5858_v40 = vpop.f32.mrf.mxu0 }
 0x541   : > { %v6308_v51 = vmul.f32 0.3, %v6292_v61  ;;  %v5879_v17 = vadd.f32 %v5855_v63, %v5681_v35 }
 0x542   : > { %v6055_v37 = vpop.f32.mrf.mxu1 }
 0x543   : > { %v6076_v22 = vadd.f32 %v6052_v0, %v5879_v17  ;;  %v6324_v52 = vmax.f32 %v6292_v61, %v6308_v51 }
 0x545   : > { %v6273_v11 = vadd.f32 %v6249_v5, %v6076_v22  ;;  %v6367_v8 = vmul.f32 %v6346_v10, %v6324_v52 }
 0x546   : > { %v5660_v54 = vpop.f32.mrf.mxu3 }
 0x547   : > { %v6293_v19 = vadd.f32 %v11893_v45, %v6273_v11  ;;  %v5682_v24 = vadd.f32 %v5660_v54, %v11873_v44  ;;  %6393 = vadd.xlane.f32.xlu1 %v6367_v8 }
 0x548   : > { %v6252_v16 = vpop.f32.mrf.mxu2  ;;  %v5860_v30 = vpop.f32.mrf.mxu0 }
 0x549   : > { %v6309_v26 = vmul.f32 0.3, %v6293_v19  ;;  %v5880_v23 = vadd.f32 %v5858_v40, %v5682_v24 }
 0x54a   : > { %v6057_v62 = vpop.f32.mrf.mxu1 }
 0x54b   : > { %v6077_v15 = vadd.f32 %v6055_v37, %v5880_v23  ;;  %v6325_v28 = vmax.f32 %v6293_v19, %v6309_v26 }
 0x54d   : > { %v6274_v60 = vadd.f32 %v6252_v16, %v6077_v15  ;;  %v6368_v13 = vmul.f32 %v6346_v10, %v6325_v28 }
 0x54e   : > { %v5662_v39 = vpop.f32.mrf.mxu3 }
 0x54f   : > { %v6294_v49 = vadd.f32 %v11893_v45, %v6274_v60  ;;  %v5683_v34 = vadd.f32 %v5662_v39, %v11880_v58  ;;  %6395 = vadd.xlane.f32.xlu2 %v6368_v13 }
 0x550   : > { %v6254_v14 = vpop.f32.mrf.mxu2  ;;  %v5863_v9 = vpop.f32.mrf.mxu0 }
 0x551   : > { %v6310_v44 = vmul.f32 0.3, %v6294_v49  ;;  %v5881_v38 = vadd.f32 %v5860_v30, %v5683_v34 }
 0x552   : > { %v6060_v50 = vpop.f32.mrf.mxu1 }
 0x553   : > { %v6078_v25 = vadd.f32 %v6057_v62, %v5881_v38  ;;  %v6326_v42 = vmax.f32 %v6294_v49, %v6310_v44 }
 0x555   : > { %v6275_v43 = vadd.f32 %v6254_v14, %v6078_v25  ;;  %v6369_v7 = vmul.f32 %v6347_v41, %v6326_v42  ;;  %v6420_v25 = vld [vmem:[%s11963_s7 + $0x8] sm:$0xff] }
 0x556   : > { %v5665_v47 = vpop.f32.mrf.mxu3 }
 0x557   : > { %v6295_v48 = vadd.f32 %v11893_v45, %v6275_v43  ;;  %v5684_v27 = vadd.f32 %v5665_v47, %v11883_v18  ;;  %6397 = vadd.xlane.f32.xlu0 %v6369_v7 }
 0x558   : > { %v6257_v58 = vpop.f32.mrf.mxu2  ;;  %v5865_v21 = vpop.f32.mrf.mxu0 }
 0x559   : > { %v6311_v12 = vmul.f32 0.3, %v6295_v48  ;;  %v5882_v53 = vadd.f32 %v5863_v9, %v5684_v27 }
 0x55a   : > { %v6062_v3 = vpop.f32.mrf.mxu1 }
 0x55b   : > { %v6079_v31 = vadd.f32 %v6060_v50, %v5882_v53  ;;  %v6327_v56 = vmax.f32 %v6295_v48, %v6311_v12 }
 0x55d   : > { %v6276_v57 = vadd.f32 %v6257_v58, %v6079_v31  ;;  %v6370_v29 = vmul.f32 %v6347_v41, %v6327_v56 }
 0x55e   : > { %v5667_v59 = vpop.f32.mrf.mxu3 }
 0x55f   : > { %v6296_v63 = vadd.f32 %v11893_v45, %v6276_v57  ;;  %v5685_v20 = vadd.f32 %v5667_v59, %v11886_v32  ;;  %6399 = vadd.xlane.f32.xlu1 %v6370_v29 }
 0x560   : > { %v6259_v1 = vpop.f32.mrf.mxu2 }
 0x561   : > { %v6312_v0 = vmul.f32 0.3, %v6296_v63  ;;  %v5883_v18 = vadd.f32 %v5865_v21, %v5685_v20 }
 0x563   : > { %v6080_v55 = vadd.f32 %v6062_v3, %v5883_v18  ;;  %v6328_v2 = vmax.f32 %v6296_v63, %v6312_v0 }
 0x565   : > { %v6277_v4 = vadd.f32 %v6259_v1, %v6080_v55  ;;  %v6371_v61 = vmul.f32 %v6348_v6, %v6328_v2 }
 0x567   : > { %v6297_v35 = vadd.f32 %v11893_v45, %v6277_v4  ;;  %6401 = vadd.xlane.f32.xlu2 %v6371_v61 }
 0x569   : > { %v6313_v36 = vmul.f32 0.3, %v6297_v35 }
 0x56a   : > { %v6374_v17 = vpop.xlane.xlu0 %6373 }
 0x56b   : > { %v6329_v5 = vmax.f32 %v6297_v35, %v6313_v36 }
 0x56d   : > { %v6372_v51 = vmul.f32 %v6348_v6, %v6329_v5 }
 0x56f   : > { %6403 = vadd.xlane.f32.xlu0 %v6372_v51 }
 0x572   : > { %v6376_v40 = vpop.xlane.xlu0 %6375 }
 0x57a   : > { %v6378_v10 = vpop.xlane.xlu1 %6377 }
 0x57b   : > { %v6405_v19 = vadd.f32 %v6378_v10, %v6374_v17 }
 0x582   : > { %v6380_v52 = vpop.xlane.xlu1 %6379 }
 0x583   : > { %v6412_v28 = vadd.f32 %v6380_v52, %v6376_v40 }
 0x58a   : > { %v6382_v32 = vpop.xlane.xlu2 %6381 }
 0x58b   : > { %v6406_v24 = vadd.f32 %v6405_v19, %v6382_v32 }
 0x592   : > { %v6384_v22 = vpop.xlane.xlu2 %6383 }
 0x593   : > { %v6413_v60 = vadd.f32 %v6412_v28, %v6384_v22 }
 0x59a   : > { %v6386_v37 = vpop.xlane.xlu0 %6385 }
 0x59b   : > { %v6407_v26 = vadd.f32 %v6406_v24, %v6386_v37 }
 0x5a2   : > { %v6388_v8 = vpop.xlane.xlu1 %6387 }
 0x5a3   : > { %v6414_v39 = vadd.f32 %v6413_v60, %v6388_v8 }
 0x5aa   : > { %v6390_v11 = vpop.xlane.xlu2 %6389 }
 0x5ab   : > { %v6408_v23 = vadd.f32 %v6407_v26, %v6390_v11 }
 0x5b2   : > { %v6392_v54 = vpop.xlane.xlu0 %6391 }
 0x5b3   : > { %v6415_v34 = vadd.f32 %v6414_v39, %v6392_v54 }
 0x5ba   : > { %v6394_v45 = vpop.xlane.xlu1 %6393 }
 0x5bb   : > { %v6409_v30 = vadd.f32 %v6408_v23, %v6394_v45 }
 0x5c2   : > { %v6396_v16 = vpop.xlane.xlu2 %6395 }
 0x5c3   : > { %v6416_v38 = vadd.f32 %v6415_v34, %v6396_v16 }
 0x5ca   : > { %v6398_v15 = vpop.xlane.xlu0 %6397 }
 0x5cb   : > { %v6410_v13 = vadd.f32 %v6409_v30, %v6398_v15 }
 0x5d2   : > { %v6400_v44 = vpop.xlane.xlu1 %6399 }
 0x5d3   : > { %v6417_v41 = vadd.f32 %v6416_v38, %v6400_v44 }
 0x5da   : > { %v6402_v62 = vpop.xlane.xlu2 %6401 }
 0x5db   : > { %v6411_v49 = vadd.f32 %v6410_v13, %v6402_v62 }
 0x5dd   : > { %v6421_v14 = vadd.f32 %v6419_v33, %v6411_v49 }
 0x5df   : > { %6423 = vst.msk [vmem:[%s11963_s7] sm:$0xff] %vm3345_vm1, %v6421_v14 }
 0x5e2   : > { %v6404_v42 = vpop.xlane.xlu0 %6403 }
 0x5e3   : > { %v6418_v43 = vadd.f32 %v6417_v41, %v6404_v42  ;;  %3352 = sbr.rel (!%p3350_p0) target bundleno = 739 (0x2e3), region = 112 }
 0x5e5   : > { %v6422_v7 = vadd.f32 %v6420_v25, %v6418_v43 }
 0x5e7   : > { %6424 = vst.msk [vmem:[%s11963_s7 + $0x8] sm:$0xff] %vm3345_vm1, %v6422_v7 }

</bundles_post_ra>
